<compile_context>
chip_gen: v7x
topology: tpu7x:2x2x1
jax: 0.10.0
libtpu: 0.0.40
codegen_flags: <defaults>
</compile_context>

<pallas_src>
import functools

import jax
import jax.numpy as jnp
from jax import lax
from jax.experimental import pallas as pl
from jax.experimental.pallas import tpu as pltpu


def _cross_attn_kernel(q_ref, k_ref, v_ref,
                       wq_ref, bq_ref, wk_ref, bk_ref, wv_ref, bv_ref,
                       o_ref,
                       k_s, v_s, *opt_scratch,
                       n_heads, head_dim, tkv, n_kv_blocks,
                       use_bf16_p, use_approx_recip, direct_store):
    """One (batch, query-tile) grid step.

    q_ref: (1, TQ, Dq)   k_ref/v_ref: (1, L_kv, Dkv)
    k_s/v_s: persistent VMEM (L_kv, Dq) projected K/V (compute dtype)
    opt_scratch: [(TQ, Dq) f32 accumulator] iff not direct_store
    """
    acc_ref = None if direct_store else opt_scratch[0]

    # --- K/V projections: only when entering a new batch element (qt == 0).
    # k_s / v_s persist across the query-tile axis, so later tiles reuse them.
    @pl.when(pl.program_id(1) == 0)
    def _project_kv():
        k_in = k_ref[0]                      # (L_kv, Dkv), input dtype
        v_in = v_ref[0]
        k_s[...] = (jnp.dot(k_in, wk_ref[...],
                            preferred_element_type=jnp.float32)
                    + bk_ref[...]).astype(k_s.dtype)
        v_s[...] = (jnp.dot(v_in, wv_ref[...],
                            preferred_element_type=jnp.float32)
                    + bv_ref[...]).astype(v_s.dtype)

    # --- Q projection for this query tile (1/sqrt(d) pre-folded into wq/bq).
    q_in = q_ref[0]                          # (TQ, Dq)
    q_proj = (jnp.dot(q_in, wq_ref[...],
                      preferred_element_type=jnp.float32)
              + bq_ref[...])
    q_c = q_proj.astype(k_s.dtype)           # compute dtype for the MXU

    p_dtype = jnp.bfloat16 if use_bf16_p else jnp.float32

    # --- Per-head attention, flash-style over L_kv blocks of width tkv.
    for h in range(n_heads):
        lo = h * head_dim
        hi = lo + head_dim
        q_h = q_c[:, lo:hi]                  # (TQ, d)

        m_i = l_i = acc = None
        for j in range(n_kv_blocks):
            r0 = j * tkv
            k_h = k_s[r0:r0 + tkv, lo:hi]    # (tkv, d)
            v_h = v_s[r0:r0 + tkv, lo:hi]    # (tkv, d)

            # scores: contract last dims of both operands -> no transpose.
            s = lax.dot_general(q_h, k_h, (((1,), (1,)), ((), ())),
                                preferred_element_type=jnp.float32)  # (TQ, tkv)
            m_blk = jnp.max(s, axis=-1, keepdims=True)

            if j == 0:
                m_new = m_blk
                p = jnp.exp((s - m_new).astype(p_dtype))
                l_i = jnp.sum(p.astype(jnp.float32), axis=-1, keepdims=True)
                acc = jnp.dot(p.astype(v_s.dtype), v_h,
                              preferred_element_type=jnp.float32)    # (TQ, d)
            else:
                m_new = jnp.maximum(m_i, m_blk)
                alpha = jnp.exp(m_i - m_new)                          # f32
                p = jnp.exp((s - m_new).astype(p_dtype))
                l_i = alpha * l_i + jnp.sum(p.astype(jnp.float32),
                                            axis=-1, keepdims=True)
                acc = alpha * acc + jnp.dot(p.astype(v_s.dtype), v_h,
                                            preferred_element_type=jnp.float32)
            m_i = m_new

        inv_l = pl.reciprocal(l_i, approx=use_approx_recip)
        o_h = acc * inv_l                                             # (TQ, d) f32

        if direct_store:
            # head_dim % 128 == 0: lane-aligned unmasked store, no accumulator
            # round-trip; residual added per head.
            o_ref[0, :, lo:hi] = (q_in[:, lo:hi].astype(jnp.float32) + o_h
                                  ).astype(o_ref.dtype)
        else:
            acc_ref[:, lo:hi] = o_h

    if not direct_store:
        # Residual add + single lane-dense store of the full (TQ, Dq) tile.
        o_ref[0] = (q_in.astype(jnp.float32) + acc_ref[...]).astype(o_ref.dtype)


def _device_kind():
    try:
        return jax.devices()[0].device_kind.lower()
    except Exception:
        return ""


def _vmem_limit_bytes():
    # ~70% of per-core VMEM capacity, clamped; conservative fallback works on
    # all generations (incl. v7x's 64 MiB).
    try:
        cap = pltpu.get_tpu_info().vmem_capacity_bytes
        return int(min(max(int(cap * 0.70), 32 * 1024 * 1024),
                       96 * 1024 * 1024))
    except Exception:
        return 48 * 1024 * 1024


def _pick_q_tiling(L_q, kind):
    """Returns (TQ, padded L_q)."""
    max_tq = 256 if "v7" in kind else 512     # v7x: 64 MiB VMEM -> smaller TQ
    if L_q <= max_tq:
        return L_q, L_q                       # single tile (block == full dim)
    for t in (512, 256, 128):
        if t <= max_tq and L_q % t == 0:
            return t, L_q
    t = 128                                    # pad instead of TQ = L_q fallback
    return t, ((L_q + t - 1) // t) * t


def _pick_kv_tile(L_kv, kv_block):
    if kv_block is not None:
        assert L_kv % kv_block == 0
        return kv_block
    for t in (512, 256, 128):
        if L_kv % t == 0:
            return t
    # TODO(synk): ragged L_kv would need key padding + masking; single block.
    return L_kv


def cross_attention_layer(queries, keys, values, params, n_heads, *,
                          kv_block=None):
    """Pallas CrossAttentionLayer.forward (mask=None).

    queries: (B, L_q, Dq)    keys/values: (B, L_kv, Dkv)
    params: wq (Dq,Dq), bq (1,Dq), wk (Dkv,Dq), bk (1,Dq), wv (Dkv,Dq), bv (1,Dq),
            stored as (in, out).  Pass everything in bf16 for the MXU-native path.
    """
    B, L_q, Dq = queries.shape
    _, L_kv, Dkv = keys.shape
    assert Dq % n_heads == 0
    head_dim = Dq // n_heads

    kind = _device_kind()
    TQ, L_q_pad = _pick_q_tiling(L_q, kind)
    n_qt = L_q_pad // TQ
    tkv = _pick_kv_tile(L_kv, kv_block)
    n_kv_blocks = L_kv // tkv

    compute_dtype = queries.dtype
    is_bf16 = compute_dtype == jnp.bfloat16
    # bf16 exp path only on chips with bf16 VPU/EUP (v6e / v7x); f32 on v5e-.
    old_chip = any(t in kind for t in ("v2", "v3", "v4", "v5"))
    use_bf16_p = is_bf16 and not old_chip

    # Fold 1/sqrt(head_dim) into the Q projection (host-side param transform).
    scale = 1.0 / float(head_dim) ** 0.5
    wq = params["wq"] * jnp.asarray(scale, params["wq"].dtype)
    bq = params["bq"] * jnp.asarray(scale, params["bq"].dtype)
    wk, bk = params["wk"], params["bk"]
    wv, bv = params["wv"], params["bv"]

    q_in = queries
    if L_q_pad != L_q:
        q_in = jnp.pad(queries, ((0, 0), (0, L_q_pad - L_q), (0, 0)))

    direct_store = (head_dim % 128 == 0)

    kernel = functools.partial(
        _cross_attn_kernel, n_heads=n_heads, head_dim=head_dim,
        tkv=tkv, n_kv_blocks=n_kv_blocks, use_bf16_p=use_bf16_p,
        use_approx_recip=is_bf16, direct_store=direct_store)

    scratch = [pltpu.VMEM((L_kv, Dq), compute_dtype),   # projected K (per batch)
               pltpu.VMEM((L_kv, Dq), compute_dtype)]   # projected V
    if not direct_store:
        scratch.append(pltpu.VMEM((TQ, Dq), jnp.float32))  # output accumulator

    def build(single_buffer_consts):
        const_kw = ({"pipeline_mode": pl.Buffered(1)}
                    if single_buffer_consts else {})
        in_specs = [
            pl.BlockSpec((1, TQ, Dq), lambda b, qt: (b, qt, 0)),      # queries
            # raw K/V: block index only changes with b and they are only read
            # at qt == 0 -> single-buffer to cut dead VMEM residency.
            pl.BlockSpec((1, L_kv, Dkv), lambda b, qt: (b, 0, 0), **const_kw),
            pl.BlockSpec((1, L_kv, Dkv), lambda b, qt: (b, 0, 0), **const_kw),
            # constant weights/biases: never re-fetched -> single buffer.
            pl.BlockSpec((Dq, Dq), lambda b, qt: (0, 0), **const_kw),  # wq
            pl.BlockSpec((1, Dq), lambda b, qt: (0, 0), **const_kw),   # bq
            pl.BlockSpec((Dkv, Dq), lambda b, qt: (0, 0), **const_kw), # wk
            pl.BlockSpec((1, Dq), lambda b, qt: (0, 0), **const_kw),   # bk
            pl.BlockSpec((Dkv, Dq), lambda b, qt: (0, 0), **const_kw), # wv
            pl.BlockSpec((1, Dq), lambda b, qt: (0, 0), **const_kw),   # bv
        ]
        grid_spec = pltpu.PrefetchScalarGridSpec(
            num_scalar_prefetch=0,
            grid=(B, n_qt),
            in_specs=in_specs,
            out_specs=pl.BlockSpec((1, TQ, Dq), lambda b, qt: (b, qt, 0)),
            scratch_shapes=scratch,
        )
        # TODO(synk): on v7x with B < num TensorCores the batch-parallel
        # sharding idles a core; a qt-parallel variant would need a per-core
        # K/V projection guard (k_s/v_s persistence relies on sequential qt).
        return pl.pallas_call(
            kernel,
            out_shape=jax.ShapeDtypeStruct((B, L_q_pad, Dq), compute_dtype),
            grid_spec=grid_spec,
            compiler_params=pltpu.CompilerParams(
                dimension_semantics=("parallel", "arbitrary"),
                vmem_limit_bytes=_vmem_limit_bytes(),
            ),
        )

    args = (q_in, keys, values, wq, bq, wk, bk, wv, bv)
    try:
        out = build(True)(*args)
    except Exception:
        # Fallback if pipeline_mode=pl.Buffered(1) is unsupported in this build.
        out = build(False)(*args)

    if L_q_pad != L_q:
        out = out[:, :L_q]
    return out


def _reference(queries, keys, values, params, n_heads):
    """Pure-JAX (f32) reference mirroring the PyTorch forward."""
    B, L_q, Dq = queries.shape
    _, L_kv, _ = keys.shape
    d = Dq // n_heads
    Q = queries @ params["wq"] + params["bq"][0]
    K = keys @ params["wk"] + params["bk"][0]
    V = values @ params["wv"] + params["bv"][0]
    Q = Q.reshape(B, L_q, n_heads, d).transpose(0, 2, 1, 3)
    K = K.reshape(B, L_kv, n_heads, d).transpose(0, 2, 1, 3)
    V = V.reshape(B, L_kv, n_heads, d).transpose(0, 2, 1, 3)
    s = jnp.einsum("bhqd,bhkd->bhqk", Q, K) / (d ** 0.5)
    p = jax.nn.softmax(s, axis=-1)
    o = jnp.einsum("bhqk,bhkd->bhqd", p, V)
    o = o.transpose(0, 2, 1, 3).reshape(B, L_q, Dq)
    return queries + o


if __name__ == "__main__":
    def linear_params(kw, kb, in_dim, out_dim):
        # nn.Linear default init: U(-1/sqrt(in_dim), 1/sqrt(in_dim));
        # stored here as (in, out) so the kernel does x @ W + b.
        bound = 1.0 / (in_dim ** 0.5)
        w = jax.random.uniform(kw, (in_dim, out_dim), jnp.float32, -bound, bound)
        b = jax.random.uniform(kb, (1, out_dim), jnp.float32, -bound, bound)
        return w, b

    def make_case(seed, B, L_q, L_kv, query_dim, kv_dim):
        ks = jax.random.split(jax.random.PRNGKey(seed), 9)
        q = jax.random.normal(ks[0], (B, L_q, query_dim), jnp.float32)
        k = jax.random.normal(ks[1], (B, L_kv, kv_dim), jnp.float32)
        v = jax.random.normal(ks[2], (B, L_kv, kv_dim), jnp.float32)
        wq, bq = linear_params(ks[3], ks[4], query_dim, query_dim)
        wk, bk = linear_params(ks[5], ks[6], kv_dim, query_dim)
        wv, bv = linear_params(ks[7], ks[8], kv_dim, query_dim)
        return q, k, v, dict(wq=wq, bq=bq, wk=wk, bk=bk, wv=wv, bv=bv)

    # ---- Case 1: f32, multi-head (head_dim=8), 2 KV blocks (online softmax) ----
    q, k, v, params = make_case(0, B=2, L_q=8, L_kv=16, query_dim=32, kv_dim=16)
    out = jax.block_until_ready(
        cross_attention_layer(q, k, v, params, n_heads=4, kv_block=8))
    ref = _reference(q, k, v, params, 4)
    assert out.shape == (2, 8, 32)
    assert jnp.allclose(out, ref, atol=5e-3, rtol=5e-3), (
        float(jnp.max(jnp.abs(out - ref))))

    # ---- Case 2: bf16 fast path (MXU-native dtypes; bf16 softmax on v6e+) ----
    q16, k16, v16 = (x.astype(jnp.bfloat16) for x in (q, k, v))
    p16 = {kk: vv.astype(jnp.bfloat16) for kk, vv in params.items()}
    out16 = jax.block_until_ready(
        cross_attention_layer(q16, k16, v16, p16, n_heads=4))
    p16f = {kk: vv.astype(jnp.float32) for kk, vv in p16.items()}
    ref16 = _reference(q16.astype(jnp.float32), k16.astype(jnp.float32),
                       v16.astype(jnp.float32), p16f, 4)
    assert jnp.allclose(out16.astype(jnp.float32), ref16, atol=1e-1, rtol=1e-1), (
        float(jnp.max(jnp.abs(out16.astype(jnp.float32) - ref16))))

    # ---- Case 3: head_dim=128 -> lane-aligned direct stores, 2 KV blocks ----
    q3, k3, v3, params3 = make_case(1, B=1, L_q=8, L_kv=256,
                                    query_dim=128, kv_dim=64)
    out3 = jax.block_until_ready(
        cross_attention_layer(q3, k3, v3, params3, n_heads=1, kv_block=128))
    ref3 = _reference(q3, k3, v3, params3, 1)
    assert jnp.allclose(out3, ref3, atol=5e-3, rtol=5e-3), (
        float(jnp.max(jnp.abs(out3 - ref3))))

    print("KERNEL_OK")
</pallas_src>

<mosaic_0001>
module attributes {stable_mosaic.version = 11 : i64} {
  func.func @_cross_attn_kernel(%arg0: i32, %arg1: i32, %arg2: memref<1x8x32xf32, #tpu.memory_space<vmem>>, %arg3: memref<1x16x16xf32, #tpu.memory_space<vmem>>, %arg4: memref<1x16x16xf32, #tpu.memory_space<vmem>>, %arg5: memref<32x32xf32, #tpu.memory_space<vmem>>, %arg6: memref<1x32xf32, #tpu.memory_space<vmem>>, %arg7: memref<16x32xf32, #tpu.memory_space<vmem>>, %arg8: memref<1x32xf32, #tpu.memory_space<vmem>>, %arg9: memref<16x32xf32, #tpu.memory_space<vmem>>, %arg10: memref<1x32xf32, #tpu.memory_space<vmem>>, %arg11: memref<1x8x32xf32, #tpu.memory_space<vmem>>, %arg12: memref<16x32xf32, #tpu.memory_space<vmem>>, %arg13: memref<16x32xf32, #tpu.memory_space<vmem>>, %arg14: memref<8x32xf32, #tpu.memory_space<vmem>>) attributes {dimension_semantics = [#tpu.dimension_semantics<parallel>, #tpu.dimension_semantics<arbitrary>], iteration_bounds = array<i64: 2, 1>, scalar_prefetch = 0 : i64, scratch_operands = 3 : i64, tpu.core_type = #tpu.core_type<tc>, window_params = [{transform_indices = @transform_0, window_bounds = array<i64: 1, 8, 32>}, {pipeline_mode = #tpu.pipeline_mode<synchronous>, transform_indices = @transform_1, window_bounds = array<i64: 1, 16, 16>}, {pipeline_mode = #tpu.pipeline_mode<synchronous>, transform_indices = @transform_2, window_bounds = array<i64: 1, 16, 16>}, {pipeline_mode = #tpu.pipeline_mode<synchronous>, transform_indices = @transform_3, window_bounds = array<i64: 32, 32>}, {pipeline_mode = #tpu.pipeline_mode<synchronous>, transform_indices = @transform_4, window_bounds = array<i64: 1, 32>}, {pipeline_mode = #tpu.pipeline_mode<synchronous>, transform_indices = @transform_5, window_bounds = array<i64: 16, 32>}, {pipeline_mode = #tpu.pipeline_mode<synchronous>, transform_indices = @transform_6, window_bounds = array<i64: 1, 32>}, {pipeline_mode = #tpu.pipeline_mode<synchronous>, transform_indices = @transform_7, window_bounds = array<i64: 16, 32>}, {pipeline_mode = #tpu.pipeline_mode<synchronous>, transform_indices = @transform_8, window_bounds = array<i64: 1, 32>}, {transform_indices = @transform_9, window_bounds = array<i64: 1, 8, 32>}]} {
    %c0_i32 = arith.constant 0 : i32
    %0 = arith.cmpi eq, %arg1, %c0_i32 : i32
    %1 = arith.extui %0 : i1 to i32
    %c0_i32_0 = arith.constant 0 : i32
    %2 = arith.cmpi ne, %1, %c0_i32_0 : i32
    scf.if %2 {
      %c0_81 = arith.constant 0 : index
      %c0_82 = arith.constant 0 : index
      %c0_83 = arith.constant 0 : index
      %155 = vector.load %arg3[%c0_81, %c0_82, %c0_83] : memref<1x16x16xf32, #tpu.memory_space<vmem>>, vector<1x16x16xf32>
      %156 = vector.shape_cast %155 : vector<1x16x16xf32> to vector<16x16xf32>
      %c0_84 = arith.constant 0 : index
      %c0_85 = arith.constant 0 : index
      %c0_86 = arith.constant 0 : index
      %157 = vector.load %arg4[%c0_84, %c0_85, %c0_86] : memref<1x16x16xf32, #tpu.memory_space<vmem>>, vector<1x16x16xf32>
      %158 = vector.shape_cast %157 : vector<1x16x16xf32> to vector<16x16xf32>
      %c0_87 = arith.constant 0 : index
      %c0_88 = arith.constant 0 : index
      %159 = vector.load %arg7[%c0_87, %c0_88] : memref<16x32xf32, #tpu.memory_space<vmem>>, vector<16x32xf32>
      %cst_89 = arith.constant dense<0.000000e+00> : vector<16x32xf32>
      %160 = tpu.matmul %156, %159, %cst_89 {dimension_numbers = #tpu.dot_dimension_numbers<[1], [0], [0], [1], [0, 0, 1, 1], [], []>} : vector<16x16xf32>, vector<16x32xf32>, vector<16x32xf32> -> vector<16x32xf32>
      %c0_90 = arith.constant 0 : index
      %c0_91 = arith.constant 0 : index
      %161 = vector.load %arg8[%c0_90, %c0_91] : memref<1x32xf32, #tpu.memory_space<vmem>>, vector<1x32xf32>
      %162 = vector.broadcast %161 : vector<1x32xf32> to vector<16x32xf32>
      %163 = arith.addf %160, %162 : vector<16x32xf32>
      %c0_92 = arith.constant 0 : index
      %c0_93 = arith.constant 0 : index
      %164 = vector.load %arg12[%c0_92, %c0_93] : memref<16x32xf32, #tpu.memory_space<vmem>>, vector<16x32xf32>
      tpu.vector_store %arg12[%c0_92, %c0_93], %163 {strides = array<i32>} : memref<16x32xf32, #tpu.memory_space<vmem>>, vector<16x32xf32>,
      %c0_94 = arith.constant 0 : index
      %c0_95 = arith.constant 0 : index
      %165 = vector.load %arg9[%c0_94, %c0_95] : memref<16x32xf32, #tpu.memory_space<vmem>>, vector<16x32xf32>
      %cst_96 = arith.constant dense<0.000000e+00> : vector<16x32xf32>
      %166 = tpu.matmul %158, %165, %cst_96 {dimension_numbers = #tpu.dot_dimension_numbers<[1], [0], [0], [1], [0, 0, 1, 1], [], []>} : vector<16x16xf32>, vector<16x32xf32>, vector<16x32xf32> -> vector<16x32xf32>
      %c0_97 = arith.constant 0 : index
      %c0_98 = arith.constant 0 : index
      %167 = vector.load %arg10[%c0_97, %c0_98] : memref<1x32xf32, #tpu.memory_space<vmem>>, vector<1x32xf32>
      %168 = vector.broadcast %167 : vector<1x32xf32> to vector<16x32xf32>
      %169 = arith.addf %166, %168 : vector<16x32xf32>
      %c0_99 = arith.constant 0 : index
      %c0_100 = arith.constant 0 : index
      %170 = vector.load %arg13[%c0_99, %c0_100] : memref<16x32xf32, #tpu.memory_space<vmem>>, vector<16x32xf32>
      tpu.vector_store %arg13[%c0_99, %c0_100], %169 {strides = array<i32>} : memref<16x32xf32, #tpu.memory_space<vmem>>, vector<16x32xf32>,
    } else {
    }
    %c0 = arith.constant 0 : index
    %c0_1 = arith.constant 0 : index
    %c0_2 = arith.constant 0 : index
    %3 = vector.load %arg2[%c0, %c0_1, %c0_2] : memref<1x8x32xf32, #tpu.memory_space<vmem>>, vector<1x8x32xf32>
    %4 = vector.shape_cast %3 : vector<1x8x32xf32> to vector<8x32xf32>
    %c0_3 = arith.constant 0 : index
    %c0_4 = arith.constant 0 : index
    %5 = vector.load %arg5[%c0_3, %c0_4] : memref<32x32xf32, #tpu.memory_space<vmem>>, vector<32x32xf32>
    %cst = arith.constant dense<0.000000e+00> : vector<8x32xf32>
    %6 = tpu.matmul %4, %5, %cst {dimension_numbers = #tpu.dot_dimension_numbers<[1], [0], [0], [1], [0, 0, 1, 1], [], []>} : vector<8x32xf32>, vector<32x32xf32>, vector<8x32xf32> -> vector<8x32xf32>
    %c0_5 = arith.constant 0 : index
    %c0_6 = arith.constant 0 : index
    %7 = vector.load %arg6[%c0_5, %c0_6] : memref<1x32xf32, #tpu.memory_space<vmem>>, vector<1x32xf32>
    %8 = vector.broadcast %7 : vector<1x32xf32> to vector<8x32xf32>
    %9 = arith.addf %6, %8 : vector<8x32xf32>
    %10 = vector.extract_strided_slice %9 {offsets = [0, 0], sizes = [8, 8], strides = [1, 1]} : vector<8x32xf32> to vector<8x8xf32>
    %c0_7 = arith.constant 0 : index
    %c0_8 = arith.constant 0 : index
    %11 = vector.load %arg12[%c0_7, %c0_8] : memref<16x32xf32, #tpu.memory_space<vmem>>, vector<8x8xf32>
    %c0_9 = arith.constant 0 : index
    %c0_10 = arith.constant 0 : index
    %12 = vector.load %arg13[%c0_9, %c0_10] : memref<16x32xf32, #tpu.memory_space<vmem>>, vector<8x8xf32>
    %cst_11 = arith.constant dense<0.000000e+00> : vector<8x8xf32>
    %13 = tpu.matmul %10, %11, %cst_11 {dimension_numbers = #tpu.dot_dimension_numbers<[1], [1], [0], [0], [0, 0, 1, 0], [], []>} : vector<8x8xf32>, vector<8x8xf32>, vector<8x8xf32> -> vector<8x8xf32>
    %cst_12 = arith.constant dense<0xFF800000> : vector<8xf32>
    %14 = vector.multi_reduction <maximumf>, %13, %cst_12 [1] : vector<8x8xf32> to vector<8xf32>
    %15 = vector.shape_cast %14 : vector<8xf32> to vector<8x1xf32>
    %16 = vector.broadcast %15 : vector<8x1xf32> to vector<8x8xf32>
    %17 = arith.subf %13, %16 : vector<8x8xf32>
    %18 = math.exp %17 : vector<8x8xf32>
    %cst_13 = arith.constant dense<0.000000e+00> : vector<8xf32>
    %19 = vector.multi_reduction <add>, %18, %cst_13 [1] : vector<8x8xf32> to vector<8xf32>
    %20 = vector.shape_cast %19 : vector<8xf32> to vector<8x1xf32>
    %cst_14 = arith.constant dense<0.000000e+00> : vector<8x8xf32>
    %21 = tpu.matmul %18, %12, %cst_14 {dimension_numbers = #tpu.dot_dimension_numbers<[1], [0], [0], [1], [0, 0, 1, 1], [], []>} : vector<8x8xf32>, vector<8x8xf32>, vector<8x8xf32> -> vector<8x8xf32>
    %c8 = arith.constant 8 : index
    %c0_15 = arith.constant 0 : index
    %22 = vector.load %arg12[%c8, %c0_15] : memref<16x32xf32, #tpu.memory_space<vmem>>, vector<8x8xf32>
    %c8_16 = arith.constant 8 : index
    %c0_17 = arith.constant 0 : index
    %23 = vector.load %arg13[%c8_16, %c0_17] : memref<16x32xf32, #tpu.memory_space<vmem>>, vector<8x8xf32>
    %cst_18 = arith.constant dense<0.000000e+00> : vector<8x8xf32>
    %24 = tpu.matmul %10, %22, %cst_18 {dimension_numbers = #tpu.dot_dimension_numbers<[1], [1], [0], [0], [0, 0, 1, 0], [], []>} : vector<8x8xf32>, vector<8x8xf32>, vector<8x8xf32> -> vector<8x8xf32>
    %cst_19 = arith.constant dense<0xFF800000> : vector<8xf32>
    %25 = vector.multi_reduction <maximumf>, %24, %cst_19 [1] : vector<8x8xf32> to vector<8xf32>
    %26 = vector.shape_cast %25 : vector<8xf32> to vector<8x1xf32>
    %27 = arith.maximumf %15, %26 : vector<8x1xf32>
    %28 = arith.subf %15, %27 : vector<8x1xf32>
    %29 = math.exp %28 : vector<8x1xf32>
    %30 = vector.broadcast %27 : vector<8x1xf32> to vector<8x8xf32>
    %31 = arith.subf %24, %30 : vector<8x8xf32>
    %32 = math.exp %31 : vector<8x8xf32>
    %33 = arith.mulf %29, %20 : vector<8x1xf32>
    %cst_20 = arith.constant dense<0.000000e+00> : vector<8xf32>
    %34 = vector.multi_reduction <add>, %32, %cst_20 [1] : vector<8x8xf32> to vector<8xf32>
    %35 = vector.shape_cast %34 : vector<8xf32> to vector<8x1xf32>
    %36 = arith.addf %33, %35 : vector<8x1xf32>
    %37 = vector.broadcast %29 : vector<8x1xf32> to vector<8x8xf32>
    %38 = arith.mulf %37, %21 : vector<8x8xf32>
    %cst_21 = arith.constant dense<0.000000e+00> : vector<8x8xf32>
    %39 = tpu.matmul %32, %23, %cst_21 {dimension_numbers = #tpu.dot_dimension_numbers<[1], [0], [0], [1], [0, 0, 1, 1], [], []>} : vector<8x8xf32>, vector<8x8xf32>, vector<8x8xf32> -> vector<8x8xf32>
    %40 = arith.addf %38, %39 : vector<8x8xf32>
    %41 = tpu.reciprocal %36 : vector<8x1xf32> -> vector<8x1xf32>
    %42 = vector.broadcast %41 : vector<8x1xf32> to vector<8x8xf32>
    %43 = arith.mulf %40, %42 : vector<8x8xf32>
    %c0_22 = arith.constant 0 : index
    %c0_23 = arith.constant 0 : index
    %44 = vector.load %arg14[%c0_22, %c0_23] : memref<8x32xf32, #tpu.memory_space<vmem>>, vector<8x8xf32>
    tpu.vector_store %arg14[%c0_22, %c0_23], %43 {strides = array<i32>} : memref<8x32xf32, #tpu.memory_space<vmem>>, vector<8x8xf32>,
    %45 = vector.extract_strided_slice %9 {offsets = [0, 8], sizes = [8, 8], strides = [1, 1]} : vector<8x32xf32> to vector<8x8xf32>
    %c0_24 = arith.constant 0 : index
    %c8_25 = arith.constant 8 : index
    %46 = vector.load %arg12[%c0_24, %c8_25] : memref<16x32xf32, #tpu.memory_space<vmem>>, vector<8x8xf32>
    %c0_26 = arith.constant 0 : index
    %c8_27 = arith.constant 8 : index
    %47 = vector.load %arg13[%c0_26, %c8_27] : memref<16x32xf32, #tpu.memory_space<vmem>>, vector<8x8xf32>
    %cst_28 = arith.constant dense<0.000000e+00> : vector<8x8xf32>
    %48 = tpu.matmul %45, %46, %cst_28 {dimension_numbers = #tpu.dot_dimension_numbers<[1], [1], [0], [0], [0, 0, 1, 0], [], []>} : vector<8x8xf32>, vector<8x8xf32>, vector<8x8xf32> -> vector<8x8xf32>
    %cst_29 = arith.constant dense<0xFF800000> : vector<8xf32>
    %49 = vector.multi_reduction <maximumf>, %48, %cst_29 [1] : vector<8x8xf32> to vector<8xf32>
    %50 = vector.shape_cast %49 : vector<8xf32> to vector<8x1xf32>
    %51 = vector.broadcast %50 : vector<8x1xf32> to vector<8x8xf32>
    %52 = arith.subf %48, %51 : vector<8x8xf32>
    %53 = math.exp %52 : vector<8x8xf32>
    %cst_30 = arith.constant dense<0.000000e+00> : vector<8xf32>
    %54 = vector.multi_reduction <add>, %53, %cst_30 [1] : vector<8x8xf32> to vector<8xf32>
    %55 = vector.shape_cast %54 : vector<8xf32> to vector<8x1xf32>
    %cst_31 = arith.constant dense<0.000000e+00> : vector<8x8xf32>
    %56 = tpu.matmul %53, %47, %cst_31 {dimension_numbers = #tpu.dot_dimension_numbers<[1], [0], [0], [1], [0, 0, 1, 1], [], []>} : vector<8x8xf32>, vector<8x8xf32>, vector<8x8xf32> -> vector<8x8xf32>
    %c8_32 = arith.constant 8 : index
    %c8_33 = arith.constant 8 : index
    %57 = vector.load %arg12[%c8_32, %c8_33] : memref<16x32xf32, #tpu.memory_space<vmem>>, vector<8x8xf32>
    %c8_34 = arith.constant 8 : index
    %c8_35 = arith.constant 8 : index
    %58 = vector.load %arg13[%c8_34, %c8_35] : memref<16x32xf32, #tpu.memory_space<vmem>>, vector<8x8xf32>
    %cst_36 = arith.constant dense<0.000000e+00> : vector<8x8xf32>
    %59 = tpu.matmul %45, %57, %cst_36 {dimension_numbers = #tpu.dot_dimension_numbers<[1], [1], [0], [0], [0, 0, 1, 0], [], []>} : vector<8x8xf32>, vector<8x8xf32>, vector<8x8xf32> -> vector<8x8xf32>
    %cst_37 = arith.constant dense<0xFF800000> : vector<8xf32>
    %60 = vector.multi_reduction <maximumf>, %59, %cst_37 [1] : vector<8x8xf32> to vector<8xf32>
    %61 = vector.shape_cast %60 : vector<8xf32> to vector<8x1xf32>
    %62 = arith.maximumf %50, %61 : vector<8x1xf32>
    %63 = arith.subf %50, %62 : vector<8x1xf32>
    %64 = math.exp %63 : vector<8x1xf32>
    %65 = vector.broadcast %62 : vector<8x1xf32> to vector<8x8xf32>
    %66 = arith.subf %59, %65 : vector<8x8xf32>
    %67 = math.exp %66 : vector<8x8xf32>
    %68 = arith.mulf %64, %55 : vector<8x1xf32>
    %cst_38 = arith.constant dense<0.000000e+00> : vector<8xf32>
    %69 = vector.multi_reduction <add>, %67, %cst_38 [1] : vector<8x8xf32> to vector<8xf32>
    %70 = vector.shape_cast %69 : vector<8xf32> to vector<8x1xf32>
    %71 = arith.addf %68, %70 : vector<8x1xf32>
    %72 = vector.broadcast %64 : vector<8x1xf32> to vector<8x8xf32>
    %73 = arith.mulf %72, %56 : vector<8x8xf32>
    %cst_39 = arith.constant dense<0.000000e+00> : vector<8x8xf32>
    %74 = tpu.matmul %67, %58, %cst_39 {dimension_numbers = #tpu.dot_dimension_numbers<[1], [0], [0], [1], [0, 0, 1, 1], [], []>} : vector<8x8xf32>, vector<8x8xf32>, vector<8x8xf32> -> vector<8x8xf32>
    %75 = arith.addf %73, %74 : vector<8x8xf32>
    %76 = tpu.reciprocal %71 : vector<8x1xf32> -> vector<8x1xf32>
    %77 = vector.broadcast %76 : vector<8x1xf32> to vector<8x8xf32>
    %78 = arith.mulf %75, %77 : vector<8x8xf32>
    %c0_40 = arith.constant 0 : index
    %c8_41 = arith.constant 8 : index
    %79 = vector.load %arg14[%c0_40, %c8_41] : memref<8x32xf32, #tpu.memory_space<vmem>>, vector<8x8xf32>
    tpu.vector_store %arg14[%c0_40, %c8_41], %78 {strides = array<i32>} : memref<8x32xf32, #tpu.memory_space<vmem>>, vector<8x8xf32>,
    %80 = vector.extract_strided_slice %9 {offsets = [0, 16], sizes = [8, 8], strides = [1, 1]} : vector<8x32xf32> to vector<8x8xf32>
    %c0_42 = arith.constant 0 : index
    %c16 = arith.constant 16 : index
    %81 = vector.load %arg12[%c0_42, %c16] : memref<16x32xf32, #tpu.memory_space<vmem>>, vector<8x8xf32>
    %c0_43 = arith.constant 0 : index
    %c16_44 = arith.constant 16 : index
    %82 = vector.load %arg13[%c0_43, %c16_44] : memref<16x32xf32, #tpu.memory_space<vmem>>, vector<8x8xf32>
    %cst_45 = arith.constant dense<0.000000e+00> : vector<8x8xf32>
    %83 = tpu.matmul %80, %81, %cst_45 {dimension_numbers = #tpu.dot_dimension_numbers<[1], [1], [0], [0], [0, 0, 1, 0], [], []>} : vector<8x8xf32>, vector<8x8xf32>, vector<8x8xf32> -> vector<8x8xf32>
    %cst_46 = arith.constant dense<0xFF800000> : vector<8xf32>
    %84 = vector.multi_reduction <maximumf>, %83, %cst_46 [1] : vector<8x8xf32> to vector<8xf32>
    %85 = vector.shape_cast %84 : vector<8xf32> to vector<8x1xf32>
    %86 = vector.broadcast %85 : vector<8x1xf32> to vector<8x8xf32>
    %87 = arith.subf %83, %86 : vector<8x8xf32>
    %88 = math.exp %87 : vector<8x8xf32>
    %cst_47 = arith.constant dense<0.000000e+00> : vector<8xf32>
    %89 = vector.multi_reduction <add>, %88, %cst_47 [1] : vector<8x8xf32> to vector<8xf32>
    %90 = vector.shape_cast %89 : vector<8xf32> to vector<8x1xf32>
    %cst_48 = arith.constant dense<0.000000e+00> : vector<8x8xf32>
    %91 = tpu.matmul %88, %82, %cst_48 {dimension_numbers = #tpu.dot_dimension_numbers<[1], [0], [0], [1], [0, 0, 1, 1], [], []>} : vector<8x8xf32>, vector<8x8xf32>, vector<8x8xf32> -> vector<8x8xf32>
    %c8_49 = arith.constant 8 : index
    %c16_50 = arith.constant 16 : index
    %92 = vector.load %arg12[%c8_49, %c16_50] : memref<16x32xf32, #tpu.memory_space<vmem>>, vector<8x8xf32>
    %c8_51 = arith.constant 8 : index
    %c16_52 = arith.constant 16 : index
    %93 = vector.load %arg13[%c8_51, %c16_52] : memref<16x32xf32, #tpu.memory_space<vmem>>, vector<8x8xf32>
    %cst_53 = arith.constant dense<0.000000e+00> : vector<8x8xf32>
    %94 = tpu.matmul %80, %92, %cst_53 {dimension_numbers = #tpu.dot_dimension_numbers<[1], [1], [0], [0], [0, 0, 1, 0], [], []>} : vector<8x8xf32>, vector<8x8xf32>, vector<8x8xf32> -> vector<8x8xf32>
    %cst_54 = arith.constant dense<0xFF800000> : vector<8xf32>
    %95 = vector.multi_reduction <maximumf>, %94, %cst_54 [1] : vector<8x8xf32> to vector<8xf32>
    %96 = vector.shape_cast %95 : vector<8xf32> to vector<8x1xf32>
    %97 = arith.maximumf %85, %96 : vector<8x1xf32>
    %98 = arith.subf %85, %97 : vector<8x1xf32>
    %99 = math.exp %98 : vector<8x1xf32>
    %100 = vector.broadcast %97 : vector<8x1xf32> to vector<8x8xf32>
    %101 = arith.subf %94, %100 : vector<8x8xf32>
    %102 = math.exp %101 : vector<8x8xf32>
    %103 = arith.mulf %99, %90 : vector<8x1xf32>
    %cst_55 = arith.constant dense<0.000000e+00> : vector<8xf32>
    %104 = vector.multi_reduction <add>, %102, %cst_55 [1] : vector<8x8xf32> to vector<8xf32>
    %105 = vector.shape_cast %104 : vector<8xf32> to vector<8x1xf32>
    %106 = arith.addf %103, %105 : vector<8x1xf32>
    %107 = vector.broadcast %99 : vector<8x1xf32> to vector<8x8xf32>
    %108 = arith.mulf %107, %91 : vector<8x8xf32>
    %cst_56 = arith.constant dense<0.000000e+00> : vector<8x8xf32>
    %109 = tpu.matmul %102, %93, %cst_56 {dimension_numbers = #tpu.dot_dimension_numbers<[1], [0], [0], [1], [0, 0, 1, 1], [], []>} : vector<8x8xf32>, vector<8x8xf32>, vector<8x8xf32> -> vector<8x8xf32>
    %110 = arith.addf %108, %109 : vector<8x8xf32>
    %111 = tpu.reciprocal %106 : vector<8x1xf32> -> vector<8x1xf32>
    %112 = vector.broadcast %111 : vector<8x1xf32> to vector<8x8xf32>
    %113 = arith.mulf %110, %112 : vector<8x8xf32>
    %c0_57 = arith.constant 0 : index
    %c16_58 = arith.constant 16 : index
    %114 = vector.load %arg14[%c0_57, %c16_58] : memref<8x32xf32, #tpu.memory_space<vmem>>, vector<8x8xf32>
    tpu.vector_store %arg14[%c0_57, %c16_58], %113 {strides = array<i32>} : memref<8x32xf32, #tpu.memory_space<vmem>>, vector<8x8xf32>,
    %115 = vector.extract_strided_slice %9 {offsets = [0, 24], sizes = [8, 8], strides = [1, 1]} : vector<8x32xf32> to vector<8x8xf32>
    %c0_59 = arith.constant 0 : index
    %c24 = arith.constant 24 : index
    %116 = vector.load %arg12[%c0_59, %c24] : memref<16x32xf32, #tpu.memory_space<vmem>>, vector<8x8xf32>
    %c0_60 = arith.constant 0 : index
    %c24_61 = arith.constant 24 : index
    %117 = vector.load %arg13[%c0_60, %c24_61] : memref<16x32xf32, #tpu.memory_space<vmem>>, vector<8x8xf32>
    %cst_62 = arith.constant dense<0.000000e+00> : vector<8x8xf32>
    %118 = tpu.matmul %115, %116, %cst_62 {dimension_numbers = #tpu.dot_dimension_numbers<[1], [1], [0], [0], [0, 0, 1, 0], [], []>} : vector<8x8xf32>, vector<8x8xf32>, vector<8x8xf32> -> vector<8x8xf32>
    %cst_63 = arith.constant dense<0xFF800000> : vector<8xf32>
    %119 = vector.multi_reduction <maximumf>, %118, %cst_63 [1] : vector<8x8xf32> to vector<8xf32>
    %120 = vector.shape_cast %119 : vector<8xf32> to vector<8x1xf32>
    %121 = vector.broadcast %120 : vector<8x1xf32> to vector<8x8xf32>
    %122 = arith.subf %118, %121 : vector<8x8xf32>
    %123 = math.exp %122 : vector<8x8xf32>
    %cst_64 = arith.constant dense<0.000000e+00> : vector<8xf32>
    %124 = vector.multi_reduction <add>, %123, %cst_64 [1] : vector<8x8xf32> to vector<8xf32>
    %125 = vector.shape_cast %124 : vector<8xf32> to vector<8x1xf32>
    %cst_65 = arith.constant dense<0.000000e+00> : vector<8x8xf32>
    %126 = tpu.matmul %123, %117, %cst_65 {dimension_numbers = #tpu.dot_dimension_numbers<[1], [0], [0], [1], [0, 0, 1, 1], [], []>} : vector<8x8xf32>, vector<8x8xf32>, vector<8x8xf32> -> vector<8x8xf32>
    %c8_66 = arith.constant 8 : index
    %c24_67 = arith.constant 24 : index
    %127 = vector.load %arg12[%c8_66, %c24_67] : memref<16x32xf32, #tpu.memory_space<vmem>>, vector<8x8xf32>
    %c8_68 = arith.constant 8 : index
    %c24_69 = arith.constant 24 : index
    %128 = vector.load %arg13[%c8_68, %c24_69] : memref<16x32xf32, #tpu.memory_space<vmem>>, vector<8x8xf32>
    %cst_70 = arith.constant dense<0.000000e+00> : vector<8x8xf32>
    %129 = tpu.matmul %115, %127, %cst_70 {dimension_numbers = #tpu.dot_dimension_numbers<[1], [1], [0], [0], [0, 0, 1, 0], [], []>} : vector<8x8xf32>, vector<8x8xf32>, vector<8x8xf32> -> vector<8x8xf32>
    %cst_71 = arith.constant dense<0xFF800000> : vector<8xf32>
    %130 = vector.multi_reduction <maximumf>, %129, %cst_71 [1] : vector<8x8xf32> to vector<8xf32>
    %131 = vector.shape_cast %130 : vector<8xf32> to vector<8x1xf32>
    %132 = arith.maximumf %120, %131 : vector<8x1xf32>
    %133 = arith.subf %120, %132 : vector<8x1xf32>
    %134 = math.exp %133 : vector<8x1xf32>
    %135 = vector.broadcast %132 : vector<8x1xf32> to vector<8x8xf32>
    %136 = arith.subf %129, %135 : vector<8x8xf32>
    %137 = math.exp %136 : vector<8x8xf32>
    %138 = arith.mulf %134, %125 : vector<8x1xf32>
    %cst_72 = arith.constant dense<0.000000e+00> : vector<8xf32>
    %139 = vector.multi_reduction <add>, %137, %cst_72 [1] : vector<8x8xf32> to vector<8xf32>
    %140 = vector.shape_cast %139 : vector<8xf32> to vector<8x1xf32>
    %141 = arith.addf %138, %140 : vector<8x1xf32>
    %142 = vector.broadcast %134 : vector<8x1xf32> to vector<8x8xf32>
    %143 = arith.mulf %142, %126 : vector<8x8xf32>
    %cst_73 = arith.constant dense<0.000000e+00> : vector<8x8xf32>
    %144 = tpu.matmul %137, %128, %cst_73 {dimension_numbers = #tpu.dot_dimension_numbers<[1], [0], [0], [1], [0, 0, 1, 1], [], []>} : vector<8x8xf32>, vector<8x8xf32>, vector<8x8xf32> -> vector<8x8xf32>
    %145 = arith.addf %143, %144 : vector<8x8xf32>
    %146 = tpu.reciprocal %141 : vector<8x1xf32> -> vector<8x1xf32>
    %147 = vector.broadcast %146 : vector<8x1xf32> to vector<8x8xf32>
    %148 = arith.mulf %145, %147 : vector<8x8xf32>
    %c0_74 = arith.constant 0 : index
    %c24_75 = arith.constant 24 : index
    %149 = vector.load %arg14[%c0_74, %c24_75] : memref<8x32xf32, #tpu.memory_space<vmem>>, vector<8x8xf32>
    tpu.vector_store %arg14[%c0_74, %c24_75], %148 {strides = array<i32>} : memref<8x32xf32, #tpu.memory_space<vmem>>, vector<8x8xf32>,
    %c0_76 = arith.constant 0 : index
    %c0_77 = arith.constant 0 : index
    %150 = vector.load %arg14[%c0_76, %c0_77] : memref<8x32xf32, #tpu.memory_space<vmem>>, vector<8x32xf32>
    %151 = arith.addf %4, %150 : vector<8x32xf32>
    %c0_78 = arith.constant 0 : index
    %c0_79 = arith.constant 0 : index
    %c0_80 = arith.constant 0 : index
    %152 = vector.load %arg11[%c0_78, %c0_79, %c0_80] : memref<1x8x32xf32, #tpu.memory_space<vmem>>, vector<1x8x32xf32>
    %153 = vector.shape_cast %152 : vector<1x8x32xf32> to vector<8x32xf32>
    %154 = vector.shape_cast %151 : vector<8x32xf32> to vector<1x8x32xf32>
    tpu.vector_store %arg11[%c0_78, %c0_79, %c0_80], %154 {strides = array<i32>} : memref<1x8x32xf32, #tpu.memory_space<vmem>>, vector<1x8x32xf32>,
    return
  }
  func.func @transform_0(%arg0: i32, %arg1: i32) -> (i32, i32, i32) {
    %c0_i32 = arith.constant 0 : i32
    %c0_i32_0 = arith.constant 0 : i32
    return %arg0, %arg1, %c0_i32 : i32, i32, i32
  }
  func.func @transform_1(%arg0: i32, %arg1: i32) -> (i32, i32, i32) {
    %c0_i32 = arith.constant 0 : i32
    %c0_i32_0 = arith.constant 0 : i32
    %c0_i32_1 = arith.constant 0 : i32
    return %arg0, %c0_i32, %c0_i32_0 : i32, i32, i32
  }
  func.func @transform_2(%arg0: i32, %arg1: i32) -> (i32, i32, i32) {
    %c0_i32 = arith.constant 0 : i32
    %c0_i32_0 = arith.constant 0 : i32
    %c0_i32_1 = arith.constant 0 : i32
    return %arg0, %c0_i32, %c0_i32_0 : i32, i32, i32
  }
  func.func @transform_3(%arg0: i32, %arg1: i32) -> (i32, i32) {
    %c0_i32 = arith.constant 0 : i32
    %c0_i32_0 = arith.constant 0 : i32
    %c0_i32_1 = arith.constant 0 : i32
    return %c0_i32, %c0_i32_0 : i32, i32
  }
  func.func @transform_4(%arg0: i32, %arg1: i32) -> (i32, i32) {
    %c0_i32 = arith.constant 0 : i32
    %c0_i32_0 = arith.constant 0 : i32
    %c0_i32_1 = arith.constant 0 : i32
    return %c0_i32, %c0_i32_0 : i32, i32
  }
  func.func @transform_5(%arg0: i32, %arg1: i32) -> (i32, i32) {
    %c0_i32 = arith.constant 0 : i32
    %c0_i32_0 = arith.constant 0 : i32
    %c0_i32_1 = arith.constant 0 : i32
    return %c0_i32, %c0_i32_0 : i32, i32
  }
  func.func @transform_6(%arg0: i32, %arg1: i32) -> (i32, i32) {
    %c0_i32 = arith.constant 0 : i32
    %c0_i32_0 = arith.constant 0 : i32
    %c0_i32_1 = arith.constant 0 : i32
    return %c0_i32, %c0_i32_0 : i32, i32
  }
  func.func @transform_7(%arg0: i32, %arg1: i32) -> (i32, i32) {
    %c0_i32 = arith.constant 0 : i32
    %c0_i32_0 = arith.constant 0 : i32
    %c0_i32_1 = arith.constant 0 : i32
    return %c0_i32, %c0_i32_0 : i32, i32
  }
  func.func @transform_8(%arg0: i32, %arg1: i32) -> (i32, i32) {
    %c0_i32 = arith.constant 0 : i32
    %c0_i32_0 = arith.constant 0 : i32
    %c0_i32_1 = arith.constant 0 : i32
    return %c0_i32, %c0_i32_0 : i32, i32
  }
  func.func @transform_9(%arg0: i32, %arg1: i32) -> (i32, i32, i32) {
    %c0_i32 = arith.constant 0 : i32
    %c0_i32_0 = arith.constant 0 : i32
    return %arg0, %arg1, %c0_i32 : i32, i32, i32
  }
}

module attributes {stable_mosaic.version = 11 : i64} {
  func.func @_cross_attn_kernel(%arg0: i32, %arg1: i32, %arg2: memref<1x8x32xf32, #tpu.memory_space<vmem>>, %arg3: memref<1x16x16xf32, #tpu.memory_space<vmem>>, %arg4: memref<1x16x16xf32, #tpu.memory_space<vmem>>, %arg5: memref<32x32xf32, #tpu.memory_space<vmem>>, %arg6: memref<1x32xf32, #tpu.memory_space<vmem>>, %arg7: memref<16x32xf32, #tpu.memory_space<vmem>>, %arg8: memref<1x32xf32, #tpu.memory_space<vmem>>, %arg9: memref<16x32xf32, #tpu.memory_space<vmem>>, %arg10: memref<1x32xf32, #tpu.memory_space<vmem>>, %arg11: memref<1x8x32xf32, #tpu.memory_space<vmem>>, %arg12: memref<16x32xf32, #tpu.memory_space<vmem>>, %arg13: memref<16x32xf32, #tpu.memory_space<vmem>>, %arg14: memref<8x32xf32, #tpu.memory_space<vmem>>) attributes {dimension_semantics = [#tpu.dimension_semantics<parallel>, #tpu.dimension_semantics<arbitrary>], iteration_bounds = array<i64: 2, 1>, scalar_prefetch = 0 : i64, scratch_operands = 3 : i64, tpu.core_type = #tpu.core_type<tc>, window_params = [{transform_indices = @transform_0, window_bounds = array<i64: 1, 8, 32>}, {transform_indices = @transform_1, window_bounds = array<i64: 1, 16, 16>}, {transform_indices = @transform_2, window_bounds = array<i64: 1, 16, 16>}, {pipeline_mode = #tpu.pipeline_mode<synchronous>, transform_indices = @transform_3, window_bounds = array<i64: 32, 32>}, {pipeline_mode = #tpu.pipeline_mode<synchronous>, transform_indices = @transform_4, window_bounds = array<i64: 1, 32>}, {pipeline_mode = #tpu.pipeline_mode<synchronous>, transform_indices = @transform_5, window_bounds = array<i64: 16, 32>}, {pipeline_mode = #tpu.pipeline_mode<synchronous>, transform_indices = @transform_6, window_bounds = array<i64: 1, 32>}, {pipeline_mode = #tpu.pipeline_mode<synchronous>, transform_indices = @transform_7, window_bounds = array<i64: 16, 32>}, {pipeline_mode = #tpu.pipeline_mode<synchronous>, transform_indices = @transform_8, window_bounds = array<i64: 1, 32>}, {transform_indices = @transform_9, window_bounds = array<i64: 1, 8, 32>}]} {
    %c0_i32 = arith.constant 0 : i32
    %0 = arith.cmpi eq, %arg1, %c0_i32 : i32
    %1 = arith.extui %0 : i1 to i32
    %c0_i32_0 = arith.constant 0 : i32
    %2 = arith.cmpi ne, %1, %c0_i32_0 : i32
    scf.if %2 {
      %c0_81 = arith.constant 0 : index
      %c0_82 = arith.constant 0 : index
      %c0_83 = arith.constant 0 : index
      %155 = vector.load %arg3[%c0_81, %c0_82, %c0_83] : memref<1x16x16xf32, #tpu.memory_space<vmem>>, vector<1x16x16xf32>
      %156 = vector.shape_cast %155 : vector<1x16x16xf32> to vector<16x16xf32>
      %c0_84 = arith.constant 0 : index
      %c0_85 = arith.constant 0 : index
      %c0_86 = arith.constant 0 : index
      %157 = vector.load %arg4[%c0_84, %c0_85, %c0_86] : memref<1x16x16xf32, #tpu.memory_space<vmem>>, vector<1x16x16xf32>
      %158 = vector.shape_cast %157 : vector<1x16x16xf32> to vector<16x16xf32>
      %c0_87 = arith.constant 0 : index
      %c0_88 = arith.constant 0 : index
      %159 = vector.load %arg7[%c0_87, %c0_88] : memref<16x32xf32, #tpu.memory_space<vmem>>, vector<16x32xf32>
      %cst_89 = arith.constant dense<0.000000e+00> : vector<16x32xf32>
      %160 = tpu.matmul %156, %159, %cst_89 {dimension_numbers = #tpu.dot_dimension_numbers<[1], [0], [0], [1], [0, 0, 1, 1], [], []>} : vector<16x16xf32>, vector<16x32xf32>, vector<16x32xf32> -> vector<16x32xf32>
      %c0_90 = arith.constant 0 : index
      %c0_91 = arith.constant 0 : index
      %161 = vector.load %arg8[%c0_90, %c0_91] : memref<1x32xf32, #tpu.memory_space<vmem>>, vector<1x32xf32>
      %162 = vector.broadcast %161 : vector<1x32xf32> to vector<16x32xf32>
      %163 = arith.addf %160, %162 : vector<16x32xf32>
      %c0_92 = arith.constant 0 : index
      %c0_93 = arith.constant 0 : index
      %164 = vector.load %arg12[%c0_92, %c0_93] : memref<16x32xf32, #tpu.memory_space<vmem>>, vector<16x32xf32>
      tpu.vector_store %arg12[%c0_92, %c0_93], %163 {strides = array<i32>} : memref<16x32xf32, #tpu.memory_space<vmem>>, vector<16x32xf32>,
      %c0_94 = arith.constant 0 : index
      %c0_95 = arith.constant 0 : index
      %165 = vector.load %arg9[%c0_94, %c0_95] : memref<16x32xf32, #tpu.memory_space<vmem>>, vector<16x32xf32>
      %cst_96 = arith.constant dense<0.000000e+00> : vector<16x32xf32>
      %166 = tpu.matmul %158, %165, %cst_96 {dimension_numbers = #tpu.dot_dimension_numbers<[1], [0], [0], [1], [0, 0, 1, 1], [], []>} : vector<16x16xf32>, vector<16x32xf32>, vector<16x32xf32> -> vector<16x32xf32>
      %c0_97 = arith.constant 0 : index
      %c0_98 = arith.constant 0 : index
      %167 = vector.load %arg10[%c0_97, %c0_98] : memref<1x32xf32, #tpu.memory_space<vmem>>, vector<1x32xf32>
      %168 = vector.broadcast %167 : vector<1x32xf32> to vector<16x32xf32>
      %169 = arith.addf %166, %168 : vector<16x32xf32>
      %c0_99 = arith.constant 0 : index
      %c0_100 = arith.constant 0 : index
      %170 = vector.load %arg13[%c0_99, %c0_100] : memref<16x32xf32, #tpu.memory_space<vmem>>, vector<16x32xf32>
      tpu.vector_store %arg13[%c0_99, %c0_100], %169 {strides = array<i32>} : memref<16x32xf32, #tpu.memory_space<vmem>>, vector<16x32xf32>,
    } else {
    }
    %c0 = arith.constant 0 : index
    %c0_1 = arith.constant 0 : index
    %c0_2 = arith.constant 0 : index
    %3 = vector.load %arg2[%c0, %c0_1, %c0_2] : memref<1x8x32xf32, #tpu.memory_space<vmem>>, vector<1x8x32xf32>
    %4 = vector.shape_cast %3 : vector<1x8x32xf32> to vector<8x32xf32>
    %c0_3 = arith.constant 0 : index
    %c0_4 = arith.constant 0 : index
    %5 = vector.load %arg5[%c0_3, %c0_4] : memref<32x32xf32, #tpu.memory_space<vmem>>, vector<32x32xf32>
    %cst = arith.constant dense<0.000000e+00> : vector<8x32xf32>
    %6 = tpu.matmul %4, %5, %cst {dimension_numbers = #tpu.dot_dimension_numbers<[1], [0], [0], [1], [0, 0, 1, 1], [], []>} : vector<8x32xf32>, vector<32x32xf32>, vector<8x32xf32> -> vector<8x32xf32>
    %c0_5 = arith.constant 0 : index
    %c0_6 = arith.constant 0 : index
    %7 = vector.load %arg6[%c0_5, %c0_6] : memref<1x32xf32, #tpu.memory_space<vmem>>, vector<1x32xf32>
    %8 = vector.broadcast %7 : vector<1x32xf32> to vector<8x32xf32>
    %9 = arith.addf %6, %8 : vector<8x32xf32>
    %10 = vector.extract_strided_slice %9 {offsets = [0, 0], sizes = [8, 8], strides = [1, 1]} : vector<8x32xf32> to vector<8x8xf32>
    %c0_7 = arith.constant 0 : index
    %c0_8 = arith.constant 0 : index
    %11 = vector.load %arg12[%c0_7, %c0_8] : memref<16x32xf32, #tpu.memory_space<vmem>>, vector<8x8xf32>
    %c0_9 = arith.constant 0 : index
    %c0_10 = arith.constant 0 : index
    %12 = vector.load %arg13[%c0_9, %c0_10] : memref<16x32xf32, #tpu.memory_space<vmem>>, vector<8x8xf32>
    %cst_11 = arith.constant dense<0.000000e+00> : vector<8x8xf32>
    %13 = tpu.matmul %10, %11, %cst_11 {dimension_numbers = #tpu.dot_dimension_numbers<[1], [1], [0], [0], [0, 0, 1, 0], [], []>} : vector<8x8xf32>, vector<8x8xf32>, vector<8x8xf32> -> vector<8x8xf32>
    %cst_12 = arith.constant dense<0xFF800000> : vector<8xf32>
    %14 = vector.multi_reduction <maximumf>, %13, %cst_12 [1] : vector<8x8xf32> to vector<8xf32>
    %15 = vector.shape_cast %14 : vector<8xf32> to vector<8x1xf32>
    %16 = vector.broadcast %15 : vector<8x1xf32> to vector<8x8xf32>
    %17 = arith.subf %13, %16 : vector<8x8xf32>
    %18 = math.exp %17 : vector<8x8xf32>
    %cst_13 = arith.constant dense<0.000000e+00> : vector<8xf32>
    %19 = vector.multi_reduction <add>, %18, %cst_13 [1] : vector<8x8xf32> to vector<8xf32>
    %20 = vector.shape_cast %19 : vector<8xf32> to vector<8x1xf32>
    %cst_14 = arith.constant dense<0.000000e+00> : vector<8x8xf32>
    %21 = tpu.matmul %18, %12, %cst_14 {dimension_numbers = #tpu.dot_dimension_numbers<[1], [0], [0], [1], [0, 0, 1, 1], [], []>} : vector<8x8xf32>, vector<8x8xf32>, vector<8x8xf32> -> vector<8x8xf32>
    %c8 = arith.constant 8 : index
    %c0_15 = arith.constant 0 : index
    %22 = vector.load %arg12[%c8, %c0_15] : memref<16x32xf32, #tpu.memory_space<vmem>>, vector<8x8xf32>
    %c8_16 = arith.constant 8 : index
    %c0_17 = arith.constant 0 : index
    %23 = vector.load %arg13[%c8_16, %c0_17] : memref<16x32xf32, #tpu.memory_space<vmem>>, vector<8x8xf32>
    %cst_18 = arith.constant dense<0.000000e+00> : vector<8x8xf32>
    %24 = tpu.matmul %10, %22, %cst_18 {dimension_numbers = #tpu.dot_dimension_numbers<[1], [1], [0], [0], [0, 0, 1, 0], [], []>} : vector<8x8xf32>, vector<8x8xf32>, vector<8x8xf32> -> vector<8x8xf32>
    %cst_19 = arith.constant dense<0xFF800000> : vector<8xf32>
    %25 = vector.multi_reduction <maximumf>, %24, %cst_19 [1] : vector<8x8xf32> to vector<8xf32>
    %26 = vector.shape_cast %25 : vector<8xf32> to vector<8x1xf32>
    %27 = arith.maximumf %15, %26 : vector<8x1xf32>
    %28 = arith.subf %15, %27 : vector<8x1xf32>
    %29 = math.exp %28 : vector<8x1xf32>
    %30 = vector.broadcast %27 : vector<8x1xf32> to vector<8x8xf32>
    %31 = arith.subf %24, %30 : vector<8x8xf32>
    %32 = math.exp %31 : vector<8x8xf32>
    %33 = arith.mulf %29, %20 : vector<8x1xf32>
    %cst_20 = arith.constant dense<0.000000e+00> : vector<8xf32>
    %34 = vector.multi_reduction <add>, %32, %cst_20 [1] : vector<8x8xf32> to vector<8xf32>
    %35 = vector.shape_cast %34 : vector<8xf32> to vector<8x1xf32>
    %36 = arith.addf %33, %35 : vector<8x1xf32>
    %37 = vector.broadcast %29 : vector<8x1xf32> to vector<8x8xf32>
    %38 = arith.mulf %37, %21 : vector<8x8xf32>
    %cst_21 = arith.constant dense<0.000000e+00> : vector<8x8xf32>
    %39 = tpu.matmul %32, %23, %cst_21 {dimension_numbers = #tpu.dot_dimension_numbers<[1], [0], [0], [1], [0, 0, 1, 1], [], []>} : vector<8x8xf32>, vector<8x8xf32>, vector<8x8xf32> -> vector<8x8xf32>
    %40 = arith.addf %38, %39 : vector<8x8xf32>
    %41 = tpu.reciprocal %36 : vector<8x1xf32> -> vector<8x1xf32>
    %42 = vector.broadcast %41 : vector<8x1xf32> to vector<8x8xf32>
    %43 = arith.mulf %40, %42 : vector<8x8xf32>
    %c0_22 = arith.constant 0 : index
    %c0_23 = arith.constant 0 : index
    %44 = vector.load %arg14[%c0_22, %c0_23] : memref<8x32xf32, #tpu.memory_space<vmem>>, vector<8x8xf32>
    tpu.vector_store %arg14[%c0_22, %c0_23], %43 {strides = array<i32>} : memref<8x32xf32, #tpu.memory_space<vmem>>, vector<8x8xf32>,
    %45 = vector.extract_strided_slice %9 {offsets = [0, 8], sizes = [8, 8], strides = [1, 1]} : vector<8x32xf32> to vector<8x8xf32>
    %c0_24 = arith.constant 0 : index
    %c8_25 = arith.constant 8 : index
    %46 = vector.load %arg12[%c0_24, %c8_25] : memref<16x32xf32, #tpu.memory_space<vmem>>, vector<8x8xf32>
    %c0_26 = arith.constant 0 : index
    %c8_27 = arith.constant 8 : index
    %47 = vector.load %arg13[%c0_26, %c8_27] : memref<16x32xf32, #tpu.memory_space<vmem>>, vector<8x8xf32>
    %cst_28 = arith.constant dense<0.000000e+00> : vector<8x8xf32>
    %48 = tpu.matmul %45, %46, %cst_28 {dimension_numbers = #tpu.dot_dimension_numbers<[1], [1], [0], [0], [0, 0, 1, 0], [], []>} : vector<8x8xf32>, vector<8x8xf32>, vector<8x8xf32> -> vector<8x8xf32>
    %cst_29 = arith.constant dense<0xFF800000> : vector<8xf32>
    %49 = vector.multi_reduction <maximumf>, %48, %cst_29 [1] : vector<8x8xf32> to vector<8xf32>
    %50 = vector.shape_cast %49 : vector<8xf32> to vector<8x1xf32>
    %51 = vector.broadcast %50 : vector<8x1xf32> to vector<8x8xf32>
    %52 = arith.subf %48, %51 : vector<8x8xf32>
    %53 = math.exp %52 : vector<8x8xf32>
    %cst_30 = arith.constant dense<0.000000e+00> : vector<8xf32>
    %54 = vector.multi_reduction <add>, %53, %cst_30 [1] : vector<8x8xf32> to vector<8xf32>
    %55 = vector.shape_cast %54 : vector<8xf32> to vector<8x1xf32>
    %cst_31 = arith.constant dense<0.000000e+00> : vector<8x8xf32>
    %56 = tpu.matmul %53, %47, %cst_31 {dimension_numbers = #tpu.dot_dimension_numbers<[1], [0], [0], [1], [0, 0, 1, 1], [], []>} : vector<8x8xf32>, vector<8x8xf32>, vector<8x8xf32> -> vector<8x8xf32>
    %c8_32 = arith.constant 8 : index
    %c8_33 = arith.constant 8 : index
    %57 = vector.load %arg12[%c8_32, %c8_33] : memref<16x32xf32, #tpu.memory_space<vmem>>, vector<8x8xf32>
    %c8_34 = arith.constant 8 : index
    %c8_35 = arith.constant 8 : index
    %58 = vector.load %arg13[%c8_34, %c8_35] : memref<16x32xf32, #tpu.memory_space<vmem>>, vector<8x8xf32>
    %cst_36 = arith.constant dense<0.000000e+00> : vector<8x8xf32>
    %59 = tpu.matmul %45, %57, %cst_36 {dimension_numbers = #tpu.dot_dimension_numbers<[1], [1], [0], [0], [0, 0, 1, 0], [], []>} : vector<8x8xf32>, vector<8x8xf32>, vector<8x8xf32> -> vector<8x8xf32>
    %cst_37 = arith.constant dense<0xFF800000> : vector<8xf32>
    %60 = vector.multi_reduction <maximumf>, %59, %cst_37 [1] : vector<8x8xf32> to vector<8xf32>
    %61 = vector.shape_cast %60 : vector<8xf32> to vector<8x1xf32>
    %62 = arith.maximumf %50, %61 : vector<8x1xf32>
    %63 = arith.subf %50, %62 : vector<8x1xf32>
    %64 = math.exp %63 : vector<8x1xf32>
    %65 = vector.broadcast %62 : vector<8x1xf32> to vector<8x8xf32>
    %66 = arith.subf %59, %65 : vector<8x8xf32>
    %67 = math.exp %66 : vector<8x8xf32>
    %68 = arith.mulf %64, %55 : vector<8x1xf32>
    %cst_38 = arith.constant dense<0.000000e+00> : vector<8xf32>
    %69 = vector.multi_reduction <add>, %67, %cst_38 [1] : vector<8x8xf32> to vector<8xf32>
    %70 = vector.shape_cast %69 : vector<8xf32> to vector<8x1xf32>
    %71 = arith.addf %68, %70 : vector<8x1xf32>
    %72 = vector.broadcast %64 : vector<8x1xf32> to vector<8x8xf32>
    %73 = arith.mulf %72, %56 : vector<8x8xf32>
    %cst_39 = arith.constant dense<0.000000e+00> : vector<8x8xf32>
    %74 = tpu.matmul %67, %58, %cst_39 {dimension_numbers = #tpu.dot_dimension_numbers<[1], [0], [0], [1], [0, 0, 1, 1], [], []>} : vector<8x8xf32>, vector<8x8xf32>, vector<8x8xf32> -> vector<8x8xf32>
    %75 = arith.addf %73, %74 : vector<8x8xf32>
    %76 = tpu.reciprocal %71 : vector<8x1xf32> -> vector<8x1xf32>
    %77 = vector.broadcast %76 : vector<8x1xf32> to vector<8x8xf32>
    %78 = arith.mulf %75, %77 : vector<8x8xf32>
    %c0_40 = arith.constant 0 : index
    %c8_41 = arith.constant 8 : index
    %79 = vector.load %arg14[%c0_40, %c8_41] : memref<8x32xf32, #tpu.memory_space<vmem>>, vector<8x8xf32>
    tpu.vector_store %arg14[%c0_40, %c8_41], %78 {strides = array<i32>} : memref<8x32xf32, #tpu.memory_space<vmem>>, vector<8x8xf32>,
    %80 = vector.extract_strided_slice %9 {offsets = [0, 16], sizes = [8, 8], strides = [1, 1]} : vector<8x32xf32> to vector<8x8xf32>
    %c0_42 = arith.constant 0 : index
    %c16 = arith.constant 16 : index
    %81 = vector.load %arg12[%c0_42, %c16] : memref<16x32xf32, #tpu.memory_space<vmem>>, vector<8x8xf32>
    %c0_43 = arith.constant 0 : index
    %c16_44 = arith.constant 16 : index
    %82 = vector.load %arg13[%c0_43, %c16_44] : memref<16x32xf32, #tpu.memory_space<vmem>>, vector<8x8xf32>
    %cst_45 = arith.constant dense<0.000000e+00> : vector<8x8xf32>
    %83 = tpu.matmul %80, %81, %cst_45 {dimension_numbers = #tpu.dot_dimension_numbers<[1], [1], [0], [0], [0, 0, 1, 0], [], []>} : vector<8x8xf32>, vector<8x8xf32>, vector<8x8xf32> -> vector<8x8xf32>
    %cst_46 = arith.constant dense<0xFF800000> : vector<8xf32>
    %84 = vector.multi_reduction <maximumf>, %83, %cst_46 [1] : vector<8x8xf32> to vector<8xf32>
    %85 = vector.shape_cast %84 : vector<8xf32> to vector<8x1xf32>
    %86 = vector.broadcast %85 : vector<8x1xf32> to vector<8x8xf32>
    %87 = arith.subf %83, %86 : vector<8x8xf32>
    %88 = math.exp %87 : vector<8x8xf32>
    %cst_47 = arith.constant dense<0.000000e+00> : vector<8xf32>
    %89 = vector.multi_reduction <add>, %88, %cst_47 [1] : vector<8x8xf32> to vector<8xf32>
    %90 = vector.shape_cast %89 : vector<8xf32> to vector<8x1xf32>
    %cst_48 = arith.constant dense<0.000000e+00> : vector<8x8xf32>
    %91 = tpu.matmul %88, %82, %cst_48 {dimension_numbers = #tpu.dot_dimension_numbers<[1], [0], [0], [1], [0, 0, 1, 1], [], []>} : vector<8x8xf32>, vector<8x8xf32>, vector<8x8xf32> -> vector<8x8xf32>
    %c8_49 = arith.constant 8 : index
    %c16_50 = arith.constant 16 : index
    %92 = vector.load %arg12[%c8_49, %c16_50] : memref<16x32xf32, #tpu.memory_space<vmem>>, vector<8x8xf32>
    %c8_51 = arith.constant 8 : index
    %c16_52 = arith.constant 16 : index
    %93 = vector.load %arg13[%c8_51, %c16_52] : memref<16x32xf32, #tpu.memory_space<vmem>>, vector<8x8xf32>
    %cst_53 = arith.constant dense<0.000000e+00> : vector<8x8xf32>
    %94 = tpu.matmul %80, %92, %cst_53 {dimension_numbers = #tpu.dot_dimension_numbers<[1], [1], [0], [0], [0, 0, 1, 0], [], []>} : vector<8x8xf32>, vector<8x8xf32>, vector<8x8xf32> -> vector<8x8xf32>
    %cst_54 = arith.constant dense<0xFF800000> : vector<8xf32>
    %95 = vector.multi_reduction <maximumf>, %94, %cst_54 [1] : vector<8x8xf32> to vector<8xf32>
    %96 = vector.shape_cast %95 : vector<8xf32> to vector<8x1xf32>
    %97 = arith.maximumf %85, %96 : vector<8x1xf32>
    %98 = arith.subf %85, %97 : vector<8x1xf32>
    %99 = math.exp %98 : vector<8x1xf32>
    %100 = vector.broadcast %97 : vector<8x1xf32> to vector<8x8xf32>
    %101 = arith.subf %94, %100 : vector<8x8xf32>
    %102 = math.exp %101 : vector<8x8xf32>
    %103 = arith.mulf %99, %90 : vector<8x1xf32>
    %cst_55 = arith.constant dense<0.000000e+00> : vector<8xf32>
    %104 = vector.multi_reduction <add>, %102, %cst_55 [1] : vector<8x8xf32> to vector<8xf32>
    %105 = vector.shape_cast %104 : vector<8xf32> to vector<8x1xf32>
    %106 = arith.addf %103, %105 : vector<8x1xf32>
    %107 = vector.broadcast %99 : vector<8x1xf32> to vector<8x8xf32>
    %108 = arith.mulf %107, %91 : vector<8x8xf32>
    %cst_56 = arith.constant dense<0.000000e+00> : vector<8x8xf32>
    %109 = tpu.matmul %102, %93, %cst_56 {dimension_numbers = #tpu.dot_dimension_numbers<[1], [0], [0], [1], [0, 0, 1, 1], [], []>} : vector<8x8xf32>, vector<8x8xf32>, vector<8x8xf32> -> vector<8x8xf32>
    %110 = arith.addf %108, %109 : vector<8x8xf32>
    %111 = tpu.reciprocal %106 : vector<8x1xf32> -> vector<8x1xf32>
    %112 = vector.broadcast %111 : vector<8x1xf32> to vector<8x8xf32>
    %113 = arith.mulf %110, %112 : vector<8x8xf32>
    %c0_57 = arith.constant 0 : index
    %c16_58 = arith.constant 16 : index
    %114 = vector.load %arg14[%c0_57, %c16_58] : memref<8x32xf32, #tpu.memory_space<vmem>>, vector<8x8xf32>
    tpu.vector_store %arg14[%c0_57, %c16_58], %113 {strides = array<i32>} : memref<8x32xf32, #tpu.memory_space<vmem>>, vector<8x8xf32>,
    %115 = vector.extract_strided_slice %9 {offsets = [0, 24], sizes = [8, 8], strides = [1, 1]} : vector<8x32xf32> to vector<8x8xf32>
    %c0_59 = arith.constant 0 : index
    %c24 = arith.constant 24 : index
    %116 = vector.load %arg12[%c0_59, %c24] : memref<16x32xf32, #tpu.memory_space<vmem>>, vector<8x8xf32>
    %c0_60 = arith.constant 0 : index
    %c24_61 = arith.constant 24 : index
    %117 = vector.load %arg13[%c0_60, %c24_61] : memref<16x32xf32, #tpu.memory_space<vmem>>, vector<8x8xf32>
    %cst_62 = arith.constant dense<0.000000e+00> : vector<8x8xf32>
    %118 = tpu.matmul %115, %116, %cst_62 {dimension_numbers = #tpu.dot_dimension_numbers<[1], [1], [0], [0], [0, 0, 1, 0], [], []>} : vector<8x8xf32>, vector<8x8xf32>, vector<8x8xf32> -> vector<8x8xf32>
    %cst_63 = arith.constant dense<0xFF800000> : vector<8xf32>
    %119 = vector.multi_reduction <maximumf>, %118, %cst_63 [1] : vector<8x8xf32> to vector<8xf32>
    %120 = vector.shape_cast %119 : vector<8xf32> to vector<8x1xf32>
    %121 = vector.broadcast %120 : vector<8x1xf32> to vector<8x8xf32>
    %122 = arith.subf %118, %121 : vector<8x8xf32>
    %123 = math.exp %122 : vector<8x8xf32>
    %cst_64 = arith.constant dense<0.000000e+00> : vector<8xf32>
    %124 = vector.multi_reduction <add>, %123, %cst_64 [1] : vector<8x8xf32> to vector<8xf32>
    %125 = vector.shape_cast %124 : vector<8xf32> to vector<8x1xf32>
    %cst_65 = arith.constant dense<0.000000e+00> : vector<8x8xf32>
    %126 = tpu.matmul %123, %117, %cst_65 {dimension_numbers = #tpu.dot_dimension_numbers<[1], [0], [0], [1], [0, 0, 1, 1], [], []>} : vector<8x8xf32>, vector<8x8xf32>, vector<8x8xf32> -> vector<8x8xf32>
    %c8_66 = arith.constant 8 : index
    %c24_67 = arith.constant 24 : index
    %127 = vector.load %arg12[%c8_66, %c24_67] : memref<16x32xf32, #tpu.memory_space<vmem>>, vector<8x8xf32>
    %c8_68 = arith.constant 8 : index
    %c24_69 = arith.constant 24 : index
    %128 = vector.load %arg13[%c8_68, %c24_69] : memref<16x32xf32, #tpu.memory_space<vmem>>, vector<8x8xf32>
    %cst_70 = arith.constant dense<0.000000e+00> : vector<8x8xf32>
    %129 = tpu.matmul %115, %127, %cst_70 {dimension_numbers = #tpu.dot_dimension_numbers<[1], [1], [0], [0], [0, 0, 1, 0], [], []>} : vector<8x8xf32>, vector<8x8xf32>, vector<8x8xf32> -> vector<8x8xf32>
    %cst_71 = arith.constant dense<0xFF800000> : vector<8xf32>
    %130 = vector.multi_reduction <maximumf>, %129, %cst_71 [1] : vector<8x8xf32> to vector<8xf32>
    %131 = vector.shape_cast %130 : vector<8xf32> to vector<8x1xf32>
    %132 = arith.maximumf %120, %131 : vector<8x1xf32>
    %133 = arith.subf %120, %132 : vector<8x1xf32>
    %134 = math.exp %133 : vector<8x1xf32>
    %135 = vector.broadcast %132 : vector<8x1xf32> to vector<8x8xf32>
    %136 = arith.subf %129, %135 : vector<8x8xf32>
    %137 = math.exp %136 : vector<8x8xf32>
    %138 = arith.mulf %134, %125 : vector<8x1xf32>
    %cst_72 = arith.constant dense<0.000000e+00> : vector<8xf32>
    %139 = vector.multi_reduction <add>, %137, %cst_72 [1] : vector<8x8xf32> to vector<8xf32>
    %140 = vector.shape_cast %139 : vector<8xf32> to vector<8x1xf32>
    %141 = arith.addf %138, %140 : vector<8x1xf32>
    %142 = vector.broadcast %134 : vector<8x1xf32> to vector<8x8xf32>
    %143 = arith.mulf %142, %126 : vector<8x8xf32>
    %cst_73 = arith.constant dense<0.000000e+00> : vector<8x8xf32>
    %144 = tpu.matmul %137, %128, %cst_73 {dimension_numbers = #tpu.dot_dimension_numbers<[1], [0], [0], [1], [0, 0, 1, 1], [], []>} : vector<8x8xf32>, vector<8x8xf32>, vector<8x8xf32> -> vector<8x8xf32>
    %145 = arith.addf %143, %144 : vector<8x8xf32>
    %146 = tpu.reciprocal %141 : vector<8x1xf32> -> vector<8x1xf32>
    %147 = vector.broadcast %146 : vector<8x1xf32> to vector<8x8xf32>
    %148 = arith.mulf %145, %147 : vector<8x8xf32>
    %c0_74 = arith.constant 0 : index
    %c24_75 = arith.constant 24 : index
    %149 = vector.load %arg14[%c0_74, %c24_75] : memref<8x32xf32, #tpu.memory_space<vmem>>, vector<8x8xf32>
    tpu.vector_store %arg14[%c0_74, %c24_75], %148 {strides = array<i32>} : memref<8x32xf32, #tpu.memory_space<vmem>>, vector<8x8xf32>,
    %c0_76 = arith.constant 0 : index
    %c0_77 = arith.constant 0 : index
    %150 = vector.load %arg14[%c0_76, %c0_77] : memref<8x32xf32, #tpu.memory_space<vmem>>, vector<8x32xf32>
    %151 = arith.addf %4, %150 : vector<8x32xf32>
    %c0_78 = arith.constant 0 : index
    %c0_79 = arith.constant 0 : index
    %c0_80 = arith.constant 0 : index
    %152 = vector.load %arg11[%c0_78, %c0_79, %c0_80] : memref<1x8x32xf32, #tpu.memory_space<vmem>>, vector<1x8x32xf32>
    %153 = vector.shape_cast %152 : vector<1x8x32xf32> to vector<8x32xf32>
    %154 = vector.shape_cast %151 : vector<8x32xf32> to vector<1x8x32xf32>
    tpu.vector_store %arg11[%c0_78, %c0_79, %c0_80], %154 {strides = array<i32>} : memref<1x8x32xf32, #tpu.memory_space<vmem>>, vector<1x8x32xf32>,
    return
  }
  func.func @transform_0(%arg0: i32, %arg1: i32) -> (i32, i32, i32) {
    %c0_i32 = arith.constant 0 : i32
    %c0_i32_0 = arith.constant 0 : i32
    return %arg0, %arg1, %c0_i32 : i32, i32, i32
  }
  func.func @transform_1(%arg0: i32, %arg1: i32) -> (i32, i32, i32) {
    %c0_i32 = arith.constant 0 : i32
    %c0_i32_0 = arith.constant 0 : i32
    %c0_i32_1 = arith.constant 0 : i32
    return %arg0, %c0_i32, %c0_i32_0 : i32, i32, i32
  }
  func.func @transform_2(%arg0: i32, %arg1: i32) -> (i32, i32, i32) {
    %c0_i32 = arith.constant 0 : i32
    %c0_i32_0 = arith.constant 0 : i32
    %c0_i32_1 = arith.constant 0 : i32
    return %arg0, %c0_i32, %c0_i32_0 : i32, i32, i32
  }
  func.func @transform_3(%arg0: i32, %arg1: i32) -> (i32, i32) {
    %c0_i32 = arith.constant 0 : i32
    %c0_i32_0 = arith.constant 0 : i32
    %c0_i32_1 = arith.constant 0 : i32
    return %c0_i32, %c0_i32_0 : i32, i32
  }
  func.func @transform_4(%arg0: i32, %arg1: i32) -> (i32, i32) {
    %c0_i32 = arith.constant 0 : i32
    %c0_i32_0 = arith.constant 0 : i32
    %c0_i32_1 = arith.constant 0 : i32
    return %c0_i32, %c0_i32_0 : i32, i32
  }
  func.func @transform_5(%arg0: i32, %arg1: i32) -> (i32, i32) {
    %c0_i32 = arith.constant 0 : i32
    %c0_i32_0 = arith.constant 0 : i32
    %c0_i32_1 = arith.constant 0 : i32
    return %c0_i32, %c0_i32_0 : i32, i32
  }
  func.func @transform_6(%arg0: i32, %arg1: i32) -> (i32, i32) {
    %c0_i32 = arith.constant 0 : i32
    %c0_i32_0 = arith.constant 0 : i32
    %c0_i32_1 = arith.constant 0 : i32
    return %c0_i32, %c0_i32_0 : i32, i32
  }
  func.func @transform_7(%arg0: i32, %arg1: i32) -> (i32, i32) {
    %c0_i32 = arith.constant 0 : i32
    %c0_i32_0 = arith.constant 0 : i32
    %c0_i32_1 = arith.constant 0 : i32
    return %c0_i32, %c0_i32_0 : i32, i32
  }
  func.func @transform_8(%arg0: i32, %arg1: i32) -> (i32, i32) {
    %c0_i32 = arith.constant 0 : i32
    %c0_i32_0 = arith.constant 0 : i32
    %c0_i32_1 = arith.constant 0 : i32
    return %c0_i32, %c0_i32_0 : i32, i32
  }
  func.func @transform_9(%arg0: i32, %arg1: i32) -> (i32, i32, i32) {
    %c0_i32 = arith.constant 0 : i32
    %c0_i32_0 = arith.constant 0 : i32
    return %arg0, %arg1, %c0_i32 : i32, i32, i32
  }
}

</mosaic_0001>

<bundles_post_ra>
// kernel: tpu_custom_call.1
= control target key start
LH: loop header
LB: loop body
LE: loop exit
PB: predicated region body
PF: predicated region fallthrough
CT: control target
= control target key end

     0   :  { %s3420_s0 = inlined_call_operand.hbm [shape: f32[2,8,32], index: 0, kind: input, shape index: {}]   ;;  %s3421_s1 = inlined_call_operand.hbm [shape: f32[2,16,16], index: 1, kind: input, shape index: {}]   ;;  %s3422_s2 = inlined_call_operand.hbm [shape: f32[2,16,16], index: 2, kind: input, shape index: {}]   ;;  %s3423_s3 = inlined_call_operand.hbm [shape: f32[32,32], index: 3, kind: input, shape index: {}]   ;;  %s3424_s4 = inlined_call_operand.vmem [shape: f32[1,32], index: 4, kind: input, shape index: {}]   ;;  %s3425_s5 = inlined_call_operand.vmem [shape: f32[16,32], index: 5, kind: input, shape index: {}]   ;;  %s3426_s6 = inlined_call_operand.vmem [shape: f32[1,32], index: 6, kind: input, shape index: {}]   ;;  %s3427_s7 = inlined_call_operand.hbm [shape: f32[16,32], index: 7, kind: input, shape index: {}]   ;;  %s3428_s8 = inlined_call_operand.vmem [shape: f32[1,32], index: 8, kind: input, shape index: {}]   ;;  %s3429_s9 = inlined_call_operand.hbm [shape: f32[2,8,32], index: 9, kind: output, shape index: {}]  }
   0x1   :  { %3447 = sst [smem:[#allocation21_spill]] %s3421_s1 }
   0x2   :  { %3448 = sst [smem:[#allocation22_spill]] %s3429_s9 }
   0x3   :  { %14 = vsyncpa [#allocation6], 0 }
   0x4   :  { %16 = vsyncpa [#allocation6 + $0x1], 0 }
   0x5   :  { %17 = vsyncpa [#allocation9], 0 }
   0x6   :  { %18 = vsyncpa [#allocation12], 0 }
   0x7   :  { %19 = vsyncpa [#allocation7], 0 }
   0x8   :  { %21 = vsyncpa [#allocation7 + $0x1], 0  ;;  %s2888_s30 = smov 0   ;;  %s2890_s10 = smov 0  }
   0x9   :  { %s2892_s11 = smov 0   ;;  %s2894_s12 = smov 0  }
   0xa   :  { %s2896_s13 = smov 0   ;;  %s2898_s14 = smov 0  }
   0xb LB: > { %3449 = sst [smem:[#allocation19_spill]] %s2799_s30  ;;  %s3430_s15 = sadd.s32 4294967295, %s2819_s14   ;;  %s2819_s14 = sphi %s2898_s14, %s27_s14   ;;  %s2815_s13 = sphi %s2896_s13, %s3483_s13   ;;  %s2811_s12 = sphi %s2894_s12, %s3482_s12   ;;  %s2807_s11 = sphi %s2892_s11, %s3481_s11   ;;  %s2803_s10 = sphi %s2890_s10, %s3480_s10   ;;  %s2799_s30 = sphi %s2888_s30, %s3479_s30  }
   0xc   : > { %s2227_s16 = sadd.s32 4294967294, %s2819_s14   ;;  %p61_p0 = scmp.ne.s32.totalorder %s2803_s10, %s2799_s30 }
   0xd   : > { %p2924_p1 = scmp.eq.s32.totalorder %s3430_s15, 0  ;;  %p271_p2 = scmp.eq.s32.totalorder %s2227_s16, 1 }
   0xe   : > { %p2228_p3 = scmp.ge.s32.totalorder %s2819_s14, 1  ;;  %p278_p5 = scmp.lt.s32.totalorder %s2819_s14, 3 }
   0xf   : > { %s3450_s17 = scalar_select %p2924_p1, 1, 0 }
  0x10   : > { %p2931_p4 = por %p2924_p1, %p61_p0  ;;  %p2936_p6 = por %p271_p2, %p61_p0 }
  0x11   : > { %s2279_s20 = sshll.u32 %s2811_s12, 8  ;;  %p2941_p7 = pnand %p2228_p3, %p278_p5 }
  0x12   : > { %s3451_s18 = scalar_select %p2931_p4, 1, 0 }
  0x13   : > { %s3452_s19 = scalar_select %p2936_p6, 1, 0 }
  0x14   : > { %s3454_s21 = scalar_select %p2941_p7, 1, 0 }
  0x15   : > { %3453 = sst [smem:[#allocation20_spill]] %s3452_s19  ;;  %s3455_s1 = sld [smem:[#allocation21_spill]] }
  0x16   : > { %p3433_p8 = pneg %p2941_p7  ;;  %s2821_s25 = smov [#allocation8]  }
  0x17   : > { %s293_s26 = sshll.u32 %s2821_s25, 4  ;;  %s2966_s16 = scalar_lea.hbm %s3422_s2, %s2279_s20  ;;  %s2952_s26 = int_to_ptr.vmem [resolvable:$true] %s293_s26 }
  0x18   : > { %p2959_p9 = pnand %p3433_p8, %p2931_p4 }
  0x1a   : > { %s3456_s27 = scalar_select %p2959_p9, 1, 0 }
  0x1b   : > { %s2948_s24 = scalar_lea.hbm %s3455_s1, %s2279_s20  ;;  %p3441_p12 = pneg %p2959_p9 }
  0x1c   : > { %s2583_s22 = scalar_lea.hbm %s2948_s24, 256  ;;  %s2588_s15 = scalar_lea.hbm %s3455_s1, 512 }
  0x1d   : > { %p2584_p11 = scmp.ne.s32.totalorder %s2948_s24, %s2583_s22  ;;  %p2589_p2 = scmp.lt.u32.totalorder %s2948_s24, %s3455_s1 }
  0x1e   : > { %p2590_p3 = scmp.lt.u32.totalorder %s2588_s15, %s2583_s22  ;;  %p2592_p8 = scmp.lt.u32.totalorder %s2583_s22, %s2948_s24 }
  0x1f   : > { %p2586_p13 = pnand %p3441_p12, %p2584_p11 }
  0x20   : > { %p2591_p5 = por %p2590_p3, %p2589_p2 }
  0x21   : > { %p2587_p0 = pneg %p2586_p13 }
  0x22   : > { %p2593_p10 = por %p2592_p8, %p2591_p5 }
  0x24   : > { %p2594_p6 = pnand %p2593_p10, %p2587_p0 }
  0x26   : > { %2597 = shalt.err (!%p2594_p6)
}
  0x27   : > { %s2598_s20 = scalar_lea.vmem %s2952_s26, 256  ;;  %p2606_p7 = scmp.lt.s32.totalorder %s2952_s26, %s2952_s26 }
  0x28   : > { %p2599_p11 = scmp.ne.s32.totalorder %s2952_s26, %s2598_s20  ;;  %p2607_p1 = scmp.lt.s32.totalorder %s2598_s20, %s2598_s20 }
  0x2a   : > { %p2601_p13 = pnand %p2599_p11, %p3441_p12  ;;  %p2608_p2 = por %p2607_p1, %p2606_p7 }
  0x2c   : > { %p2602_p4 = pneg %p2601_p13 }
  0x2e   : > { %p2609_p3 = pnand %p2608_p2, %p2602_p4 }
  0x30   : > { %2612 = shalt.err (!%p2609_p3)
}
  0x31   : > { %s2822_s30 = smov 128   ;;  %s2823_s15 = smov 8  }
  0x32   : > { %2464 = dma.hbm_to_vmem [thread:$0]  (!%p2959_p9), %s2948_s24, 256, %s2952_s26, [#allocation9], %s2822_s30, %s2822_s30, %s2823_s15  }
  0x33   : > { %s2824_s19 = smov [#allocation11]   ;;  %p3457_p6 = scmp.ne.s32.totalorder %s3450_s17, 0 }
  0x34   : > { %s322_s28 = sshll.u32 %s2824_s19, 4  ;;  %p3458_p8 = scmp.ne.s32.totalorder %s3454_s21, 0  ;;  %s323_s28 = int_to_ptr.vmem [resolvable:$true] %s322_s28 }
  0x35   : > { %s2825_s22 = smov [#allocation10]   ;;  %s2613_s1 = scalar_lea.hbm %s3423_s3, 512 }
  0x36   : > { %p3459_p10 = pneg %p3458_p8  ;;  %s309_s23 = sshll.u32 %s2825_s22, 4  ;;  %s310_s23 = int_to_ptr.vmem [resolvable:$true] %s309_s23 }
  0x37   : > { %p2614_p4 = scmp.ne.s32.totalorder %s3423_s3, %s2613_s1  ;;  %p2620_p11 = scmp.lt.u32.totalorder %s2613_s1, %s3423_s3 }
  0x38   : > { %p3003_p1 = pnand %p3459_p10, %p3457_p6 }
  0x3a   : > { %s3460_s29 = scalar_select %p3003_p1, 1, 0 }
  0x3b   : > { %p3444_p7 = pneg %p3003_p1 }
  0x3d   : > { %p2616_p0 = pnand %p3444_p7, %p2614_p4 }
  0x3f   : > { %p2617_p5 = pneg %p2616_p0 }
  0x41   : > { %p2622_p13 = pnand %p2620_p11, %p2617_p5 }
  0x43   : > { %2625 = shalt.err (!%p2622_p13)
}
  0x44   : > { %s2626_s22 = scalar_lea.vmem %s323_s28, 512  ;;  %p2634_p10 = scmp.lt.s32.totalorder %s323_s28, %s323_s28 }
  0x45   : > { %p2627_p2 = scmp.ne.s32.totalorder %s323_s28, %s2626_s22  ;;  %p2635_p12 = scmp.lt.s32.totalorder %s2626_s22, %s2626_s22 }
  0x47   : > { %p2629_p3 = pnand %p2627_p2, %p3444_p7  ;;  %p2636_p8 = por %p2635_p12, %p2634_p10 }
  0x49   : > { %p2630_p6 = pneg %p2629_p3 }
  0x4b   : > { %p2637_p9 = pnand %p2636_p8, %p2630_p6 }
  0x4d   : > { %2640 = shalt.err (!%p2637_p9)
}
  0x4e   : > { %2470 = dma.hbm_to_vmem [thread:$0]  (!%p3003_p1), %s3423_s3, 512, %s323_s28, [#allocation12], %s2822_s30, %s2822_s30, %s2823_s15  }
  0x4f   : > { %s2641_s25 = scalar_lea.hbm %s2966_s16, 256  ;;  %p3461_p12 = scmp.ne.s32.totalorder %s3456_s27, 0 }
  0x50   : > { %p2642_p4 = scmp.ne.s32.totalorder %s2966_s16, %s2641_s25  ;;  %s2646_s26 = scalar_lea.hbm %s3422_s2, 512 }
  0x51   : > { %p3462_p8 = pneg %p3461_p12  ;;  %p2647_p5 = scmp.lt.u32.totalorder %s2966_s16, %s3422_s2 }
  0x52   : > { %p2648_p11 = scmp.lt.u32.totalorder %s2646_s26, %s2641_s25  ;;  %p2650_p2 = scmp.lt.u32.totalorder %s2641_s25, %s2966_s16 }
  0x53   : > { %p2644_p9 = pnand %p2642_p4, %p3462_p8 }
  0x54   : > { %p2649_p13 = por %p2648_p11, %p2647_p5 }
  0x55   : > { %p2645_p0 = pneg %p2644_p9 }
  0x56   : > { %p2651_p3 = por %p2650_p2, %p2649_p13 }
  0x58   : > { %p2652_p6 = pnand %p2651_p3, %p2645_p0 }
  0x5a   : > { %2655 = shalt.err (!%p2652_p6)
}
  0x5b   : > { %s2656_s28 = scalar_lea.vmem %s310_s23, 256  ;;  %p3463_p4 = pmov %p3462_p8 }
  0x5c   : > { %p2657_p10 = scmp.ne.s32.totalorder %s310_s23, %s2656_s28  ;;  %p2664_p7 = scmp.lt.s32.totalorder %s310_s23, %s310_s23 }
  0x5d   : > { %p2665_p1 = scmp.lt.s32.totalorder %s2656_s28, %s2656_s28 }
  0x5e   : > { %p2659_p8 = pnand %p2657_p10, %p3463_p4 }
  0x5f   : > { %p2666_p5 = por %p2665_p1, %p2664_p7 }
  0x60   : > { %p2660_p9 = pneg %p2659_p8 }
  0x62   : > { %p2667_p11 = pnand %p2666_p5, %p2660_p9 }
  0x64   : > { %2670 = shalt.err (!%p2667_p11)
}
  0x65   : > { %2467 = dma.hbm_to_vmem [thread:$0]  (!%p3461_p12), %s2966_s16, 256, %s310_s23, [#allocation9], %s2822_s30, %s2822_s30, %s2823_s15  }
  0x66   : > { %s2826_s1 = smov [#allocation13]   ;;  %s2671_s24 = scalar_lea.hbm %s3427_s7, 256 }
  0x67   : > { %s344_s9 = sshll.u32 %s2826_s1, 4  ;;  %p2672_p1 = scmp.ne.s32.totalorder %s3427_s7, %s2671_s24  ;;  %s345_s9 = int_to_ptr.vmem [resolvable:$true] %s344_s9 }
  0x68   : > { %p3464_p7 = scmp.ne.s32.totalorder %s3460_s29, 0  ;;  %p2678_p3 = scmp.lt.u32.totalorder %s2671_s24, %s3427_s7 }
  0x6a   : > { %p3465_p0 = pneg %p3464_p7 }
  0x6c   : > { %p2674_p13 = pnand %p2672_p1, %p3465_p0 }
  0x6e   : > { %p2675_p2 = pneg %p2674_p13 }
  0x70   : > { %p2680_p12 = pnand %p2678_p3, %p2675_p2 }
  0x72   : > { %2683 = shalt.err (!%p2680_p12)
}
  0x73   : > { %s2684_s16 = scalar_lea.vmem %s345_s9, 256  ;;  %p3466_p10 = pmov %p3465_p0 }
  0x74   : > { %p2685_p6 = scmp.ne.s32.totalorder %s345_s9, %s2684_s16  ;;  %p2692_p9 = scmp.lt.s32.totalorder %s345_s9, %s345_s9 }
  0x75   : > { %p2693_p5 = scmp.lt.s32.totalorder %s2684_s16, %s2684_s16 }
  0x76   : > { %p2687_p4 = pnand %p2685_p6, %p3466_p10 }
  0x77   : > { %p2694_p11 = por %p2693_p5, %p2692_p9 }
  0x78   : > { %p2688_p8 = pneg %p2687_p4 }
  0x7a   : > { %p2695_p0 = pnand %p2694_p11, %p2688_p8 }
  0x7c   : > { %2698 = shalt.err (!%p2695_p0)
}
  0x7d   : > { %2473 = dma.hbm_to_vmem [thread:$0]  (!%p3464_p7), %s3427_s7, 256, %s345_s9, [#allocation12], %s2822_s30, %s2822_s30, %s2823_s15  }
  0x7e   : > { %s39_s1 = sadd.s32 1, %s2815_s13  ;;  %s48_s29 = sadd.s32 1, %s2807_s11 }
  0x7f   : > { %p41_p1 = scmp.ge.s32.totalorder %s39_s1, 2  ;;  %p55_p13 = scmp.ne.s32.totalorder %s2807_s11, %s2803_s10 }
  0x80   : > { %p56_p2 = scmp.eq.s32.totalorder %s2819_s14, 0  ;;  %s3467_s25 = sadd.s32 4294967295, %s2819_s14  }
  0x81   : > { %p265_p3 = scmp.eq.s32.totalorder %s3467_s25, 1  ;;  %s3485_s1 = smov (%p41_p1, %s39_s1), 0 }
  0x82   : > { %p3086_p12 = por %p56_p2, %p55_p13  ;;  %s43_s30 = ssub.s32 %s2815_s13, %s3485_s1 }
  0x83   : > { %p3090_p6 = por %p265_p3, %p55_p13  ;;  %p2484_p7 = scmp.lt.s32.totalorder %s2819_s14, 2 }
  0x84   : > { %p46_p10 = scmp.eq.s32.totalorder %s43_s30, 0  ;;  %s361_s15 = sand.u32 1, %s2807_s11  }
  0x85   : > { %s2236_s9 = sshll.u32 %s361_s15, 3  ;;  %s2237_s19 = sshll.u32 %s2815_s13, 7 }
  0x86   : > { %s3099_s26 = scalar_select %p46_p10, %s2807_s11, %s48_s29  }
  0x87   : > { %s3105_s16 = scalar_lea.hbm %s3420_s0, %s2237_s19  ;;  %s365_s23 = scalar_lea.vmem [#allocation5], %s2236_s9 }
  0x88   : > { %s373_s28 = sshll.u32 %s365_s23, 4  ;;  %p3111_p4 = pnand %p2484_p7, %p3086_p12  ;;  %s3107_s28 = int_to_ptr.vmem [resolvable:$true] %s373_s28 }
  0x89   : > { %s362_s29 = scalar_lea.sflag [#allocation6], %s361_s15  ;;  %s2699_s30 = scalar_lea.hbm %s3105_s16, 128 }
  0x8a   : > { %p2700_p8 = scmp.ne.s32.totalorder %s3105_s16, %s2699_s30  ;;  %p2701_p9 = pneg %p3111_p4 }
  0x8b   : > { %s2704_s27 = scalar_lea.hbm %s3420_s0, 256  ;;  %p2705_p0 = scmp.lt.u32.totalorder %s3105_s16, %s3420_s0 }
  0x8c   : > { %p2702_p5 = pnand %p2701_p9, %p2700_p8  ;;  %p2706_p1 = scmp.lt.u32.totalorder %s2704_s27, %s2699_s30 }
  0x8d   : > { %p2708_p2 = scmp.lt.u32.totalorder %s2699_s30, %s3105_s16 }
  0x8e   : > { %p2703_p11 = pneg %p2702_p5  ;;  %p2707_p13 = por %p2706_p1, %p2705_p0 }
  0x90   : > { %p2709_p3 = por %p2708_p2, %p2707_p13 }
  0x92   : > { %p2710_p12 = pnand %p2709_p3, %p2703_p11 }
  0x94   : > { %2713 = shalt.err (!%p2710_p12)
}
  0x95   : > { %s2714_s15 = scalar_lea.vmem %s3107_s28, 128  ;;  %s2827_s23 = smov [#allocation5]  }
  0x96   : > { %p2715_p7 = scmp.ne.s32.totalorder %s3107_s28, %s2714_s15  ;;  %s2719_s9 = sshll.u32 %s2827_s23, 4  ;;  %s2720_s9 = int_to_ptr.vmem [resolvable:$false] %s2719_s9 }
  0x97   : > { %s2721_s19 = scalar_lea.vmem %s2720_s9, 256  ;;  %p2722_p5 = scmp.lt.s32.totalorder %s3107_s28, %s2720_s9 }
  0x98   : > { %p2717_p10 = pnand %p2715_p7, %p2701_p9  ;;  %p2723_p0 = scmp.lt.s32.totalorder %s2721_s19, %s2714_s15 }
  0x9a   : > { %p2718_p8 = pneg %p2717_p10  ;;  %p2724_p1 = por %p2723_p0, %p2722_p5 }
  0x9c   : > { %p2725_p13 = pnand %p2724_p1, %p2718_p8 }
  0x9e   : > { %2728 = shalt.err (!%p2725_p13)
}
  0x9f   : > { %2477 = dma.hbm_to_vmem [thread:$0]  (!%p3111_p4), %s3105_s16, 128, %s3107_s28, %s362_s29  }
  0xa0   : > { %p3471_p11 = scmp.ne.s32.totalorder %s3454_s21, 0 }
  0xa1   : > { %s3143_s30 = sand.u32 (!%p3471_p11), 1, %s2803_s10   ;;  %p3472_p9 = scmp.ne.s32.totalorder (!%p3471_p11), %s3451_s18, 0 }
  0xa2   : > { %382 = sbr.rel (%p3471_p11) target bundleno = 1314 (0x522), region = 56  ;;  %s2239_s27 = sshll.u32 (!%p3471_p11), %s3143_s30, 3 }
  0xa3   : > { %s385_s20 = scalar_lea.sflag (!%p3471_p11), [#allocation6], %s3143_s30  ;;  %s3149_s22 = scalar_lea.vmem (!%p3471_p11), [#allocation5], %s2239_s27 }
  0xa9   : > { %2782 = dma.done.wait (%p3472_p9), %s385_s20, 128  }
  0xaa   : > { %2784 = vsyncadd (%p3472_p9), %s385_s20, 4294967168 }
  0xab   : > { %2786 = dma.done.wait (%p3472_p9), [#allocation9], 512  }
  0xac   : > { %2788 = vsyncadd (%p3472_p9), [#allocation9], 4294966784  ;;  %p3473_p4 = scmp.ne.s32.totalorder %s3450_s17, 0 }
  0xae   : > { %2790 = dma.done.wait (%p3473_p4), [#allocation12], 768  }
  0xaf   : > { %2792 = vsyncadd (%p3473_p4), [#allocation12], 4294966528  ;;  %vm456_vm0 = vcmask 130048   ;;  %v447_v0 = vld [vmem:[%s3425_s5] sm:$0xff]  ;;  %v448_v1 = vld [vmem:[%s3425_s5 + $0x8] sm:$0xff]  ;;  %v2828_v8 = vmov 0.0|0.0  }
  0xb0   : > { %v443_v2 = vld [vmem:[#allocation8] sm:$0xff]  ;;  %v2431_v3 = vpack.c.bf16 %v448_v1, %v447_v0  ;;  %v635_v5 = vld [vmem:[#allocation11 + $0x8] sm:$0xff]  ;;  %v636_v9 = vld [vmem:[#allocation11 + $0x10] sm:$0xff]  ;;  %vm2829_vm1 = vmmov 0   ;;  %v2830_v12 = vmov 0.0   ;;  %vm538_vm2 = vcmask 261120  }
  0xb1   : > { %2330 = vmatprep.mubr.msk.f32.mxu0 %vm456_vm0, %v443_v2  ;;  %v634_v4 = vld [vmem:[#allocation11] sm:$0xff]  ;;  %v444_v6 = vld [vmem:[#allocation8 + $0x8] sm:$0xff]  ;;  %v637_v10 = vld [vmem:[#allocation11 + $0x18] sm:$0xff]  ;;  %vm721_vm3 = vcmask 64512   ;;  %s2831_s23 = smov 120   ;;  %s2832_s9 = smov 112  }
  0xb2   : > { %2432 = vmatprep.subr.bf16.mxu0 %v2431_v3  ;;  %v2440_v7 = vpack.c.bf16 %v635_v5, %v634_v4  ;;  %v2443_v11 = vpack.c.bf16 %v637_v10, %v636_v9  ;;  %v3174_v13 = vld [vmem:[%s3149_s22] sm:$0xff]  ;;  %v541_v14 = vld [vmem:[#allocation13] sm:$0xff]  ;;  %v542_v15 = vld [vmem:[#allocation13 + $0x8] sm:$0xff]  ;;  %s2833_s19 = smov 104   ;;  %s2834_s21 = smov 8   ;;  %vm1392_vm4 = vcmask 130112  }
  0xb3   : > { %2434 = vmatpush3.bf16.msra.mxu0 %v2431_v3  ;;  %v2435_v16 = vpack.c.bf16 %v542_v15, %v541_v14  ;;  %v445_v17 = vld [vmem:[#allocation10] sm:$0xff]  ;;  %v446_v18 = vld [vmem:[#allocation10 + $0x8] sm:$0xff]  ;;  %v2243_v19 = vld [vmem:[%s3426_s6] ss:$0 sm:$0xff]  ;;  %s2835_s16 = smov 16   ;;  %s2836_s28 = smov 24  }
  0xb4   : > { %2439 = vmatprep.subr.bf16.mxu0 %v2828_v8  ;;  %2337 = vmatprep.mubr.msk.f32.mxu1 %vm456_vm0, %v445_v17  ;;  %v2249_v24 = vld [vmem:[%s3424_s4] ss:$0 sm:$0xff]  ;;  %vm1738_vm5 = vcmask 195712   ;;  %vm2084_vm6 = vcmask 261312   ;;  %s2276_s25 = sshll.u32 %s2811_s12, 7  ;;  %s438_s17 = scalar_lea.vmem [#allocation14], %s2239_s27 }
  0xb5   : > { %2436 = vmatprep.subr.bf16.mxu1 %v2435_v16  ;;  %v2246_v30 = vld [vmem:[%s3428_s8] ss:$0 sm:$0xff]  ;;  %s2104_s18 = sshll.u32 %s438_s17, 4  ;;  %s2837_s27 = smov [#allocation14]   ;;  %s3372_s18 = int_to_ptr.vmem [resolvable:$true] %s2104_s18 }
  0xb6   : > { %2331 = vmatmul.mubr.msk.f32.vlgmr.msra.gmra.mrb[0].mxu0 %vm456_vm0, %v444_v6  ;;  %2438 = vmatpush3.bf16.msra.mxu1 %v2435_v16  ;;  %s2729_s12 = scalar_lea.vmem %s3372_s18, 128  ;;  %s2733_s20 = sshll.u32 %s2837_s27, 4  ;;  %s2734_s20 = int_to_ptr.vmem [resolvable:$false] %s2733_s20 }
  0xb7   : > { %2441 = vmatpush3.bf16.msra.mxu0 %v2440_v7  ;;  %2348 = vmatprep.mubr.msk.f32.mxu0 %vm2829_vm1, %v2830_v12  ;;  %p2730_p2 = scmp.ne.s32.totalorder %s3372_s18, %s2729_s12  ;;  %s2735_s22 = scalar_lea.vmem %s2734_s20, 256 }
  0xb8   : > { %2442 = vmatprep.subr.bf16.mxu0 %v2828_v8  ;;  %2351 = vmatprep.subr.mxu1 %v2830_v12  ;;  %p2736_p7 = scmp.lt.s32.totalorder %s3372_s18, %s2734_s20  ;;  %p2737_p10 = scmp.lt.s32.totalorder %s2735_s22, %s2729_s12 }
  0xb9   : > { %2338 = vmatmul.mubr.msk.f32.vlgmr.msra.gmra.mrb[0].mxu1 %vm456_vm0, %v446_v18  ;;  %p2731_p3 = pnand %p2730_p2, %p3090_p6 }
  0xba   : > { %2353 = vmatprep.mubr.msk.f32.mxu1 %vm2829_vm1, %v2830_v12  ;;  %p2738_p8 = por %p2737_p10, %p2736_p7 }
  0xbb   : > { %2444 = vmatpush3.bf16.msra.mxu0 %v2443_v11  ;;  %p2732_p12 = pneg %p2731_p3 }
  0xbc   : > { %2361 = vmatprep.subr.mxu0 %v2830_v12 }
  0xbd   : > { %p2739_p5 = pnand %p2738_p8, %p2732_p12 }
  0xbe   : > { %2349 = vmatmul.mubr.msk.f32.vlgmr.msra.gmra.mrb[2].mxu0 %vm538_vm2, %v3174_v13 }
  0xbf   : > { %2363 = vmatprep.mubr.msk.f32.mxu0 %vm2829_vm1, %v2830_v12 }
 0x189   : > { %v2332_v20 = vpop.f32.mrb[0].mxu0 }
 0x18a   : > { %v535_v21 = vadd.f32 %v2332_v20, %v2243_v19  ;;  %v529_v22 = vpop.f32.mrb[1].mxu0 }
 0x18b   : > { %v530_v23 = vadd.f32 %v2243_v19, %v529_v22 }
 0x18c   : > { %540 = vst.msk [vmem:[#allocation2 + $0x8] sm:$0xff] %vm538_vm2, %v535_v21  ;;  %v2339_v31 = vpop.f32.mrb[0].mxu1 }
 0x18d   : > { %539 = vst.msk [vmem:[#allocation2] sm:$0xff] %vm538_vm2, %v530_v23  ;;  %v628_v32 = vadd.f32 %v2339_v31, %v2246_v30  ;;  %v622_v33 = vpop.f32.mrb[1].mxu1 }
 0x18e   : > { %v623_v34 = vadd.f32 %v2246_v30, %v622_v33 }
 0x18f   : > { %632 = vst.msk [vmem:[#allocation3 + $0x8] sm:$0xff] %vm538_vm2, %v628_v32 }
 0x190   : > { %631 = vst.msk [vmem:[#allocation3] sm:$0xff] %vm538_vm2, %v623_v34 }
 0x191   : > { %v715_v25 = vpop.f32.mrb[2].mxu0 }
 0x192   : > { %v2350_v26 = vpop.f32.mrb[3].mxu0  ;;  %v716_v28 = vadd.f32 %v2249_v24, %v715_v25 }
 0x193   : > { %v1215_v27 = vld [vmem:[#allocation2 + $0x8] sm:$0xff] }
 0x194   : > { %1218 = vrot.lane.b32.xlu1 %v1215_v27, %s2831_s23  ;;  %2362 = vmatpush3.xpose.msk.msra.mxu0 %vm721_vm3, %v1215_v27  ;;  %v1048_v29 = vld [vmem:[#allocation2] sm:$0xff] }
 0x195   : > { %1053 = vrot.lane.b32.xlu0 %v1048_v29, %s2831_s23  ;;  %2352 = vmatpush3.xpose.msk.msra.mxu1 %vm721_vm3, %v1048_v29 }
 0x196   : > { %2371 = vmatprep.subr.mxu0 %v2830_v12  ;;  %2356 = vmatprep.subr.mxu1 %v2830_v12  ;;  %v1216_v51 = vld [vmem:[#allocation3 + $0x8] sm:$0xff] }
 0x197   : > { %2364 = vmatmul.mubr.msk.f32.vlgmr.msra.gmra.mrb[4].mxu0 %vm721_vm3, %v716_v28  ;;  %v3218_v35 = vld [vmem:[#allocation3] sm:$0xff] }
 0x198   : > { %1399 = vrot.lane.b32.xlu1 %v1048_v29, %s2832_s9  ;;  %2354 = vmatmul.mubr.msk.f32.vlgmr.msra.gmra.mrb[2].mxu1 %vm721_vm3, %v716_v28 }
 0x199   : > { %1050 = vrot.lane.b32.xlu0 %v716_v28, %s2831_s23  ;;  %2373 = vmatprep.mubr.msk.f32.mxu0 %vm2829_vm1, %v2830_v12 }
 0x19a   : > { %2358 = vmatprep.mubr.msk.f32.mxu1 %vm2829_vm1, %v2830_v12  ;;  %2357 = vmatpush3.msra.mxu1 %v3218_v35 }
 0x19b   : > { %2366 = vmatprep.subr.mxu1 %v2830_v12 }
 0x19c   : > { %1564 = vrot.lane.b32.xlu1 %v1215_v27, %s2832_s9 }
 0x19d   : > { %1396 = vrot.lane.b32.xlu0 %v716_v28, %s2832_s9 }
 0x1a0   : > { %1742 = vrot.lane.b32.xlu1 %v716_v28, %s2833_s19 }
 0x1a1   : > { %1745 = vrot.lane.b32.xlu0 %v1048_v29, %s2833_s19 }
 0x1a5   : > { %1910 = vrot.lane.b32.xlu0 %v1215_v27, %s2833_s19 }
 0x206   : > { %v1219_v37 = vpop.permute.xlu1 %1218 }
 0x207   : > { %v1054_v36 = vpop.permute.xlu0 %1053 }
 0x208   : > { %2372 = vmatpush3.xpose.msk.msra.mxu0 %vm721_vm3, %v1054_v36 }
 0x209   : > { %2381 = vmatprep.subr.mxu0 %v2830_v12 }
 0x20a   : > { %v1400_v39 = vpop.permute.xlu1 %1399 }
 0x20b   : > { %v1051_v38 = vpop.permute.xlu0 %1050 }
 0x20c   : > { %2374 = vmatmul.mubr.msk.f32.vlgmr.msra.gmra.mrb[6].mxu0 %vm721_vm3, %v1051_v38 }
 0x20d   : > { %2382 = vmatpush3.xpose.msk.msra.mxu0 %vm721_vm3, %v1219_v37  ;;  %2383 = vmatprep.mubr.msk.f32.mxu0 %vm2829_vm1, %v2830_v12 }
 0x20e   : > { %2391 = vmatprep.subr.mxu0 %v2830_v12  ;;  %v1565_v41 = vpop.permute.xlu1 %1564 }
 0x20f   : > { %v1397_v40 = vpop.permute.xlu0 %1396 }
 0x210   : > { %2384 = vmatmul.mubr.msk.f32.vlgmr.msra.gmra.mrb[8].mxu0 %vm721_vm3, %v1051_v38 }
 0x211   : > { %2392 = vmatpush3.xpose.msk.msra.mxu0 %vm721_vm3, %v1400_v39  ;;  %2393 = vmatprep.mubr.msk.f32.mxu0 %vm2829_vm1, %v2830_v12 }
 0x212   : > { %2401 = vmatprep.subr.mxu0 %v2830_v12  ;;  %v1743_v43 = vpop.permute.xlu1 %1742 }
 0x213   : > { %v1746_v42 = vpop.permute.xlu0 %1745 }
 0x214   : > { %2394 = vmatmul.mubr.msk.f32.vlgmr.msra.gmra.mrb[10].mxu0 %vm721_vm3, %v1397_v40 }
 0x215   : > { %2402 = vmatpush3.xpose.msk.msra.mxu0 %vm721_vm3, %v1565_v41  ;;  %2403 = vmatprep.mubr.msk.f32.mxu0 %vm2829_vm1, %v2830_v12 }
 0x216   : > { %2411 = vmatprep.subr.mxu0 %v2830_v12 }
 0x217   : > { %v1911_v44 = vpop.permute.xlu0 %1910 }
 0x218   : > { %2404 = vmatmul.mubr.msk.f32.vlgmr.msra.gmra.mrb[12].mxu0 %vm721_vm3, %v1397_v40 }
 0x219   : > { %2412 = vmatpush3.xpose.msk.msra.mxu0 %vm721_vm3, %v1746_v42  ;;  %2413 = vmatprep.mubr.msk.f32.mxu0 %vm2829_vm1, %v2830_v12 }
 0x21a   : > { %2421 = vmatprep.subr.mxu0 %v2830_v12 }
 0x21c   : > { %2414 = vmatmul.mubr.msk.f32.vlgmr.msra.gmra.mrb[14].mxu0 %vm721_vm3, %v1743_v43 }
 0x21d   : > { %2422 = vmatpush3.xpose.msk.msra.mxu0 %vm721_vm3, %v1911_v44  ;;  %2423 = vmatprep.mubr.msk.f32.mxu0 %vm2829_vm1, %v2830_v12 }
 0x220   : > { %2424 = vmatmul.mubr.msk.f32.vlgmr.msra.gmra.mrb[16].mxu0 %vm721_vm3, %v1743_v43 }
 0x26a   : > { %v951_v45 = vpop.f32.mrb[4].mxu0 }
 0x26b   : > { %v794_v46 = vpop.f32.mrb[2].mxu1  ;;  %v2365_v47 = vpop.f32.mrb[5].mxu0  ;;  %v955_v48 = vsel %vm721_vm3, %v951_v45, -inf }
 0x26c   : > { %v2355_v49 = vpop.f32.mrb[3].mxu1  ;;  %956 = vmax.xlane.f32.xlu0 %v955_v48  ;;  %v798_v50 = vsel %vm721_vm3, %v794_v46, -inf }
 0x26d   : > { %799 = vmax.xlane.f32.xlu1 %v798_v50 }
 0x27e   : > { %1309 = vrot.lane.b32.xlu1 %v1216_v51, %s2831_s23 }
 0x282   : > { %1485 = vrot.lane.b32.xlu1 %v3218_v35, %s2832_s9 }
 0x2df   : > { %v1125_v52 = vpop.f32.mrb[6].mxu0 }
 0x2e0   : > { %v2375_v53 = vpop.f32.mrb[7].mxu0  ;;  %v1129_v54 = vsel %vm721_vm3, %v1125_v52, -inf }
 0x2e1   : > { %1130 = vmax.xlane.f32.xlu0 %v1129_v54 }
 0x2e3   : > { %v1288_v55 = vpop.f32.mrb[8].mxu0 }
 0x2e4   : > { %v2385_v56 = vpop.f32.mrb[9].mxu0  ;;  %v1292_v57 = vsel %vm721_vm3, %v1288_v55, -inf }
 0x2e5   : > { %1293 = vmax.xlane.f32.xlu1 %v1292_v57 }
 0x2e7   : > { %v3256_v58 = vpop.f32.mrb[10].mxu0 }
 0x2e8   : > { %v2395_v59 = vpop.f32.mrb[11].mxu0  ;;  %v1475_v16 = vsel %vm721_vm3, %v3256_v58, -inf }
 0x2eb   : > { %v3258_v60 = vpop.f32.mrb[12].mxu0 }
 0x2ec   : > { %v2405_v61 = vpop.f32.mrb[13].mxu0  ;;  %v1638_v62 = vsel %vm721_vm3, %v3258_v60, -inf }
 0x2ed   : > { %1639 = vmax.xlane.f32.xlu1 %v1638_v62 }
 0x2ef   : > { %v3262_v63 = vpop.f32.mrb[14].mxu0 }
 0x2f0   : > { %v2415_v0 = vpop.f32.mrb[15].mxu0  ;;  %v1821_v17 = vsel %vm721_vm3, %v3262_v63, -inf }
 0x2f3   : > { %v3264_v1 = vpop.f32.mrb[16].mxu0 }
 0x2f4   : > { %v2425_v2 = vpop.f32.mrb[17].mxu0  ;;  %v1984_v3 = vsel %vm721_vm3, %v3264_v1, -inf }
 0x2f5   : > { %1985 = vmax.xlane.f32.xlu1 %v1984_v3 }
 0x2f7   : > { %1139 = vrot.lane.b32.xlu0 %v3218_v35, %s2831_s23  ;;  %s3474_s23 = sld [smem:[#allocation22_spill]] }
 0x2f9   : > { %v957_v4 = vpop.xlane.xlu0 %956 }
 0x2fa   : > { %v3270_v5 = vpop.xlane.xlu1 %799 }
 0x2fb   : > { %v801_v6 = vsub.f32 %v794_v46, %v3270_v5  ;;  %v3274_v7 = vmax.f32 %v3270_v5, %v957_v4 }
 0x2fd   : > { %v802_v8 = vmul.f32 1.442695, %v801_v6  ;;  %v959_v9 = vsub.f32 %v3270_v5, %v3274_v7  ;;  %v962_v10 = vsub.f32 %v951_v45, %v3274_v7 }
 0x2fe   : > { %v1310_v18 = vpop.permute.xlu1 %1309 }
 0x2ff   : > { %2551 = vpow2.f32 %v802_v8  ;;  %v963_v11 = vmul.f32 1.442695, %v962_v10  ;;  %v960_v62 = vmul.f32 1.442695, %v959_v9 }
 0x301   : > { %2553 = vpow2.f32 %v963_v11 }
 0x302   : > { %v1486_v19 = vpop.permute.xlu1 %1485 }
 0x306   : > { %1831 = vrot.lane.b32.xlu1 %v3218_v35, %s2833_s19 }
 0x309   : > { %v3281_v14 = vpop.eup %2551 }
 0x30a   : > { %2359 = vmatmul.mubr.msk.f32.vlgmr.msra.gmra.mrb[4].mxu1 %vm721_vm3, %v3281_v14 }
 0x30b   : > { %2367 = vmatpush3.msra.mxu1 %v1216_v51  ;;  %2368 = vmatprep.mubr.msk.f32.mxu1 %vm2829_vm1, %v2830_v12  ;;  %v3288_v15 = vpop.eup %2553 }
 0x30c   : > { %2376 = vmatprep.subr.mxu1 %v2830_v12  ;;  %v966_v61 = vsel %vm721_vm3, %v3288_v15, 0.0 }
 0x30e   : > { %2369 = vmatmul.mubr.msk.f32.vlgmr.msra.gmra.mrb[6].mxu1 %vm721_vm3, %v3288_v15 }
 0x30f   : > { %2378 = vmatprep.mubr.msk.f32.mxu1 %vm2829_vm1, %v2830_v12 }
 0x316   : > { %1476 = vmax.xlane.f32.xlu0 %v1475_v16 }
 0x31a   : > { %1822 = vmax.xlane.f32.xlu0 %v1821_v17 }
 0x330   : > { %1655 = vrot.lane.b32.xlu0 %v1216_v51, %s2832_s9  ;;  %s3370_s9 = scalar_lea.hbm %s3474_s23, %s2276_s25 }
 0x334   : > { %2001 = vrot.lane.b32.xlu0 %v1216_v51, %s2833_s19  ;;  %s2090_s19 = scalar_lea.sflag [#allocation7], %s3143_s30 }
 0x36e   : > { %v3300_v20 = vpop.xlane.xlu0 %1130 }
 0x36f   : > { %v1132_v21 = vsub.f32 %v1125_v52, %v3300_v20 }
 0x371   : > { %v1133_v22 = vmul.f32 1.442695, %v1132_v21 }
 0x372   : > { %v1140_v23 = vpop.permute.xlu0 %1139  ;;  %v1294_v24 = vpop.xlane.xlu1 %1293 }
 0x373   : > { %2555 = vpow2.f32 %v1133_v22  ;;  %v3304_v25 = vmax.f32 %v3300_v20, %v1294_v24  ;;  %2377 = vmatpush3.msra.mxu1 %v1140_v23 }
 0x374   : > { %2386 = vmatprep.subr.mxu1 %v2830_v12 }
 0x375   : > { %v1296_v26 = vsub.f32 %v3300_v20, %v3304_v25  ;;  %v1299_v27 = vsub.f32 %v1288_v55, %v3304_v25 }
 0x377   : > { %v1300_v28 = vmul.f32 1.442695, %v1299_v27 }
 0x379   : > { %2557 = vpow2.f32 %v1300_v28 }
 0x37a   : > { %v1640_v33 = vpop.xlane.xlu1 %1639 }
 0x37d   : > { %v2556_v29 = vpop.eup %2555 }
 0x37e   : > { %2379 = vmatmul.mubr.msk.f32.vlgmr.msra.gmra.mrb[8].mxu1 %vm721_vm3, %v2556_v29  ;;  %v1135_v30 = vsel %vm721_vm3, %v2556_v29, 0.0 }
 0x37f   : > { %2387 = vmatpush3.msra.mxu1 %v1310_v18  ;;  %1136 = vadd.xlane.f32.xlu1 %v1135_v30 }
 0x380   : > { %2388 = vmatprep.mubr.msk.f32.mxu1 %vm2829_vm1, %v2830_v12  ;;  %2396 = vmatprep.subr.mxu1 %v2830_v12 }
 0x382   : > { %v1986_v41 = vpop.xlane.xlu1 %1985 }
 0x383   : > { %v2558_v31 = vpop.eup %2557 }
 0x384   : > { %2389 = vmatmul.mubr.msk.f32.vlgmr.msra.gmra.mrb[10].mxu1 %vm721_vm3, %v2558_v31  ;;  %v1303_v32 = vsel %vm721_vm3, %v2558_v31, 0.0 }
 0x385   : > { %2397 = vmatpush3.msra.mxu1 %v1486_v19  ;;  %1304 = vadd.xlane.f32.xlu0 %v1303_v32 }
 0x386   : > { %2398 = vmatprep.mubr.msk.f32.mxu1 %vm2829_vm1, %v2830_v12  ;;  %2406 = vmatprep.subr.mxu1 %v2830_v12  ;;  %v1832_v54 = vpop.permute.xlu1 %1831 }
 0x3a3   : > { %v3320_v34 = vpop.xlane.xlu0 %1476 }
 0x3a4   : > { %v1478_v35 = vsub.f32 %v3256_v58, %v3320_v34  ;;  %v3325_v36 = vmax.f32 %v3320_v34, %v1640_v33 }
 0x3a6   : > { %v1479_v37 = vmul.f32 1.442695, %v1478_v35  ;;  %v1642_v38 = vsub.f32 %v3320_v34, %v3325_v36  ;;  %v1645_v39 = vsub.f32 %v3258_v60, %v3325_v36  ;;  %v804_v60 = vsel %vm721_vm3, %v3281_v14, 0.0 }
 0x3a7   : > { %v1823_v40 = vpop.xlane.xlu0 %1822 }
 0x3a8   : > { %2559 = vpow2.f32 %v1479_v37  ;;  %v1646_v42 = vmul.f32 1.442695, %v1645_v39  ;;  %v1824_v43 = vsub.f32 %v3262_v63, %v1823_v40  ;;  %v1987_v44 = vmax.f32 %v1823_v40, %v1986_v41 }
 0x3a9   : > { %v1643_v35 = vmul.f32 1.442695, %v1642_v38 }
 0x3aa   : > { %v1825_v45 = vmul.f32 1.442695, %v1824_v43  ;;  %2561 = vpow2.f32 %v1646_v42  ;;  %v1988_v46 = vsub.f32 %v1823_v40, %v1987_v44  ;;  %v1991_v47 = vsub.f32 %v3264_v1, %v1987_v44 }
 0x3ab   : > { %v1656_v50 = vpop.permute.xlu0 %1655 }
 0x3ac   : > { %2563 = vpow2.f32 %v1825_v45  ;;  %v1992_v48 = vmul.f32 1.442695, %v1991_v47  ;;  %v1989_v8 = vmul.f32 1.442695, %v1988_v46 }
 0x3ae   : > { %2565 = vpow2.f32 %v1992_v48 }
 0x3af   : > { %v2002_v58 = vpop.permute.xlu0 %2001  ;;  %2567 = vpow2.f32 %v960_v62 }
 0x3b0   : > { %2569 = vpow2.f32 %v1989_v8 }
 0x3b2   : > { %v2560_v49 = vpop.eup %2559 }
 0x3b3   : > { %2399 = vmatmul.mubr.msk.f32.vlgmr.msra.gmra.mrb[12].mxu1 %vm721_vm3, %v2560_v49  ;;  %v1481_v51 = vsel %vm721_vm3, %v2560_v49, 0.0 }
 0x3b4   : > { %2407 = vmatpush3.msra.mxu1 %v1656_v50  ;;  %1482 = vadd.xlane.f32.xlu0 %v1481_v51  ;;  %v2562_v52 = vpop.eup %2561 }
 0x3b5   : > { %2408 = vmatprep.mubr.msk.f32.mxu1 %vm2829_vm1, %v2830_v12  ;;  %2416 = vmatprep.subr.mxu1 %v2830_v12  ;;  %v1649_v56 = vsel %vm721_vm3, %v2562_v52, 0.0 }
 0x3b6   : > { %v2564_v53 = vpop.eup %2563 }
 0x3b7   : > { %2409 = vmatmul.mubr.msk.f32.vlgmr.msra.gmra.mrb[14].mxu1 %vm721_vm3, %v2562_v52  ;;  %v1827_v55 = vsel %vm721_vm3, %v2564_v53, 0.0 }
 0x3b8   : > { %2417 = vmatpush3.msra.mxu1 %v1832_v54  ;;  %1828 = vadd.xlane.f32.xlu1 %v1827_v55  ;;  %v2566_v57 = vpop.eup %2565 }
 0x3b9   : > { %1650 = vadd.xlane.f32.xlu0 %v1649_v56  ;;  %2418 = vmatprep.mubr.msk.f32.mxu1 %vm2829_vm1, %v2830_v12  ;;  %v1995_v59 = vsel %vm721_vm3, %v2566_v57, 0.0  ;;  %v2568_v63 = vpop.eup %2567 }
 0x3ba   : > { %2426 = vmatprep.subr.mxu1 %v2830_v12  ;;  %v2570_v5 = vpop.eup %2569 }
 0x3bb   : > { %2419 = vmatmul.mubr.msk.f32.vlgmr.msra.gmra.mrb[16].mxu1 %vm721_vm3, %v2564_v53 }
 0x3bc   : > { %2427 = vmatpush3.msra.mxu1 %v2002_v58  ;;  %1996 = vadd.xlane.f32.xlu1 %v1995_v59 }
 0x3bd   : > { %805 = vadd.xlane.f32.xlu0 %v804_v60  ;;  %2428 = vmatprep.mubr.msk.f32.mxu1 %vm2829_vm1, %v2830_v12  ;;  %v1297_v12 = vmul.f32 1.442695, %v1296_v26 }
 0x3bf   : > { %2429 = vmatmul.mubr.msk.f32.vlgmr.msra.gmra.mrb[18].mxu1 %vm721_vm3, %v2566_v57  ;;  %2571 = vpow2.f32 %v1297_v12 }
 0x3c0   : > { %967 = vadd.xlane.f32.xlu1 %v966_v61 }
 0x3c9   : > { %v2572_v16 = vpop.eup %2571 }
 0x3dd   : > { %v876_v0 = vpop.f32.mrb[4].mxu1 }
 0x3de   : > { %v970_v1 = vmul.f32 %v2568_v63, %v876_v0  ;;  %v2360_v2 = vpop.f32.mrb[5].mxu1 }
 0x3e1   : > { %v1040_v3 = vpop.f32.mrb[6].mxu1 }
 0x3e2   : > { %v1044_v4 = vadd.f32 %v1040_v3, %v970_v1  ;;  %v2370_v6 = vpop.f32.mrb[7].mxu1 }
 0x40c   : > { %v1137_v11 = vpop.xlane.xlu1 %1136 }
 0x40d   : > { %v1302_v17 = vmul.f32 %v2572_v16, %v1137_v11 }
 0x412   : > { %v1305_v10 = vpop.xlane.xlu0 %1304 }
 0x413   : > { %v1306_v21 = vadd.f32 %v1305_v10, %v1302_v17 }
 0x415   : > { %2573 = vrcp.f32 %v1306_v21 }
 0x41f   : > { %v2574_v28 = vpop.eup %2573 }
 0x441   : > { %v1483_v14 = vpop.xlane.xlu0 %1482 }
 0x445   : > { %v1829_v7 = vpop.xlane.xlu1 %1828 }
 0x446   : > { %v1651_v9 = vpop.xlane.xlu0 %1650  ;;  %v1994_v15 = vmul.f32 %v2570_v5, %v1829_v7 }
 0x449   : > { %v1997_v18 = vpop.xlane.xlu1 %1996 }
 0x44a   : > { %v806_v19 = vpop.xlane.xlu0 %805  ;;  %v1998_v41 = vadd.f32 %v1997_v18, %v1994_v15 }
 0x44b   : > { %v965_v22 = vmul.f32 %v2568_v63, %v806_v19 }
 0x44d   : > { %v968_v23 = vpop.xlane.xlu1 %967 }
 0x44e   : > { %v969_v24 = vadd.f32 %v968_v23, %v965_v22 }
 0x450   : > { %2575 = vrcp.f32 %v969_v24 }
 0x451   : > { %v1211_v20 = vpop.f32.mrb[8].mxu1  ;;  %2577 = vpow2.f32 %v1643_v35 }
 0x452   : > { %v1307_v25 = vmul.f32 %v2572_v16, %v1211_v20  ;;  %v2380_v26 = vpop.f32.mrb[9].mxu1 }
 0x457   : > { %v1381_v27 = vpop.f32.mrb[10].mxu1 }
 0x458   : > { %v1385_v29 = vadd.f32 %v1381_v27, %v1307_v25  ;;  %v2390_v30 = vpop.f32.mrb[11].mxu1 }
 0x45a   : > { %v2576_v31 = vpop.eup %2575  ;;  %v1387_v32 = vmul.f32 %v2574_v28, %v1385_v29 }
 0x45b   : > { %v1046_v33 = vmul.f32 %v2576_v31, %v1044_v4  ;;  %v2578_v37 = vpop.eup %2577 }
 0x45c   : > { %1389 = vrot.lane.b32.xlu0 %v1387_v32, %s2834_s21  ;;  %v1648_v39 = vmul.f32 %v2578_v37, %v1483_v14 }
 0x45d   : > { %1047 = vst.msk [vmem:[#allocation4] sm:$0xff] %vm721_vm3, %v1046_v33 }
 0x45e   : > { %v1652_v40 = vadd.f32 %v1651_v9, %v1648_v39 }
 0x460   : > { %2579 = vrcp.f32 %v1652_v40 }
 0x461   : > { %2581 = vrcp.f32 %v1998_v41 }
 0x46a   : > { %v2580_v48 = vpop.eup %2579 }
 0x46b   : > { %v2582_v53 = vpop.eup %2581 }
 0x486   : > { %v1557_v42 = vpop.f32.mrb[12].mxu1 }
 0x487   : > { %v1653_v43 = vmul.f32 %v2578_v37, %v1557_v42  ;;  %v2400_v44 = vpop.f32.mrb[13].mxu1 }
 0x48a   : > { %v1727_v45 = vpop.f32.mrb[14].mxu1 }
 0x48b   : > { %v1731_v46 = vadd.f32 %v1727_v45, %v1653_v43  ;;  %v2410_v47 = vpop.f32.mrb[15].mxu1 }
 0x48d   : > { %v1733_v49 = vmul.f32 %v2580_v48, %v1731_v46 }
 0x48e   : > { %v1903_v50 = vpop.f32.mrb[16].mxu1 }
 0x48f   : > { %v1999_v51 = vmul.f32 %v2570_v5, %v1903_v50  ;;  %1735 = vrot.lane.b32.xlu1 %v1733_v49, %s2835_s16  ;;  %v2420_v34 = vpop.f32.mrb[17].mxu1 }
 0x492   : > { %v2073_v36 = vpop.f32.mrb[18].mxu1 }
 0x493   : > { %v2077_v38 = vadd.f32 %v2073_v36, %v1999_v51  ;;  %v2430_v52 = vpop.f32.mrb[19].mxu1 }
 0x495   : > { %v2079_v54 = vmul.f32 %v2582_v53, %v2077_v38 }
 0x497   : > { %2081 = vrot.lane.b32.xlu1 %v2079_v54, %s2836_s28 }
 0x4ce   : > { %v1390_v55 = vpop.permute.xlu0 %1389 }
 0x4cf   : > { %1393 = vst.msk [vmem:[#allocation4] sm:$0xff] %vm1392_vm4, %v1390_v55 }
 0x501   : > { %v1736_v56 = vpop.permute.xlu1 %1735 }
 0x502   : > { %1739 = vst.msk [vmem:[#allocation4] sm:$0xff] %vm1738_vm5, %v1736_v56 }
 0x509   : > { %v2082_v57 = vpop.permute.xlu1 %2081 }
 0x50a   : > { %2085 = vst.msk [vmem:[#allocation4] sm:$0xff] %vm2084_vm6, %v2082_v57 }
 0x511   : > { %v2086_v58 = vld [vmem:[#allocation4] sm:$0xff] }
 0x512   : > { %v2087_v59 = vadd.f32 %v2086_v58, %v3174_v13 }
 0x514   : > { %2088 = vst.msk [vmem:[%s438_s17] sm:$0xff] %vm538_vm2, %v2087_v59 }
 0x515   : > { %2742 = shalt.err (!%p2739_p5)
}
 0x516   : > { %s2743_s30 = scalar_lea.hbm %s3370_s9, 128  ;;  %s2747_s28 = scalar_lea.hbm %s3474_s23, 256 }
 0x517   : > { %p2744_p0 = scmp.ne.s32.totalorder %s3370_s9, %s2743_s30  ;;  %p2748_p11 = scmp.lt.u32.totalorder %s3370_s9, %s3474_s23 }
 0x518   : > { %p2749_p9 = scmp.lt.u32.totalorder %s2747_s28, %s2743_s30  ;;  %p2751_p2 = scmp.lt.u32.totalorder %s2743_s30, %s3370_s9 }
 0x519   : > { %p2745_p1 = pnand %p2744_p0, %p3090_p6 }
 0x51a   : > { %p2750_p4 = por %p2749_p9, %p2748_p11 }
 0x51b   : > { %p2746_p13 = pneg %p2745_p1 }
 0x51c   : > { %p2752_p3 = por %p2751_p2, %p2750_p4 }
 0x51e   : > { %p2753_p12 = pnand %p2752_p3, %p2746_p13 }
 0x520   : > { %2756 = shalt.err (!%p2753_p12)
}
 0x521   : > { %2459 = dma.vmem_to_hbm [thread:$0]  (%p3090_p6), %s3372_s18, 128, %s3370_s9, %s2090_s19  }
 0x522 PF: > { %s3475_s29 = sld [smem:[#allocation19_spill]]  ;;  %s3476_s15 = sld [smem:[#allocation20_spill]] }
 0x523   : > { %p3478_p10 = scmp.ge.s32.totalorder %s2819_s14, 2 }
 0x528   : > { %s2116_s12 = sand.u32 1, %s3475_s29   ;;  %p3477_p7 = scmp.ne.s32.totalorder %s3476_s15, 0 }
 0x529   : > { %s2117_s27 = scalar_lea.sflag [#allocation7], %s2116_s12 }
 0x52a   : > { %p2479_p8 = pnand %p3478_p10, %p3477_p7 }
 0x52c   : > { %2794 = dma.done.wait (!%p2479_p8), %s2117_s27, 128  }
 0x52d   : > { %2796 = vsyncadd (!%p2479_p8), %s2117_s27, 4294967168  ;;  %s27_s14 = sadd.s32 1, %s2819_s14   ;;  %s3479_s30 = smov %s2803_s10 }
 0x52e   : > { %p24_p5 = scmp.ge.s32.totalorder %s27_s14, 4   ;;  %s3480_s10 = smov %s2807_s11 }
 0x52f   : > { %s3481_s11 = smov %s3099_s26  ;;  %s3482_s12 = smov %s2815_s13 }
 0x530   : > { %s3483_s13 = smov %s3485_s1  ;;  %26 = sbr.rel (!%p24_p5) target bundleno = 11 (0xb), region = 123 }
 0x537   :  { %2122 = vsyncpa [#allocation6], 1 }
 0x538   :  { %2124 = vsyncpa [#allocation6 + $0x1], 1 }
 0x539   :  { %2125 = vsyncpa [#allocation9], 1 }
 0x53a   :  { %2126 = vsyncpa [#allocation12], 1 }
 0x53b   :  { %2127 = vsyncpa [#allocation7], 1 }
 0x53c   :  { %2129 = vsyncpa [#allocation7 + $0x1], 1 }

// kernel: tpu_custom_call.1
= control target key start
LH: loop header
LB: loop body
LE: loop exit
PB: predicated region body
PF: predicated region fallthrough
CT: control target
= control target key end

     0   :  { %s3494_s0 = inlined_call_operand.hbm [shape: f32[2,8,32], index: 0, kind: input, shape index: {}]   ;;  %s3495_s1 = inlined_call_operand.hbm [shape: f32[2,16,16], index: 1, kind: input, shape index: {}]   ;;  %s3496_s2 = inlined_call_operand.hbm [shape: f32[2,16,16], index: 2, kind: input, shape index: {}]   ;;  %s3497_s3 = inlined_call_operand.hbm [shape: f32[32,32], index: 3, kind: input, shape index: {}]   ;;  %s3498_s4 = inlined_call_operand.vmem [shape: f32[1,32], index: 4, kind: input, shape index: {}]   ;;  %s3499_s5 = inlined_call_operand.vmem [shape: f32[16,32], index: 5, kind: input, shape index: {}]   ;;  %s3500_s6 = inlined_call_operand.vmem [shape: f32[1,32], index: 6, kind: input, shape index: {}]   ;;  %s3501_s7 = inlined_call_operand.hbm [shape: f32[16,32], index: 7, kind: input, shape index: {}]   ;;  %s3502_s8 = inlined_call_operand.vmem [shape: f32[1,32], index: 8, kind: input, shape index: {}]   ;;  %s3503_s9 = inlined_call_operand.hbm [shape: f32[2,8,32], index: 9, kind: output, shape index: {}]  }
   0x1   :  { %3529 = sst [smem:[#allocation27_spill]] %s3495_s1 }
   0x2   :  { %3530 = sst [smem:[#allocation28_spill]] %s3497_s3 }
   0x3   :  { %3531 = sst [smem:[#allocation29_spill]] %s3498_s4 }
   0x4   :  { %3532 = sst [smem:[#allocation30_spill]] %s3499_s5 }
   0x5   :  { %3533 = sst [smem:[#allocation31_spill]] %s3500_s6 }
   0x6   :  { %3534 = sst [smem:[#allocation32_spill]] %s3502_s8 }
   0x7   :  { %3535 = sst [smem:[#allocation33_spill]] %s3503_s9 }
   0x8   :  { %14 = vsyncpa [#allocation6], 0 }
   0x9   :  { %16 = vsyncpa [#allocation6 + $0x1], 0 }
   0xa   :  { %17 = vsyncpa [#allocation9], 0 }
   0xb   :  { %19 = vsyncpa [#allocation9 + $0x1], 0 }
   0xc   :  { %20 = vsyncpa [#allocation12], 0 }
   0xd   :  { %21 = vsyncpa [#allocation7], 0 }
   0xe   :  { %23 = vsyncpa [#allocation7 + $0x1], 0  ;;  %s2942_s30 = smov 0   ;;  %s2944_s10 = smov 0  }
   0xf   :  { %s2946_s11 = smov 0   ;;  %s2948_s12 = smov 0  }
  0x10   :  { %s2950_s13 = smov 0   ;;  %s2952_s14 = smov 0  }
  0x11 LB: > { %3536 = sst [smem:[#allocation19_spill]] %s2853_s30  ;;  %s2973_s15 = sadd.s32 4294967295, %s2873_s14   ;;  %s2873_s14 = sphi %s2952_s14, %s29_s14   ;;  %s2869_s13 = sphi %s2950_s13, %s3589_s13   ;;  %s2865_s12 = sphi %s2948_s12, %s3588_s12   ;;  %s2861_s11 = sphi %s2946_s11, %s3584_s11   ;;  %s2857_s10 = sphi %s2944_s10, %s3587_s10   ;;  %s2853_s30 = sphi %s2942_s30, %s3586_s30  }
  0x12   : > { %3537 = sst [smem:[#allocation20_spill]] %s2861_s11  ;;  %s2279_s16 = sadd.s32 4294967294, %s2873_s14  }
  0x13   : > { %3538 = sst [smem:[#allocation21_spill]] %s2865_s12  ;;  %p57_p0 = scmp.ne.s32.totalorder %s2861_s11, %s2857_s10 }
  0x14   : > { %3539 = sst [smem:[#allocation22_spill]] %s2873_s14  ;;  %p58_p1 = scmp.eq.s32.totalorder %s2873_s14, 0 }
  0x15   : > { %p63_p2 = scmp.ne.s32.totalorder %s2857_s10, %s2853_s30  ;;  %p3507_p3 = scmp.eq.s32.totalorder %s2973_s15, 0 }
  0x16   : > { %p267_p4 = scmp.eq.s32.totalorder %s2973_s15, 1  ;;  %p2984_p5 = por %p58_p1, %p57_p0 }
  0x17   : > { %p273_p6 = scmp.eq.s32.totalorder %s2279_s16, 1  ;;  %p2990_p7 = por %p3507_p3, %p63_p2 }
  0x18   : > { %p2994_p8 = por %p267_p4, %p57_p0  ;;  %p2280_p10 = scmp.ge.s32.totalorder %s2873_s14, 1 }
  0x19   : > { %s3541_s19 = scalar_select %p2990_p7, 1, 0 }
  0x1a   : > { %s3542_s20 = scalar_select %p2994_p8, 1, 0 }
  0x1b   : > { %p2998_p9 = por %p273_p6, %p63_p2  ;;  %p280_p11 = scmp.lt.s32.totalorder %s2873_s14, 3 }
  0x1c   : > { %3543 = sst [smem:[#allocation23_spill]] %s3542_s20  ;;  %s2875_s23 = smov [#allocation11]  }
  0x1d   : > { %s3544_s21 = scalar_select %p2998_p9, 1, 0 }
  0x1e   : > { %p3004_p12 = pnand %p2280_p10, %p280_p11  ;;  %s292_s24 = sshll.u32 %s2875_s23, 4  ;;  %s3008_s24 = int_to_ptr.vmem [resolvable:$true] %s292_s24 }
  0x1f   : > { %3545 = sst [smem:[#allocation24_spill]] %s3544_s21  ;;  %s41_s26 = sadd.s32 1, %s2869_s13 }
  0x20   : > { %s3546_s22 = scalar_select %p3004_p12, 1, 0 }
  0x21   : > { %p2517_p13 = pneg %p3004_p12  ;;  %s3022_s27 = sand.u32 1, %s2861_s11  }
  0x22   : > { %p3024_p4 = scmp.ge.s32.totalorder %s41_s26, 2  ;;  %s3549_s3 = sld [smem:[#allocation28_spill]] }
  0x23   : > { %p3016_p2 = pnand %p2517_p13, %p3507_p3 }
  0x25   : > { %s3547_s25 = scalar_select %p3016_p2, 1, 0 }
  0x26   : > { %p3517_p10 = pneg %p3016_p2 }
  0x28   : > { %s2637_s23 = scalar_lea.hbm %s3549_s3, 512 }
  0x29   : > { %p2638_p6 = scmp.ne.s32.totalorder %s3549_s3, %s2637_s23  ;;  %p2644_p0 = scmp.lt.u32.totalorder %s2637_s23, %s3549_s3 }
  0x2b   : > { %p2640_p11 = pnand %p3517_p10, %p2638_p6 }
  0x2d   : > { %p2641_p13 = pneg %p2640_p11 }
  0x2f   : > { %p2646_p3 = pnand %p2644_p0, %p2641_p13 }
  0x31   : > { %2649 = shalt.err (!%p2646_p3)
}
  0x32   : > { %s2650_s29 = scalar_lea.vmem %s3008_s24, 512  ;;  %p2658_p7 = scmp.lt.s32.totalorder %s3008_s24, %s3008_s24 }
  0x33   : > { %p2651_p1 = scmp.ne.s32.totalorder %s3008_s24, %s2650_s29  ;;  %p2659_p6 = scmp.lt.s32.totalorder %s2650_s29, %s2650_s29 }
  0x35   : > { %p2653_p9 = pnand %p2651_p1, %p3517_p10  ;;  %p2660_p11 = por %p2659_p6, %p2658_p7 }
  0x37   : > { %p2654_p8 = pneg %p2653_p9 }
  0x39   : > { %p2661_p12 = pnand %p2660_p11, %p2654_p8 }
  0x3b   : > { %2664 = shalt.err (!%p2661_p12)
}
  0x3c   : > { %s3513_s9 = smov 128   ;;  %s2877_s30 = smov 8  }
  0x3d   : > { %2520 = dma.hbm_to_vmem [thread:$0]  (!%p3016_p2), %s3549_s3, 512, %s3008_s24, [#allocation12], %s3513_s9, %s3513_s9, %s2877_s30  }
  0x3e   : > { %s3591_s26 = smov (%p3024_p4, %s41_s26), 0  ;;  %p3551_p3 = scmp.lt.s32.totalorder %s2873_s14, 2 }
  0x3f   : > { %3550 = sst [smem:[#allocation25_spill]] %s3591_s26  ;;  %s350_s23 = sand.u32 1, %s2873_s14  }
  0x40   : > { %p3066_p7 = pnand %p3551_p3, %p2984_p5  ;;  %s45_s29 = ssub.s32 %s2869_s13, %s3591_s26 }
  0x41   : > { %p48_p8 = scmp.eq.s32.totalorder %s45_s29, 0  ;;  %s3515_s20 = sshll.u32 %s3022_s27, 4 }
  0x42   : > { %s3552_s16 = scalar_select %p3066_p7, 1, 0 }
  0x43   : > { %s3516_s12 = sshll.u32 %s2869_s13, 8  ;;  %s3553_s8 = sadd.s32 1, %s2861_s11 }
  0x44   : > { %s3078_s4 = scalar_select %p48_p8, %s2861_s11, %s3553_s8  }
  0x45   : > { %s3555_s1 = sld [smem:[#allocation27_spill]]  ;;  %s354_s17 = scalar_lea.vmem [#allocation8], %s3515_s20 }
  0x46   : > { %3554 = sst [smem:[#allocation26_spill]] %s3078_s4  ;;  %s361_s21 = sshll.u32 %s354_s17, 4  ;;  %s3089_s21 = int_to_ptr.vmem [resolvable:$true] %s361_s21 }
  0x47   : > { %s3091_s29 = scalar_lea.sflag [#allocation9], %s350_s23  ;;  %p3097_p9 = pneg %p3066_p7 }
  0x49   : > { %s3556_s8 = scalar_select %p3097_p9, 1, 0 }
  0x4b   : > { %s3085_s18 = scalar_lea.hbm %s3555_s1, %s3516_s12  ;;  %s2670_s20 = scalar_lea.hbm %s3555_s1, 512 }
  0x4c   : > { %s2665_s9 = scalar_lea.hbm %s3085_s18, 256  ;;  %p2671_p1 = scmp.lt.u32.totalorder %s3085_s18, %s3555_s1 }
  0x4d   : > { %p2666_p5 = scmp.ne.s32.totalorder %s3085_s18, %s2665_s9  ;;  %p2672_p4 = scmp.lt.u32.totalorder %s2670_s20, %s2665_s9 }
  0x4e   : > { %p2674_p6 = scmp.lt.u32.totalorder %s2665_s9, %s3085_s18 }
  0x4f   : > { %p2668_p12 = pnand %p3097_p9, %p2666_p5  ;;  %p2673_p13 = por %p2672_p4, %p2671_p1 }
  0x51   : > { %p2669_p0 = pneg %p2668_p12  ;;  %p2675_p11 = por %p2674_p6, %p2673_p13 }
  0x53   : > { %p2676_p3 = pnand %p2675_p11, %p2669_p0 }
  0x55   : > { %2679 = shalt.err (!%p2676_p3)
}
  0x56   : > { %s2680_s23 = scalar_lea.vmem %s3089_s21, 256  ;;  %s2878_s24 = smov [#allocation8]  }
  0x57   : > { %p2681_p8 = scmp.ne.s32.totalorder %s3089_s21, %s2680_s23  ;;  %s2685_s28 = sshll.u32 %s2878_s24, 4  ;;  %s2686_s28 = int_to_ptr.vmem [resolvable:$false] %s2685_s28 }
  0x58   : > { %s2687_s12 = scalar_lea.vmem %s2686_s28, 512  ;;  %p2688_p10 = scmp.lt.s32.totalorder %s3089_s21, %s2686_s28 }
  0x59   : > { %p2683_p5 = pnand %p2681_p8, %p3097_p9  ;;  %p2689_p2 = scmp.lt.s32.totalorder %s2687_s12, %s2680_s23 }
  0x5b   : > { %p2684_p12 = pneg %p2683_p5  ;;  %p2690_p1 = por %p2689_p2, %p2688_p10 }
  0x5d   : > { %p2691_p4 = pnand %p2690_p1, %p2684_p12 }
  0x5f   : > { %2694 = shalt.err (!%p2691_p4)
}
  0x60   : > { %s3557_s20 = smov 128   ;;  %s3558_s9 = sshll.u32 %s2869_s13, 8 }
  0x61   : > { %2530 = dma.hbm_to_vmem [thread:$0]  (!%p3066_p7), %s3085_s18, 256, %s3089_s21, %s3091_s29, %s3557_s20, %s3557_s20, %s2877_s30  }
  0x62   : > { %s3129_s23 = scalar_lea.hbm %s3496_s2, %s3558_s9  ;;  %s3559_s28 = sshll.u32 %s3022_s27, 4 }
  0x63   : > { %s375_s12 = scalar_lea.vmem [#allocation10], %s3559_s28  ;;  %s2879_s3 = smov [#allocation13]  }
  0x64   : > { %s382_s1 = sshll.u32 %s375_s12, 4  ;;  %s314_s26 = sshll.u32 %s2879_s3, 4  ;;  %s315_s26 = int_to_ptr.vmem [resolvable:$true] %s314_s26  ;;  %s3163_s1 = int_to_ptr.vmem [resolvable:$true] %s382_s1 }
  0x65   : > { %s2695_s14 = scalar_lea.hbm %s3501_s7, 256  ;;  %p3560_p10 = scmp.ne.s32.totalorder %s3547_s25, 0 }
  0x66   : > { %p2696_p2 = scmp.ne.s32.totalorder %s3501_s7, %s2695_s14  ;;  %p2702_p11 = scmp.lt.u32.totalorder %s2695_s14, %s3501_s7 }
  0x67   : > { %p3561_p0 = pneg %p3560_p10 }
  0x69   : > { %p2698_p13 = pnand %p2696_p2, %p3561_p0 }
  0x6b   : > { %p2699_p6 = pneg %p2698_p13 }
  0x6d   : > { %p2704_p3 = pnand %p2702_p11, %p2699_p6 }
  0x6f   : > { %2707 = shalt.err (!%p2704_p3)
}
  0x70   : > { %s2708_s3 = scalar_lea.vmem %s315_s26, 256  ;;  %p3562_p5 = pmov %p3561_p0 }
  0x71   : > { %p2709_p8 = scmp.ne.s32.totalorder %s315_s26, %s2708_s3  ;;  %p2716_p4 = scmp.lt.s32.totalorder %s315_s26, %s315_s26 }
  0x72   : > { %p2717_p7 = scmp.lt.s32.totalorder %s2708_s3, %s2708_s3 }
  0x73   : > { %p2711_p12 = pnand %p2709_p8, %p3562_p5 }
  0x74   : > { %p2718_p9 = por %p2717_p7, %p2716_p4 }
  0x75   : > { %p2712_p1 = pneg %p2711_p12 }
  0x77   : > { %p2719_p0 = pnand %p2718_p9, %p2712_p1 }
  0x79   : > { %2722 = shalt.err (!%p2719_p0)
}
  0x7a   : > { %2523 = dma.hbm_to_vmem [thread:$0]  (!%p3560_p10), %s3501_s7, 256, %s315_s26, [#allocation12], %s3557_s20, %s3557_s20, %s2877_s30  }
  0x7b   : > { %s2284_s6 = sshll.u32 %s3022_s27, 3  ;;  %s2285_s11 = sshll.u32 %s2869_s13, 7 }
  0x7c   : > { %s3161_s17 = scalar_lea.hbm %s3494_s0, %s2285_s11  ;;  %s335_s25 = scalar_lea.vmem [#allocation5], %s2284_s6 }
  0x7d   : > { %s343_s24 = sshll.u32 %s335_s25, 4  ;;  %s332_s28 = scalar_lea.sflag [#allocation6], %s3022_s27  ;;  %s344_s24 = int_to_ptr.vmem [resolvable:$true] %s343_s24 }
  0x7e   : > { %s2723_s12 = scalar_lea.hbm %s3161_s17, 128  ;;  %p3563_p9 = scmp.ne.s32.totalorder %s3556_s8, 0 }
  0x7f   : > { %p2724_p7 = scmp.ne.s32.totalorder %s3161_s17, %s2723_s12  ;;  %s2728_s21 = scalar_lea.hbm %s3494_s0, 256 }
  0x80   : > { %p2729_p13 = scmp.lt.u32.totalorder %s3161_s17, %s3494_s0  ;;  %p2730_p6 = scmp.lt.u32.totalorder %s2728_s21, %s2723_s12 }
  0x81   : > { %p2726_p2 = pnand %p2724_p7, %p3563_p9  ;;  %p2732_p3 = scmp.lt.u32.totalorder %s2723_s12, %s3161_s17 }
  0x82   : > { %p2731_p11 = por %p2730_p6, %p2729_p13 }
  0x83   : > { %p2727_p10 = pneg %p2726_p2 }
  0x84   : > { %p2733_p8 = por %p2732_p3, %p2731_p11 }
  0x86   : > { %p2734_p5 = pnand %p2733_p8, %p2727_p10 }
  0x88   : > { %2737 = shalt.err (!%p2734_p5)
}
  0x89   : > { %s2738_s27 = scalar_lea.vmem %s344_s24, 128  ;;  %s2880_s5 = smov [#allocation5]  }
  0x8a   : > { %p2739_p12 = scmp.ne.s32.totalorder %s344_s24, %s2738_s27  ;;  %s2743_s6 = sshll.u32 %s2880_s5, 4  ;;  %s2744_s6 = int_to_ptr.vmem [resolvable:$false] %s2743_s6 }
  0x8b   : > { %s2745_s11 = scalar_lea.vmem %s2744_s6, 256  ;;  %p2746_p0 = scmp.lt.s32.totalorder %s344_s24, %s2744_s6 }
  0x8c   : > { %p2741_p1 = pnand %p2739_p12, %p3563_p9  ;;  %p2747_p7 = scmp.lt.s32.totalorder %s2745_s11, %s2738_s27 }
  0x8e   : > { %p2742_p4 = pneg %p2741_p1  ;;  %p2748_p2 = por %p2747_p7, %p2746_p0 }
  0x90   : > { %p2749_p6 = pnand %p2748_p2, %p2742_p4 }
  0x92   : > { %2752 = shalt.err (!%p2749_p6)
}
  0x93   : > { %p3564_p13 = scmp.ne.s32.totalorder %s3552_s16, 0  ;;  %s2753_s14 = scalar_lea.hbm %s3129_s23, 256 }
  0x94   : > { %p2754_p10 = scmp.ne.s32.totalorder %s3129_s23, %s2753_s14  ;;  %s2758_s12 = scalar_lea.hbm %s3496_s2, 512 }
  0x95   : > { %2527 = dma.hbm_to_vmem [thread:$0]  (!%p3564_p13), %s3161_s17, 128, %s344_s24, %s332_s28  }
  0x96   : > { %p2756_p11 = pnand %p2754_p10, %p3563_p9  ;;  %p2759_p8 = scmp.lt.u32.totalorder %s3129_s23, %s3496_s2 }
  0x97   : > { %p2760_p5 = scmp.lt.u32.totalorder %s2758_s12, %s2753_s14  ;;  %p2762_p1 = scmp.lt.u32.totalorder %s2753_s14, %s3129_s23 }
  0x98   : > { %p2757_p3 = pneg %p2756_p11 }
  0x99   : > { %p2761_p12 = por %p2760_p5, %p2759_p8 }
  0x9b   : > { %p2763_p4 = por %p2762_p1, %p2761_p12 }
  0x9d   : > { %p2764_p0 = pnand %p2763_p4, %p2757_p3 }
  0x9f   : > { %2767 = shalt.err (!%p2764_p0)
}
  0xa0   : > { %s2768_s17 = scalar_lea.vmem %s3163_s1, 256  ;;  %s2881_s24 = smov [#allocation10]  }
  0xa1   : > { %p2769_p7 = scmp.ne.s32.totalorder %s3163_s1, %s2768_s17  ;;  %s2773_s28 = sshll.u32 %s2881_s24, 4  ;;  %s2774_s28 = int_to_ptr.vmem [resolvable:$false] %s2773_s28 }
  0xa2   : > { %s2775_s21 = scalar_lea.vmem %s2774_s28, 512  ;;  %p2776_p10 = scmp.lt.s32.totalorder %s3163_s1, %s2774_s28 }
  0xa3   : > { %p2771_p2 = pnand %p2769_p7, %p3563_p9  ;;  %p2777_p11 = scmp.lt.s32.totalorder %s2775_s21, %s2768_s17 }
  0xa5   : > { %p2772_p6 = pneg %p2771_p2  ;;  %p2778_p8 = por %p2777_p11, %p2776_p10 }
  0xa7   : > { %p2779_p5 = pnand %p2778_p8, %p2772_p6 }
  0xa9   : > { %2782 = shalt.err (!%p2779_p5)
}
  0xaa   : > { %2533 = dma.hbm_to_vmem [thread:$0]  (!%p3564_p13), %s3129_s23, 256, %s3163_s1, %s3091_s29, %s3557_s20, %s3557_s20, %s2877_s30  }
  0xab   : > { %p3565_p9 = scmp.ne.s32.totalorder %s3546_s22, 0 }
  0xac   : > { %s3211_s8 = sand.u32 (!%p3565_p9), 1, %s2857_s10   ;;  %p3566_p3 = scmp.ne.s32.totalorder (!%p3565_p9), %s3541_s19, 0 }
  0xad   : > { %394 = sbr.rel (%p3565_p9) target bundleno = 1332 (0x534), region = 56  ;;  %s2293_s3 = sshll.u32 (!%p3565_p9), %s3211_s8, 3 }
  0xae   : > { %s397_s4 = scalar_lea.sflag (!%p3565_p9), [#allocation6], %s3211_s8  ;;  %s3217_s16 = scalar_lea.vmem (!%p3565_p9), [#allocation5], %s2293_s3 }
  0xb4   : > { %2836 = dma.done.wait (%p3566_p3), %s397_s4, 128  }
  0xb5   : > { %2838 = vsyncadd (%p3566_p3), %s397_s4, 4294967168  ;;  %s405_s1 = sand.u32 1, %s2973_s15   ;;  %s2294_s22 = sshll.u32 %s3211_s8, 4 }
  0xb6   : > { %s406_s30 = scalar_lea.sflag [#allocation9], %s405_s1  ;;  %s409_s29 = scalar_lea.vmem [#allocation8], %s2294_s22 }
  0xb7   : > { %2840 = dma.done.wait (%p3566_p3), %s406_s30, 512  }
  0xb8   : > { %2842 = vsyncadd (%p3566_p3), %s406_s30, 4294966784  ;;  %s3229_s20 = scalar_lea.vmem [#allocation10], %s2294_s22  ;;  %p3567_p13 = scmp.eq.s32.totalorder %s2973_s15, 0 }
  0xba   : > { %2844 = dma.done.wait (%p3567_p13), [#allocation12], 768   ;;  %p3568_p12 = pmov %p3567_p13 }
  0xbb   : > { %vm488_vm0 = vcmask 130048   ;;  %s3569_s5 = sld [smem:[#allocation30_spill]]  ;;  %v475_v2 = vld [vmem:[%s409_s29] sm:$0xff]  ;;  %v667_v5 = vld [vmem:[#allocation11 + $0x8] sm:$0xff]  ;;  %v2882_v8 = vmov 0.0|0.0   ;;  %v669_v10 = vld [vmem:[#allocation11 + $0x18] sm:$0xff] }
  0xbc   : > { %2846 = vsyncadd (%p3568_p12), [#allocation12], 4294966528  ;;  %2386 = vmatprep.mubr.msk.f32.mxu0 %vm488_vm0, %v475_v2  ;;  %v666_v4 = vld [vmem:[#allocation11] sm:$0xff]  ;;  %v476_v6 = vld [vmem:[%s409_s29 + $0x8] sm:$0xff]  ;;  %vm2883_vm1 = vmmov 0   ;;  %v2884_v12 = vmov 0.0  }
  0xbd   : > { %v2496_v7 = vpack.c.bf16 %v667_v5, %v666_v4  ;;  %v668_v9 = vld [vmem:[#allocation11 + $0x10] sm:$0xff]  ;;  %vm570_vm2 = vcmask 261120   ;;  %v573_v14 = vld [vmem:[#allocation13] sm:$0xff]  ;;  %v574_v15 = vld [vmem:[#allocation13 + $0x8] sm:$0xff]  ;;  %s3570_s14 = sld [smem:[#allocation31_spill]]  ;;  %s3571_s12 = sld [smem:[#allocation29_spill]] }
  0xbe   : > { %v2499_v11 = vpack.c.bf16 %v669_v10, %v668_v9  ;;  %v3246_v13 = vld [vmem:[%s3217_s16] sm:$0xff]  ;;  %v2491_v16 = vpack.c.bf16 %v574_v15, %v573_v14  ;;  %v477_v17 = vld [vmem:[%s3229_s20] sm:$0xff]  ;;  %vm753_vm3 = vcmask 64512   ;;  %s2885_s26 = smov 120   ;;  %s2886_s18 = smov 112   ;;  %vm1424_vm4 = vcmask 130112  }
  0xbf   : > { %v478_v18 = vld [vmem:[%s3229_s20 + $0x8] sm:$0xff]  ;;  %2393 = vmatprep.mubr.msk.f32.mxu1 %vm488_vm0, %v477_v17  ;;  %s2887_s17 = smov 104   ;;  %s3572_s21 = sld [smem:[#allocation32_spill]]  ;;  %vm1770_vm5 = vcmask 195712   ;;  %vm2116_vm6 = vcmask 261312  }
  0xc0   : > { %2492 = vmatprep.subr.bf16.mxu1 %v2491_v16  ;;  %s2888_s4 = smov 8   ;;  %s2889_s16 = smov 16  }
  0xc1   : > { %v479_v0 = vld [vmem:[%s3569_s5] sm:$0xff]  ;;  %v480_v1 = vld [vmem:[%s3569_s5 + $0x8] sm:$0xff]  ;;  %2494 = vmatpush3.bf16.msra.mxu1 %v2491_v16  ;;  %s3573_s1 = sld [smem:[#allocation21_spill]]  ;;  %s2890_s22 = smov 24  }
  0xc2   : > { %v2487_v3 = vpack.c.bf16 %v480_v1, %v479_v0  ;;  %2407 = vmatprep.subr.mxu1 %v2884_v12  ;;  %s3574_s30 = sld [smem:[#allocation23_spill]]  ;;  %s470_s20 = scalar_lea.vmem [#allocation14], %s2293_s3 }
  0xc3   : > { %v2299_v19 = vld [vmem:[%s3570_s14] ss:$0 sm:$0xff]  ;;  %s2136_s23 = sshll.u32 %s470_s20, 4  ;;  %s3575_s11 = sld [smem:[#allocation33_spill]]  ;;  %s3446_s23 = int_to_ptr.vmem [resolvable:$true] %s2136_s23 }
  0xc4   : > { %2488 = vmatprep.subr.bf16.mxu0 %v2487_v3  ;;  %2394 = vmatmul.mubr.msk.f32.vlgmr.msra.gmra.mrb[0].mxu1 %vm488_vm0, %v478_v18  ;;  %v2305_v24 = vld [vmem:[%s3571_s12] ss:$0 sm:$0xff]  ;;  %s2122_s14 = scalar_lea.sflag [#allocation7], %s3211_s8  ;;  %s2783_s9 = scalar_lea.vmem %s3446_s23, 128 }
  0xc5   : > { %2490 = vmatpush3.bf16.msra.mxu0 %v2487_v3  ;;  %2409 = vmatprep.mubr.msk.f32.mxu1 %vm2883_vm1, %v2884_v12  ;;  %v2302_v30 = vld [vmem:[%s3572_s21] ss:$0 sm:$0xff]  ;;  %p2784_p1 = scmp.ne.s32.totalorder %s3446_s23, %s2783_s9  ;;  %s2891_s3 = smov [#allocation14]  }
  0xc6   : > { %2495 = vmatprep.subr.bf16.mxu0 %v2882_v8  ;;  %s2787_s25 = sshll.u32 %s2891_s3, 4  ;;  %s2788_s25 = int_to_ptr.vmem [resolvable:$false] %s2787_s25 }
  0xc7   : > { %s2332_s29 = sshll.u32 %s3573_s1, 7  ;;  %s2789_s12 = scalar_lea.vmem %s2788_s25, 256 }
  0xc8   : > { %2387 = vmatmul.mubr.msk.f32.vlgmr.msra.gmra.mrb[0].mxu0 %vm488_vm0, %v476_v6  ;;  %p3577_p4 = scmp.ne.s32.totalorder %s3574_s30, 0  ;;  %p2790_p2 = scmp.lt.s32.totalorder %s3446_s23, %s2788_s25 }
  0xc9   : > { %2497 = vmatpush3.bf16.msra.mxu0 %v2496_v7  ;;  %2404 = vmatprep.mubr.msk.f32.mxu0 %vm2883_vm1, %v2884_v12  ;;  %s3576_s15 = smov %s3575_s11  ;;  %s3444_s19 = scalar_lea.hbm %s3575_s11, %s2332_s29 }
  0xca   : > { %2498 = vmatprep.subr.bf16.mxu0 %v2882_v8  ;;  %p2785_p0 = pnand %p2784_p1, %p3577_p4  ;;  %p2791_p6 = scmp.lt.s32.totalorder %s2789_s12, %s2783_s9 }
  0xcc   : > { %p2786_p7 = pneg %p2785_p0  ;;  %p2792_p10 = por %p2791_p6, %p2790_p2 }
  0xcd   : > { %2500 = vmatpush3.bf16.msra.mxu0 %v2499_v11 }
  0xce   : > { %2417 = vmatprep.subr.mxu0 %v2884_v12  ;;  %p2793_p11 = pnand %p2792_p10, %p2786_p7 }
  0xd0   : > { %2405 = vmatmul.mubr.msk.f32.vlgmr.msra.gmra.mrb[2].mxu0 %vm570_vm2, %v3246_v13 }
  0xd1   : > { %2419 = vmatprep.mubr.msk.f32.mxu0 %vm2883_vm1, %v2884_v12 }
 0x197   : > { %v2395_v31 = vpop.f32.mrb[0].mxu1 }
 0x198   : > { %v660_v32 = vadd.f32 %v2395_v31, %v2302_v30  ;;  %v654_v33 = vpop.f32.mrb[1].mxu1 }
 0x199   : > { %v655_v34 = vadd.f32 %v2302_v30, %v654_v33 }
 0x19a   : > { %664 = vst.msk [vmem:[#allocation3 + $0x8] sm:$0xff] %vm570_vm2, %v660_v32 }
 0x19b   : > { %v2388_v20 = vpop.f32.mrb[0].mxu0  ;;  %663 = vst.msk [vmem:[#allocation3] sm:$0xff] %vm570_vm2, %v655_v34 }
 0x19c   : > { %v567_v21 = vadd.f32 %v2388_v20, %v2299_v19  ;;  %v561_v22 = vpop.f32.mrb[1].mxu0 }
 0x19d   : > { %v562_v23 = vadd.f32 %v2299_v19, %v561_v22 }
 0x19e   : > { %572 = vst.msk [vmem:[#allocation2 + $0x8] sm:$0xff] %vm570_vm2, %v567_v21 }
 0x19f   : > { %571 = vst.msk [vmem:[#allocation2] sm:$0xff] %vm570_vm2, %v562_v23 }
 0x1a1   : > { %v1248_v51 = vld [vmem:[#allocation3 + $0x8] sm:$0xff] }
 0x1a2   : > { %v3292_v35 = vld [vmem:[#allocation3] sm:$0xff] }
 0x1a3   : > { %v747_v25 = vpop.f32.mrb[2].mxu0 }
 0x1a4   : > { %v2406_v26 = vpop.f32.mrb[3].mxu0  ;;  %v748_v28 = vadd.f32 %v2305_v24, %v747_v25 }
 0x1a5   : > { %v1247_v27 = vld [vmem:[#allocation2 + $0x8] sm:$0xff] }
 0x1a6   : > { %1250 = vrot.lane.b32.xlu1 %v1247_v27, %s2885_s26  ;;  %2418 = vmatpush3.xpose.msk.msra.mxu0 %vm753_vm3, %v1247_v27  ;;  %v1080_v29 = vld [vmem:[#allocation2] sm:$0xff] }
 0x1a7   : > { %1085 = vrot.lane.b32.xlu0 %v1080_v29, %s2885_s26  ;;  %2408 = vmatpush3.xpose.msk.msra.mxu1 %vm753_vm3, %v1080_v29 }
 0x1a8   : > { %2427 = vmatprep.subr.mxu0 %v2884_v12  ;;  %2412 = vmatprep.subr.mxu1 %v2884_v12 }
 0x1a9   : > { %2420 = vmatmul.mubr.msk.f32.vlgmr.msra.gmra.mrb[4].mxu0 %vm753_vm3, %v748_v28 }
 0x1aa   : > { %1431 = vrot.lane.b32.xlu1 %v1080_v29, %s2886_s18  ;;  %2410 = vmatmul.mubr.msk.f32.vlgmr.msra.gmra.mrb[2].mxu1 %vm753_vm3, %v748_v28 }
 0x1ab   : > { %1082 = vrot.lane.b32.xlu0 %v748_v28, %s2885_s26  ;;  %2429 = vmatprep.mubr.msk.f32.mxu0 %vm2883_vm1, %v2884_v12 }
 0x1ac   : > { %2414 = vmatprep.mubr.msk.f32.mxu1 %vm2883_vm1, %v2884_v12  ;;  %2413 = vmatpush3.msra.mxu1 %v3292_v35 }
 0x1ad   : > { %2422 = vmatprep.subr.mxu1 %v2884_v12 }
 0x1ae   : > { %1596 = vrot.lane.b32.xlu1 %v1247_v27, %s2886_s18 }
 0x1af   : > { %1428 = vrot.lane.b32.xlu0 %v748_v28, %s2886_s18 }
 0x1b2   : > { %1774 = vrot.lane.b32.xlu1 %v748_v28, %s2887_s17 }
 0x1b3   : > { %1777 = vrot.lane.b32.xlu0 %v1080_v29, %s2887_s17 }
 0x1b7   : > { %1942 = vrot.lane.b32.xlu0 %v1247_v27, %s2887_s17 }
 0x218   : > { %v1251_v37 = vpop.permute.xlu1 %1250 }
 0x219   : > { %v1086_v36 = vpop.permute.xlu0 %1085 }
 0x21a   : > { %2428 = vmatpush3.xpose.msk.msra.mxu0 %vm753_vm3, %v1086_v36 }
 0x21b   : > { %2437 = vmatprep.subr.mxu0 %v2884_v12 }
 0x21c   : > { %v1432_v39 = vpop.permute.xlu1 %1431 }
 0x21d   : > { %v1083_v38 = vpop.permute.xlu0 %1082 }
 0x21e   : > { %2430 = vmatmul.mubr.msk.f32.vlgmr.msra.gmra.mrb[6].mxu0 %vm753_vm3, %v1083_v38 }
 0x21f   : > { %2438 = vmatpush3.xpose.msk.msra.mxu0 %vm753_vm3, %v1251_v37  ;;  %2439 = vmatprep.mubr.msk.f32.mxu0 %vm2883_vm1, %v2884_v12 }
 0x220   : > { %2447 = vmatprep.subr.mxu0 %v2884_v12  ;;  %v1597_v41 = vpop.permute.xlu1 %1596 }
 0x221   : > { %v1429_v40 = vpop.permute.xlu0 %1428 }
 0x222   : > { %2440 = vmatmul.mubr.msk.f32.vlgmr.msra.gmra.mrb[8].mxu0 %vm753_vm3, %v1083_v38 }
 0x223   : > { %2448 = vmatpush3.xpose.msk.msra.mxu0 %vm753_vm3, %v1432_v39  ;;  %2449 = vmatprep.mubr.msk.f32.mxu0 %vm2883_vm1, %v2884_v12 }
 0x224   : > { %2457 = vmatprep.subr.mxu0 %v2884_v12  ;;  %v1775_v43 = vpop.permute.xlu1 %1774 }
 0x225   : > { %v1778_v42 = vpop.permute.xlu0 %1777 }
 0x226   : > { %2450 = vmatmul.mubr.msk.f32.vlgmr.msra.gmra.mrb[10].mxu0 %vm753_vm3, %v1429_v40 }
 0x227   : > { %2458 = vmatpush3.xpose.msk.msra.mxu0 %vm753_vm3, %v1597_v41  ;;  %2459 = vmatprep.mubr.msk.f32.mxu0 %vm2883_vm1, %v2884_v12 }
 0x228   : > { %2467 = vmatprep.subr.mxu0 %v2884_v12 }
 0x229   : > { %v1943_v44 = vpop.permute.xlu0 %1942 }
 0x22a   : > { %2460 = vmatmul.mubr.msk.f32.vlgmr.msra.gmra.mrb[12].mxu0 %vm753_vm3, %v1429_v40 }
 0x22b   : > { %2468 = vmatpush3.xpose.msk.msra.mxu0 %vm753_vm3, %v1778_v42  ;;  %2469 = vmatprep.mubr.msk.f32.mxu0 %vm2883_vm1, %v2884_v12 }
 0x22c   : > { %2477 = vmatprep.subr.mxu0 %v2884_v12 }
 0x22e   : > { %2470 = vmatmul.mubr.msk.f32.vlgmr.msra.gmra.mrb[14].mxu0 %vm753_vm3, %v1775_v43 }
 0x22f   : > { %2478 = vmatpush3.xpose.msk.msra.mxu0 %vm753_vm3, %v1943_v44  ;;  %2479 = vmatprep.mubr.msk.f32.mxu0 %vm2883_vm1, %v2884_v12 }
 0x232   : > { %2480 = vmatmul.mubr.msk.f32.vlgmr.msra.gmra.mrb[16].mxu0 %vm753_vm3, %v1775_v43 }
 0x27c   : > { %v983_v45 = vpop.f32.mrb[4].mxu0 }
 0x27d   : > { %v826_v46 = vpop.f32.mrb[2].mxu1  ;;  %v2421_v47 = vpop.f32.mrb[5].mxu0  ;;  %v987_v48 = vsel %vm753_vm3, %v983_v45, -inf }
 0x27e   : > { %v2411_v49 = vpop.f32.mrb[3].mxu1  ;;  %988 = vmax.xlane.f32.xlu0 %v987_v48  ;;  %v830_v50 = vsel %vm753_vm3, %v826_v46, -inf }
 0x27f   : > { %831 = vmax.xlane.f32.xlu1 %v830_v50 }
 0x290   : > { %1341 = vrot.lane.b32.xlu1 %v1248_v51, %s2885_s26 }
 0x294   : > { %1517 = vrot.lane.b32.xlu1 %v3292_v35, %s2886_s18 }
 0x2f1   : > { %v1157_v52 = vpop.f32.mrb[6].mxu0 }
 0x2f2   : > { %v2431_v53 = vpop.f32.mrb[7].mxu0  ;;  %v1161_v54 = vsel %vm753_vm3, %v1157_v52, -inf }
 0x2f3   : > { %1162 = vmax.xlane.f32.xlu0 %v1161_v54 }
 0x2f5   : > { %v1320_v55 = vpop.f32.mrb[8].mxu0 }
 0x2f6   : > { %v2441_v56 = vpop.f32.mrb[9].mxu0  ;;  %v1324_v57 = vsel %vm753_vm3, %v1320_v55, -inf }
 0x2f7   : > { %1325 = vmax.xlane.f32.xlu1 %v1324_v57 }
 0x2f9   : > { %v3330_v58 = vpop.f32.mrb[10].mxu0 }
 0x2fa   : > { %v2451_v59 = vpop.f32.mrb[11].mxu0  ;;  %v1507_v16 = vsel %vm753_vm3, %v3330_v58, -inf }
 0x2fd   : > { %v3332_v60 = vpop.f32.mrb[12].mxu0 }
 0x2fe   : > { %v2461_v61 = vpop.f32.mrb[13].mxu0  ;;  %v1670_v62 = vsel %vm753_vm3, %v3332_v60, -inf }
 0x2ff   : > { %1671 = vmax.xlane.f32.xlu1 %v1670_v62 }
 0x301   : > { %v3336_v63 = vpop.f32.mrb[14].mxu0 }
 0x302   : > { %v2471_v0 = vpop.f32.mrb[15].mxu0  ;;  %v1853_v17 = vsel %vm753_vm3, %v3336_v63, -inf }
 0x305   : > { %v3338_v1 = vpop.f32.mrb[16].mxu0 }
 0x306   : > { %v2481_v2 = vpop.f32.mrb[17].mxu0  ;;  %v2016_v3 = vsel %vm753_vm3, %v3338_v1, -inf }
 0x307   : > { %2017 = vmax.xlane.f32.xlu1 %v2016_v3 }
 0x309   : > { %1171 = vrot.lane.b32.xlu0 %v3292_v35, %s2885_s26 }
 0x30b   : > { %v989_v4 = vpop.xlane.xlu0 %988 }
 0x30c   : > { %v3344_v5 = vpop.xlane.xlu1 %831 }
 0x30d   : > { %v833_v6 = vsub.f32 %v826_v46, %v3344_v5  ;;  %v3348_v7 = vmax.f32 %v3344_v5, %v989_v4 }
 0x30f   : > { %v834_v8 = vmul.f32 1.442695, %v833_v6  ;;  %v991_v9 = vsub.f32 %v3344_v5, %v3348_v7  ;;  %v994_v10 = vsub.f32 %v983_v45, %v3348_v7 }
 0x310   : > { %v1342_v18 = vpop.permute.xlu1 %1341 }
 0x311   : > { %2605 = vpow2.f32 %v834_v8  ;;  %v995_v11 = vmul.f32 1.442695, %v994_v10  ;;  %v992_v62 = vmul.f32 1.442695, %v991_v9 }
 0x313   : > { %2607 = vpow2.f32 %v995_v11 }
 0x314   : > { %v1518_v19 = vpop.permute.xlu1 %1517 }
 0x318   : > { %1863 = vrot.lane.b32.xlu1 %v3292_v35, %s2887_s17 }
 0x31b   : > { %v3355_v14 = vpop.eup %2605 }
 0x31c   : > { %2415 = vmatmul.mubr.msk.f32.vlgmr.msra.gmra.mrb[4].mxu1 %vm753_vm3, %v3355_v14 }
 0x31d   : > { %2423 = vmatpush3.msra.mxu1 %v1248_v51  ;;  %2424 = vmatprep.mubr.msk.f32.mxu1 %vm2883_vm1, %v2884_v12  ;;  %v3362_v15 = vpop.eup %2607 }
 0x31e   : > { %2432 = vmatprep.subr.mxu1 %v2884_v12  ;;  %v998_v61 = vsel %vm753_vm3, %v3362_v15, 0.0 }
 0x320   : > { %2425 = vmatmul.mubr.msk.f32.vlgmr.msra.gmra.mrb[6].mxu1 %vm753_vm3, %v3362_v15 }
 0x321   : > { %2434 = vmatprep.mubr.msk.f32.mxu1 %vm2883_vm1, %v2884_v12 }
 0x328   : > { %1508 = vmax.xlane.f32.xlu0 %v1507_v16 }
 0x32c   : > { %1854 = vmax.xlane.f32.xlu0 %v1853_v17 }
 0x342   : > { %1687 = vrot.lane.b32.xlu0 %v1248_v51, %s2886_s18 }
 0x346   : > { %2033 = vrot.lane.b32.xlu0 %v1248_v51, %s2887_s17 }
 0x380   : > { %v3374_v20 = vpop.xlane.xlu0 %1162 }
 0x381   : > { %v1164_v21 = vsub.f32 %v1157_v52, %v3374_v20 }
 0x383   : > { %v1165_v22 = vmul.f32 1.442695, %v1164_v21 }
 0x384   : > { %v1172_v23 = vpop.permute.xlu0 %1171  ;;  %v1326_v24 = vpop.xlane.xlu1 %1325 }
 0x385   : > { %2609 = vpow2.f32 %v1165_v22  ;;  %v3378_v25 = vmax.f32 %v3374_v20, %v1326_v24  ;;  %2433 = vmatpush3.msra.mxu1 %v1172_v23 }
 0x386   : > { %2442 = vmatprep.subr.mxu1 %v2884_v12 }
 0x387   : > { %v1328_v26 = vsub.f32 %v3374_v20, %v3378_v25  ;;  %v1331_v27 = vsub.f32 %v1320_v55, %v3378_v25 }
 0x389   : > { %v1332_v28 = vmul.f32 1.442695, %v1331_v27 }
 0x38b   : > { %2611 = vpow2.f32 %v1332_v28 }
 0x38c   : > { %v1672_v33 = vpop.xlane.xlu1 %1671 }
 0x38f   : > { %v2610_v29 = vpop.eup %2609 }
 0x390   : > { %2435 = vmatmul.mubr.msk.f32.vlgmr.msra.gmra.mrb[8].mxu1 %vm753_vm3, %v2610_v29  ;;  %v1167_v30 = vsel %vm753_vm3, %v2610_v29, 0.0 }
 0x391   : > { %2443 = vmatpush3.msra.mxu1 %v1342_v18  ;;  %1168 = vadd.xlane.f32.xlu1 %v1167_v30 }
 0x392   : > { %2444 = vmatprep.mubr.msk.f32.mxu1 %vm2883_vm1, %v2884_v12  ;;  %2452 = vmatprep.subr.mxu1 %v2884_v12 }
 0x394   : > { %v2018_v41 = vpop.xlane.xlu1 %2017 }
 0x395   : > { %v2612_v31 = vpop.eup %2611 }
 0x396   : > { %2445 = vmatmul.mubr.msk.f32.vlgmr.msra.gmra.mrb[10].mxu1 %vm753_vm3, %v2612_v31  ;;  %v1335_v32 = vsel %vm753_vm3, %v2612_v31, 0.0 }
 0x397   : > { %2453 = vmatpush3.msra.mxu1 %v1518_v19  ;;  %1336 = vadd.xlane.f32.xlu0 %v1335_v32 }
 0x398   : > { %2454 = vmatprep.mubr.msk.f32.mxu1 %vm2883_vm1, %v2884_v12  ;;  %2462 = vmatprep.subr.mxu1 %v2884_v12  ;;  %v1864_v54 = vpop.permute.xlu1 %1863 }
 0x3b5   : > { %v3394_v34 = vpop.xlane.xlu0 %1508 }
 0x3b6   : > { %v1510_v35 = vsub.f32 %v3330_v58, %v3394_v34  ;;  %v3399_v36 = vmax.f32 %v3394_v34, %v1672_v33 }
 0x3b8   : > { %v1511_v37 = vmul.f32 1.442695, %v1510_v35  ;;  %v1674_v38 = vsub.f32 %v3394_v34, %v3399_v36  ;;  %v1677_v39 = vsub.f32 %v3332_v60, %v3399_v36  ;;  %v836_v60 = vsel %vm753_vm3, %v3355_v14, 0.0 }
 0x3b9   : > { %v1855_v40 = vpop.xlane.xlu0 %1854 }
 0x3ba   : > { %2613 = vpow2.f32 %v1511_v37  ;;  %v1678_v42 = vmul.f32 1.442695, %v1677_v39  ;;  %v1856_v43 = vsub.f32 %v3336_v63, %v1855_v40  ;;  %v2019_v44 = vmax.f32 %v1855_v40, %v2018_v41 }
 0x3bb   : > { %v1675_v35 = vmul.f32 1.442695, %v1674_v38 }
 0x3bc   : > { %v1857_v45 = vmul.f32 1.442695, %v1856_v43  ;;  %2615 = vpow2.f32 %v1678_v42  ;;  %v2020_v46 = vsub.f32 %v1855_v40, %v2019_v44  ;;  %v2023_v47 = vsub.f32 %v3338_v1, %v2019_v44 }
 0x3bd   : > { %v1688_v50 = vpop.permute.xlu0 %1687 }
 0x3be   : > { %2617 = vpow2.f32 %v1857_v45  ;;  %v2024_v48 = vmul.f32 1.442695, %v2023_v47  ;;  %v2021_v8 = vmul.f32 1.442695, %v2020_v46 }
 0x3c0   : > { %2619 = vpow2.f32 %v2024_v48 }
 0x3c1   : > { %v2034_v58 = vpop.permute.xlu0 %2033  ;;  %2621 = vpow2.f32 %v992_v62 }
 0x3c2   : > { %2623 = vpow2.f32 %v2021_v8 }
 0x3c4   : > { %v2614_v49 = vpop.eup %2613 }
 0x3c5   : > { %2455 = vmatmul.mubr.msk.f32.vlgmr.msra.gmra.mrb[12].mxu1 %vm753_vm3, %v2614_v49  ;;  %v1513_v51 = vsel %vm753_vm3, %v2614_v49, 0.0 }
 0x3c6   : > { %2463 = vmatpush3.msra.mxu1 %v1688_v50  ;;  %1514 = vadd.xlane.f32.xlu0 %v1513_v51  ;;  %v2616_v52 = vpop.eup %2615 }
 0x3c7   : > { %2464 = vmatprep.mubr.msk.f32.mxu1 %vm2883_vm1, %v2884_v12  ;;  %2472 = vmatprep.subr.mxu1 %v2884_v12  ;;  %v1681_v56 = vsel %vm753_vm3, %v2616_v52, 0.0 }
 0x3c8   : > { %v2618_v53 = vpop.eup %2617 }
 0x3c9   : > { %2465 = vmatmul.mubr.msk.f32.vlgmr.msra.gmra.mrb[14].mxu1 %vm753_vm3, %v2616_v52  ;;  %v1859_v55 = vsel %vm753_vm3, %v2618_v53, 0.0 }
 0x3ca   : > { %2473 = vmatpush3.msra.mxu1 %v1864_v54  ;;  %1860 = vadd.xlane.f32.xlu1 %v1859_v55  ;;  %v2620_v57 = vpop.eup %2619 }
 0x3cb   : > { %1682 = vadd.xlane.f32.xlu0 %v1681_v56  ;;  %2474 = vmatprep.mubr.msk.f32.mxu1 %vm2883_vm1, %v2884_v12  ;;  %v2027_v59 = vsel %vm753_vm3, %v2620_v57, 0.0  ;;  %v2622_v63 = vpop.eup %2621 }
 0x3cc   : > { %2482 = vmatprep.subr.mxu1 %v2884_v12  ;;  %v2624_v5 = vpop.eup %2623 }
 0x3cd   : > { %2475 = vmatmul.mubr.msk.f32.vlgmr.msra.gmra.mrb[16].mxu1 %vm753_vm3, %v2618_v53 }
 0x3ce   : > { %2483 = vmatpush3.msra.mxu1 %v2034_v58  ;;  %2028 = vadd.xlane.f32.xlu1 %v2027_v59 }
 0x3cf   : > { %837 = vadd.xlane.f32.xlu0 %v836_v60  ;;  %2484 = vmatprep.mubr.msk.f32.mxu1 %vm2883_vm1, %v2884_v12  ;;  %v1329_v12 = vmul.f32 1.442695, %v1328_v26 }
 0x3d1   : > { %2485 = vmatmul.mubr.msk.f32.vlgmr.msra.gmra.mrb[18].mxu1 %vm753_vm3, %v2620_v57  ;;  %2625 = vpow2.f32 %v1329_v12 }
 0x3d2   : > { %999 = vadd.xlane.f32.xlu1 %v998_v61 }
 0x3db   : > { %v2626_v16 = vpop.eup %2625 }
 0x3ef   : > { %v908_v0 = vpop.f32.mrb[4].mxu1 }
 0x3f0   : > { %v1002_v1 = vmul.f32 %v2622_v63, %v908_v0  ;;  %v2416_v2 = vpop.f32.mrb[5].mxu1 }
 0x3f3   : > { %v1072_v3 = vpop.f32.mrb[6].mxu1 }
 0x3f4   : > { %v1076_v4 = vadd.f32 %v1072_v3, %v1002_v1  ;;  %v2426_v6 = vpop.f32.mrb[7].mxu1 }
 0x41e   : > { %v1169_v11 = vpop.xlane.xlu1 %1168 }
 0x41f   : > { %v1334_v17 = vmul.f32 %v2626_v16, %v1169_v11 }
 0x424   : > { %v1337_v10 = vpop.xlane.xlu0 %1336 }
 0x425   : > { %v1338_v21 = vadd.f32 %v1337_v10, %v1334_v17 }
 0x427   : > { %2627 = vrcp.f32 %v1338_v21 }
 0x431   : > { %v2628_v28 = vpop.eup %2627 }
 0x453   : > { %v1515_v14 = vpop.xlane.xlu0 %1514 }
 0x457   : > { %v1861_v7 = vpop.xlane.xlu1 %1860 }
 0x458   : > { %v1683_v9 = vpop.xlane.xlu0 %1682  ;;  %v2026_v15 = vmul.f32 %v2624_v5, %v1861_v7 }
 0x45b   : > { %v2029_v18 = vpop.xlane.xlu1 %2028 }
 0x45c   : > { %v838_v19 = vpop.xlane.xlu0 %837  ;;  %v2030_v41 = vadd.f32 %v2029_v18, %v2026_v15 }
 0x45d   : > { %v997_v22 = vmul.f32 %v2622_v63, %v838_v19 }
 0x45f   : > { %v1000_v23 = vpop.xlane.xlu1 %999 }
 0x460   : > { %v1001_v24 = vadd.f32 %v1000_v23, %v997_v22 }
 0x462   : > { %2629 = vrcp.f32 %v1001_v24 }
 0x463   : > { %v1243_v20 = vpop.f32.mrb[8].mxu1  ;;  %2631 = vpow2.f32 %v1675_v35 }
 0x464   : > { %v1339_v25 = vmul.f32 %v2626_v16, %v1243_v20  ;;  %v2436_v26 = vpop.f32.mrb[9].mxu1 }
 0x469   : > { %v1413_v27 = vpop.f32.mrb[10].mxu1 }
 0x46a   : > { %v1417_v29 = vadd.f32 %v1413_v27, %v1339_v25  ;;  %v2446_v30 = vpop.f32.mrb[11].mxu1 }
 0x46c   : > { %v2630_v31 = vpop.eup %2629  ;;  %v1419_v32 = vmul.f32 %v2628_v28, %v1417_v29 }
 0x46d   : > { %v1078_v33 = vmul.f32 %v2630_v31, %v1076_v4  ;;  %v2632_v37 = vpop.eup %2631 }
 0x46e   : > { %1421 = vrot.lane.b32.xlu0 %v1419_v32, %s2888_s4  ;;  %v1680_v39 = vmul.f32 %v2632_v37, %v1515_v14 }
 0x46f   : > { %1079 = vst.msk [vmem:[#allocation4] sm:$0xff] %vm753_vm3, %v1078_v33 }
 0x470   : > { %v1684_v40 = vadd.f32 %v1683_v9, %v1680_v39 }
 0x472   : > { %2633 = vrcp.f32 %v1684_v40 }
 0x473   : > { %2635 = vrcp.f32 %v2030_v41 }
 0x47c   : > { %v2634_v48 = vpop.eup %2633 }
 0x47d   : > { %v2636_v53 = vpop.eup %2635 }
 0x498   : > { %v1589_v42 = vpop.f32.mrb[12].mxu1 }
 0x499   : > { %v1685_v43 = vmul.f32 %v2632_v37, %v1589_v42  ;;  %v2456_v44 = vpop.f32.mrb[13].mxu1 }
 0x49c   : > { %v1759_v45 = vpop.f32.mrb[14].mxu1 }
 0x49d   : > { %v1763_v46 = vadd.f32 %v1759_v45, %v1685_v43  ;;  %v2466_v47 = vpop.f32.mrb[15].mxu1 }
 0x49f   : > { %v1765_v49 = vmul.f32 %v2634_v48, %v1763_v46 }
 0x4a0   : > { %v1935_v50 = vpop.f32.mrb[16].mxu1 }
 0x4a1   : > { %v2031_v51 = vmul.f32 %v2624_v5, %v1935_v50  ;;  %1767 = vrot.lane.b32.xlu1 %v1765_v49, %s2889_s16  ;;  %v2476_v34 = vpop.f32.mrb[17].mxu1 }
 0x4a4   : > { %v2105_v36 = vpop.f32.mrb[18].mxu1 }
 0x4a5   : > { %v2109_v38 = vadd.f32 %v2105_v36, %v2031_v51  ;;  %v2486_v52 = vpop.f32.mrb[19].mxu1 }
 0x4a7   : > { %v2111_v54 = vmul.f32 %v2636_v53, %v2109_v38 }
 0x4a9   : > { %2113 = vrot.lane.b32.xlu1 %v2111_v54, %s2890_s22 }
 0x4e0   : > { %v1422_v55 = vpop.permute.xlu0 %1421 }
 0x4e1   : > { %1425 = vst.msk [vmem:[#allocation4] sm:$0xff] %vm1424_vm4, %v1422_v55 }
 0x513   : > { %v1768_v56 = vpop.permute.xlu1 %1767 }
 0x514   : > { %1771 = vst.msk [vmem:[#allocation4] sm:$0xff] %vm1770_vm5, %v1768_v56 }
 0x51b   : > { %v2114_v57 = vpop.permute.xlu1 %2113 }
 0x51c   : > { %2117 = vst.msk [vmem:[#allocation4] sm:$0xff] %vm2116_vm6, %v2114_v57 }
 0x523   : > { %v2118_v58 = vld [vmem:[#allocation4] sm:$0xff] }
 0x524   : > { %v2119_v59 = vadd.f32 %v2118_v58, %v3246_v13 }
 0x526   : > { %2120 = vst.msk [vmem:[%s470_s20] sm:$0xff] %vm570_vm2, %v2119_v59 }
 0x527   : > { %2796 = shalt.err (!%p2793_p11)
}
 0x528   : > { %s2797_s8 = scalar_lea.hbm %s3444_s19, 128  ;;  %s2801_s17 = scalar_lea.hbm %s3576_s15, 256 }
 0x529   : > { %p2798_p8 = scmp.ne.s32.totalorder %s3444_s19, %s2797_s8  ;;  %p2802_p3 = scmp.lt.u32.totalorder %s3444_s19, %s3576_s15 }
 0x52a   : > { %p2803_p13 = scmp.lt.u32.totalorder %s2801_s17, %s2797_s8  ;;  %p2805_p1 = scmp.lt.u32.totalorder %s2797_s8, %s3444_s19 }
 0x52b   : > { %p2799_p5 = pnand %p2798_p8, %p3577_p4 }
 0x52c   : > { %p2804_p12 = por %p2803_p13, %p2802_p3 }
 0x52d   : > { %p2800_p9 = pneg %p2799_p5 }
 0x52e   : > { %p2806_p0 = por %p2805_p1, %p2804_p12 }
 0x530   : > { %p2807_p7 = pnand %p2806_p0, %p2800_p9 }
 0x532   : > { %2810 = shalt.err (!%p2807_p7)
}
 0x533   : > { %2515 = dma.vmem_to_hbm [thread:$0]  (%p3577_p4), %s3446_s23, 128, %s3444_s19, %s2122_s14  }
 0x534 PF: > { %s3578_s21 = sld [smem:[#allocation19_spill]]  ;;  %s3579_s4 = sld [smem:[#allocation24_spill]] }
 0x535   : > { %s3580_s16 = sld [smem:[#allocation22_spill]] }
 0x53a   : > { %s2148_s1 = sand.u32 1, %s3578_s21   ;;  %p3581_p2 = scmp.ne.s32.totalorder %s3579_s4, 0 }
 0x53b   : > { %p3582_p6 = scmp.ge.s32.totalorder %s3580_s16, 2  ;;  %s2149_s22 = scalar_lea.sflag [#allocation7], %s2148_s1 }
 0x53d   : > { %p2535_p10 = pnand %p3582_p6, %p3581_p2 }
 0x53f   : > { %2848 = dma.done.wait (!%p2535_p10), %s2149_s22, 128  }
 0x540   : > { %2850 = vsyncadd (!%p2535_p10), %s2149_s22, 4294967168  ;;  %s29_s14 = sadd.s32 1, %s3580_s16   ;;  %s3583_s29 = sld [smem:[#allocation20_spill]] }
 0x541   : > { %p26_p11 = scmp.ge.s32.totalorder %s29_s14, 4   ;;  %s3584_s11 = sld [smem:[#allocation26_spill]] }
 0x542   : > { %s3585_s20 = sld [smem:[#allocation25_spill]]  ;;  %s3586_s30 = smov %s2857_s10 }
 0x543   : > { %s3588_s12 = smov %s2869_s13  ;;  %28 = sbr.rel (!%p26_p11) target bundleno = 17 (0x11), region = 137 }
 0x546   : > { %s3587_s10 = smov %s3583_s29 }
 0x548   : > { %s3589_s13 = smov %s3585_s20 }
 0x54a   :  { %2154 = vsyncpa [#allocation6], 1 }
 0x54b   :  { %2156 = vsyncpa [#allocation6 + $0x1], 1 }
 0x54c   :  { %2157 = vsyncpa [#allocation9], 1 }
 0x54d   :  { %2159 = vsyncpa [#allocation9 + $0x1], 1 }
 0x54e   :  { %2160 = vsyncpa [#allocation12], 1 }
 0x54f   :  { %2161 = vsyncpa [#allocation7], 1 }
 0x550   :  { %2163 = vsyncpa [#allocation7 + $0x1], 1 }

</bundles_post_ra>
